<compile_context>
chip_gen: v7x
topology: tpu7x:2x2x1
jax: 0.10.0
libtpu: 0.0.40
codegen_flags: <defaults>
</compile_context>

<pallas_src>
import functools
import math

import numpy as np

import jax
import jax.numpy as jnp
from jax import lax
from jax.experimental import pallas as pl
from jax.experimental.pallas import tpu as pltpu


_LN_EPS = 1e-12                      # ESPnet LayerNorm eps
_VMEM_LIMIT = 32 * 1024 * 1024       # raises v5e's 16 MiB scoped default


def _cparams(ndims):
    return pltpu.CompilerParams(
        dimension_semantics=("parallel",) * ndims,
        vmem_limit_bytes=_VMEM_LIMIT)


def _t_tile(t):
    """Largest 8-aligned tile dividing t, else the full extent."""
    for cand in (256, 128, 64, 32, 16, 8):
        if t >= cand and t % cand == 0:
            return cand
    return t


# --------------------- fused subsampling + embed kernel ----------------------

def _subsample_embed_kernel(xe_ref, xo_ref, w1_ref, b1_ref, w2_ref, b2_ref,
                            we_ref, be_ref, pe_ref, o_ref,
                            *, f2, c, t2, d, xscale):
    # conv1 (banded, lane-dense matmul) computed separately for the even/odd
    # conv1 output rows so conv2's stride-2 time access needs no strided loads.
    def conv1_phase(xp_ref):
        acc = None
        for di in range(3):
            xv = xp_ref[0, di].astype(jnp.bfloat16)          # (rows, idim)
            part = jnp.dot(xv, w1_ref[di],
                           preferred_element_type=jnp.float32)
            acc = part if acc is None else acc + part
        return jnp.maximum(acc + b1_ref[...], 0.0).astype(jnp.bfloat16)

    he = conv1_phase(xe_ref)      # (t2+1, f1*c): conv1 rows 0,2,4,...
    ho = conv1_phase(xo_ref)      # (t2,   f1*c): conv1 rows 1,3,5,...

    # conv2 + ReLU + embed linear, accumulated per output-frequency column so
    # nothing needs an in-kernel reshape; embed matmul folded per column.
    emb = None
    for f in range(f2):
        col = None
        for di in range(3):
            for dj in range(3):
                lo = (2 * f + dj) * c
                if di == 1:
                    patch = ho[:, lo:lo + c]                  # conv1 row 2t+1
                else:
                    toff = di // 2                            # 0 -> 2t, 1 -> 2t+2
                    patch = he[toff:toff + t2, lo:lo + c]
                w_tap = w2_ref[(di * 3 + dj) * c:(di * 3 + dj + 1) * c, :]
                part = jnp.dot(patch, w_tap,
                               preferred_element_type=jnp.float32)
                col = part if col is None else col + part
        col = jnp.maximum(col + b2_ref[...], 0.0).astype(jnp.bfloat16)
        part = jnp.dot(col, we_ref[f * c:(f + 1) * c, :],
                       preferred_element_type=jnp.float32)
        emb = part if emb is None else emb + part
    o_ref[0] = (emb + be_ref[...]) * xscale + pe_ref[...]


def subsample_embed(xe, xo, prep, pe, *, adim, f1, f2, t2, xscale):
    b = xe.shape[0]
    idim = xe.shape[-1]
    kernel = functools.partial(_subsample_embed_kernel, f2=f2, c=adim, t2=t2,
                               d=adim, xscale=xscale)
    return pl.pallas_call(
        kernel,
        out_shape=jax.ShapeDtypeStruct((b, t2, adim), jnp.float32),
        grid=(b,),
        in_specs=[pl.BlockSpec((1, 3, t2 + 1, idim), lambda i: (i, 0, 0, 0)),
                  pl.BlockSpec((1, 3, t2, idim), lambda i: (i, 0, 0, 0)),
                  pl.BlockSpec((3, idim, f1 * adim), lambda i: (0, 0, 0)),
                  pl.BlockSpec((1, f1 * adim), lambda i: (0, 0)),
                  pl.BlockSpec((9 * adim, adim), lambda i: (0, 0)),
                  pl.BlockSpec((1, adim), lambda i: (0, 0)),
                  pl.BlockSpec((f2 * adim, adim), lambda i: (0, 0)),
                  pl.BlockSpec((1, adim), lambda i: (0, 0)),
                  pl.BlockSpec((t2, adim), lambda i: (0, 0))],
        out_specs=pl.BlockSpec((1, t2, adim), lambda i: (i, 0, 0)),
        compiler_params=_cparams(1),
    )(xe, xo, prep["w1band"], prep["b1"], prep["w2"], prep["b2"],
      prep["embed_w"], prep["embed_b"], pe)


# ------------------ fused LN + QKV + MHSA + Wo + residual --------------------

def _attn_layer_kernel(h_ref, g_ref, b_ref, wqkv_ref, bqkv_ref, kb_ref,
                       wo_ref, bo_ref, o_ref, ctx_scr,
                       *, nheads, d_k, scale, eps):
    x = h_ref[0]                                             # (T, D) f32
    mean = jnp.mean(x, axis=-1, keepdims=True)
    xc = x - mean
    var = jnp.mean(xc * xc, axis=-1, keepdims=True)
    hn = (xc * lax.rsqrt(var + eps) * g_ref[...] + b_ref[...]
          ).astype(jnp.bfloat16)
    qkv = (jnp.dot(hn, wqkv_ref[...], preferred_element_type=jnp.float32)
           + bqkv_ref[...]).astype(jnp.bfloat16)             # (T, 3D)
    key_bias = kb_ref[0]                                     # (1, T) f32
    d = nheads * d_k
    for h in range(nheads):
        qh = qkv[:, h * d_k:(h + 1) * d_k]
        kh = qkv[:, d + h * d_k:d + (h + 1) * d_k]
        vh = qkv[:, 2 * d + h * d_k:2 * d + (h + 1) * d_k]
        s = lax.dot_general(qh, kh, (((1,), (1,)), ((), ())),
                            preferred_element_type=jnp.float32) * scale
        s = s + key_bias                                     # (T, T) f32
        mx = jnp.max(s, axis=-1, keepdims=True)
        p = jnp.exp(s - mx)
        denom = jnp.sum(p, axis=-1, keepdims=True)
        attn = (p * pl.reciprocal(denom, approx=True)).astype(jnp.bfloat16)
        ctx_scr[:, h * d_k:(h + 1) * d_k] = jnp.dot(
            attn, vh, preferred_element_type=jnp.float32).astype(jnp.bfloat16)
    out = jnp.dot(ctx_scr[...], wo_ref[...],
                  preferred_element_type=jnp.float32)        # single K=D matmul
    o_ref[0] = x + out + bo_ref[...]


def attention_layer(h3, key_bias3, lp, *, nheads, d_k):
    b, t, d = h3.shape
    kernel = functools.partial(_attn_layer_kernel, nheads=nheads, d_k=d_k,
                               scale=1.0 / math.sqrt(d_k), eps=_LN_EPS)
    return pl.pallas_call(
        kernel,
        out_shape=jax.ShapeDtypeStruct((b, t, d), jnp.float32),
        grid=(b,),
        in_specs=[pl.BlockSpec((1, t, d), lambda i: (i, 0, 0)),
                  pl.BlockSpec((1, d), lambda i: (0, 0)),
                  pl.BlockSpec((1, d), lambda i: (0, 0)),
                  pl.BlockSpec((d, 3 * d), lambda i: (0, 0)),
                  pl.BlockSpec((1, 3 * d), lambda i: (0, 0)),
                  pl.BlockSpec((1, 1, t), lambda i: (i, 0, 0)),
                  pl.BlockSpec((d, d), lambda i: (0, 0)),
                  pl.BlockSpec((1, d), lambda i: (0, 0))],
        out_specs=pl.BlockSpec((1, t, d), lambda i: (i, 0, 0)),
        scratch_shapes=[pltpu.VMEM((t, d), jnp.bfloat16)],
        compiler_params=_cparams(1),
    )(h3, lp["ln1_g"], lp["ln1_b"], lp["wqkv"], lp["bqkv"], key_bias3,
      lp["wo"], lp["bo"])


# ---------------------- fused LN + FFN + residual ----------------------------

def _ln_ffn_kernel(h_ref, g_ref, b_ref, w1_ref, b1_ref, w2_ref, b2_ref, o_ref,
                   *, eps):
    x = h_ref[0]
    mean = jnp.mean(x, axis=-1, keepdims=True)
    xc = x - mean
    var = jnp.mean(xc * xc, axis=-1, keepdims=True)
    hn = (xc * lax.rsqrt(var + eps) * g_ref[...] + b_ref[...]
          ).astype(jnp.bfloat16)
    a = jnp.dot(hn, w1_ref[...], preferred_element_type=jnp.float32) + b1_ref[...]
    a = jnp.maximum(a, 0.0).astype(jnp.bfloat16)
    y = jnp.dot(a, w2_ref[...], preferred_element_type=jnp.float32) + b2_ref[...]
    o_ref[0] = x + y


def ln_ffn(h3, lp):
    b, t, d = h3.shape
    e = lp["ffn_w1"].shape[1]
    tq = _t_tile(t)
    return pl.pallas_call(
        functools.partial(_ln_ffn_kernel, eps=_LN_EPS),
        out_shape=jax.ShapeDtypeStruct((b, t, d), jnp.float32),
        grid=(b, t // tq),
        in_specs=[pl.BlockSpec((1, tq, d), lambda i, j: (i, j, 0)),
                  pl.BlockSpec((1, d), lambda i, j: (0, 0)),
                  pl.BlockSpec((1, d), lambda i, j: (0, 0)),
                  pl.BlockSpec((d, e), lambda i, j: (0, 0)),
                  pl.BlockSpec((1, e), lambda i, j: (0, 0)),
                  pl.BlockSpec((e, d), lambda i, j: (0, 0)),
                  pl.BlockSpec((1, d), lambda i, j: (0, 0))],
        out_specs=pl.BlockSpec((1, tq, d), lambda i, j: (i, j, 0)),
        compiler_params=_cparams(2),
    )(h3, lp["ln2_g"], lp["ln2_b"], lp["ffn_w1"], lp["ffn_b1"],
      lp["ffn_w2"], lp["ffn_b2"])


# ------------------------------ final LayerNorm ------------------------------

def _layernorm_kernel(x_ref, g_ref, b_ref, o_ref, *, eps):
    x = x_ref[0]
    mean = jnp.mean(x, axis=-1, keepdims=True)
    xc = x - mean
    var = jnp.mean(xc * xc, axis=-1, keepdims=True)
    o_ref[0] = xc * lax.rsqrt(var + eps) * g_ref[...] + b_ref[...]


def layer_norm(x3, g, b):
    bsz, t, d = x3.shape
    tq = _t_tile(t)
    return pl.pallas_call(
        functools.partial(_layernorm_kernel, eps=_LN_EPS),
        out_shape=jax.ShapeDtypeStruct((bsz, t, d), jnp.float32),
        grid=(bsz, t // tq),
        in_specs=[pl.BlockSpec((1, tq, d), lambda i, j: (i, j, 0)),
                  pl.BlockSpec((1, d), lambda i, j: (0, 0)),
                  pl.BlockSpec((1, d), lambda i, j: (0, 0))],
        out_specs=pl.BlockSpec((1, tq, d), lambda i, j: (i, j, 0)),
        compiler_params=_cparams(2),
    )(x3, g, b)


# ------------------------------- JAX glue ------------------------------------

def make_positional_encoding(t, d):
    position = jnp.arange(t, dtype=jnp.float32)[:, None]
    div_term = jnp.exp(jnp.arange(0, d, 2, dtype=jnp.float32)
                       * -(math.log(10000.0) / d))
    pe = jnp.zeros((t, d), jnp.float32)
    pe = pe.at[:, 0::2].set(jnp.sin(position * div_term))
    pe = pe.at[:, 1::2].set(jnp.cos(position * div_term))
    return pe


def init_params(key, idim, adim, aheads, eunits, elayers):
    f1 = (idim - 1) // 2
    f2 = (f1 - 1) // 2
    keys = list(jax.random.split(key, 3 + 6 * elayers))
    kit = iter(keys)

    def dense(shape, fan_in):
        return jax.random.normal(next(kit), shape, jnp.float32) / math.sqrt(fan_in)

    z = lambda *s: jnp.zeros(s, jnp.float32)
    o = lambda *s: jnp.ones(s, jnp.float32)

    params = {
        "conv1_w": dense((adim, 1, 3, 3), 9),            "conv1_b": z(adim),
        "conv2_w": dense((adim, adim, 3, 3), adim * 9),  "conv2_b": z(adim),
        "embed_w": dense((adim * f2, adim), adim * f2),  "embed_b": z(adim),
        "after_g": o(adim), "after_b": z(adim),
        "layers": [],
    }
    for _ in range(elayers):
        params["layers"].append({
            "ln1_g": o(adim), "ln1_b": z(adim),
            "wq": dense((adim, adim), adim), "bq": z(adim),
            "wk": dense((adim, adim), adim), "bk": z(adim),
            "wv": dense((adim, adim), adim), "bv": z(adim),
            "wo": dense((adim, adim), adim), "bo": z(adim),
            "ln2_g": o(adim), "ln2_b": z(adim),
            "ffn_w1": dense((adim, eunits), adim), "ffn_b1": z(eunits),
            "ffn_w2": dense((eunits, adim), eunits), "ffn_b2": z(adim),
        })
    return params


def prepare_params(params, idim, adim):
    """One-time: build the banded conv1 weight, fuse Q/K/V, cast weights to
    bf16, reorder conv/embed weights to the layouts the kernels consume."""
    f1 = (idim - 1) // 2
    f2 = (f1 - 1) // 2
    bf = lambda a: jnp.asarray(a).astype(jnp.bfloat16)
    row = lambda a: jnp.asarray(a).reshape(1, -1).astype(jnp.float32)

    # banded conv1 weight: band[di][2*f+dj, f*adim + c] = w1[c, 0, di, dj]
    w1 = np.asarray(params["conv1_w"], np.float32)           # (C, 1, 3, 3)
    band = np.zeros((3, idim, f1, adim), np.float32)
    f_idx = np.arange(f1)
    for di in range(3):
        for dj in range(3):
            band[di, 2 * f_idx + dj, f_idx, :] = w1[:, 0, di, dj][None, :]

    # embed weight rows reordered from torch's (c*F2 + f) to the kernel's (f*adim + c)
    emb = params["embed_w"].reshape(adim, f2, adim).transpose(1, 0, 2)

    prep = {
        "w1band": bf(band.reshape(3, idim, f1 * adim)),
        "b1": row(jnp.tile(params["conv1_b"], f1)),
        "w2": bf(params["conv2_w"].transpose(2, 3, 1, 0).reshape(9 * adim, adim)),
        "b2": row(params["conv2_b"]),
        "embed_w": bf(emb.reshape(f2 * adim, adim)),
        "embed_b": row(params["embed_b"]),
        "after_g": row(params["after_g"]), "after_b": row(params["after_b"]),
        "layers": [],
    }
    for lp in params["layers"]:
        wqkv = jnp.concatenate([lp["wq"], lp["wk"], lp["wv"]], axis=1)
        bqkv = jnp.concatenate([lp["bq"], lp["bk"], lp["bv"]], axis=0)
        prep["layers"].append({
            "ln1_g": row(lp["ln1_g"]), "ln1_b": row(lp["ln1_b"]),
            "wqkv": bf(wqkv), "bqkv": row(bqkv),
            "wo": bf(lp["wo"]), "bo": row(lp["bo"]),
            "ln2_g": row(lp["ln2_g"]), "ln2_b": row(lp["ln2_b"]),
            "ffn_w1": bf(lp["ffn_w1"]), "ffn_b1": row(lp["ffn_b1"]),
            "ffn_w2": bf(lp["ffn_w2"]), "ffn_b2": row(lp["ffn_b2"]),
        })
    return prep


@functools.partial(jax.jit, static_argnames=("adim", "aheads"))
def _forward_core(prep, x, ilens, *, adim, aheads):
    bsz, t, idim = x.shape
    x = x.astype(jnp.float32)
    t1 = (t - 1) // 2
    t2 = (t1 - 1) // 2
    f1 = (idim - 1) // 2
    f2 = (f1 - 1) // 2

    # padding mask, its conv-style subsampling ([:, :-2:2] twice) and the
    # additive key bias (computed ONCE, reused by every layer).
    t_idx = jnp.arange(t)
    src_mask = t_idx[None, :] < ilens[:, None]               # (B, T) bool
    mask = src_mask[:, :-2:2][:, :-2:2]                      # (B, T2) bool
    assert mask.shape[1] == t2
    key_bias3 = jnp.where(mask, 0.0, -1e30).astype(jnp.float32
                                                   ).reshape(bsz, 1, t2)

    # time-phase row slices of the (tiny) raw input so the fused subsampling
    # kernel never needs strided access: xe[b, di, tt] = x[b, 4*tt + di],
    # xo[b, di, tt] = x[b, 4*tt + 2 + di]   (conv1 output rows 2*tt / 2*tt+1)
    xe = jnp.stack([x[:, di::4, :][:, :t2 + 1] for di in range(3)], axis=1)
    xo = jnp.stack([x[:, 2 + di::4, :][:, :t2] for di in range(3)], axis=1)

    pe = make_positional_encoding(t2, adim)
    h = subsample_embed(xe, xo, prep, pe, adim=adim, f1=f1, f2=f2, t2=t2,
                        xscale=math.sqrt(adim))              # (B, T2, D) f32

    d_k = adim // aheads
    # pre-norm transformer encoder blocks: 2 fused pallas_calls per layer
    for lp in prep["layers"]:
        h = attention_layer(h, key_bias3, lp, nheads=aheads, d_k=d_k)
        h = ln_ffn(h, lp)

    hs_pad = layer_norm(h, prep["after_g"], prep["after_b"])
    return hs_pad, mask                                      # == hs_mask.squeeze(-2)


def e2e_forward(prep, xs_pad, ilens, *, adim, aheads):
    # xs_pad[:, :max(ilens)] is a data-dependent shape -> done eagerly on host;
    # everything downstream is a single jit trace per input length.
    t = int(jax.device_get(jnp.max(ilens)))
    x = xs_pad[:, :t, :]
    return _forward_core(prep, x, ilens, adim=adim, aheads=aheads)


if __name__ == "__main__":
    key = jax.random.PRNGKey(0)
    B, Tmax, idim = 2, 30, 20
    adim, aheads, eunits, elayers = 32, 4, 64, 2

    k_param, k_x = jax.random.split(key)
    params = init_params(k_param, idim, adim, aheads, eunits, elayers)
    prep = prepare_params(params, idim, adim)

    xs_pad = jax.random.normal(k_x, (B, Tmax, idim), jnp.float32)
    ilens = jnp.array([30, 17], dtype=jnp.int32)

    hs_pad, hs_mask = e2e_forward(prep, xs_pad, ilens, adim=adim, aheads=aheads)
    jax.block_until_ready(hs_pad)
    jax.block_until_ready(hs_mask)

    T2 = ((Tmax - 1) // 2 - 1) // 2
    assert hs_pad.shape == (B, T2, adim), hs_pad.shape
    assert hs_mask.shape == (B, T2), hs_mask.shape
    assert bool(jnp.all(jnp.isfinite(hs_pad)))
    print("KERNEL_OK")
</pallas_src>

<mosaic_0001>
module attributes {stable_mosaic.version = 11 : i64} {
  func.func @_ln_ffn_kernel(%arg0: i32, %arg1: i32, %arg2: memref<1x6x32xf32, #tpu.memory_space<vmem>>, %arg3: memref<1x32xf32, #tpu.memory_space<vmem>>, %arg4: memref<1x32xf32, #tpu.memory_space<vmem>>, %arg5: memref<32x64xbf16, #tpu.memory_space<vmem>>, %arg6: memref<1x64xf32, #tpu.memory_space<vmem>>, %arg7: memref<64x32xbf16, #tpu.memory_space<vmem>>, %arg8: memref<1x32xf32, #tpu.memory_space<vmem>>, %arg9: memref<1x6x32xf32, #tpu.memory_space<vmem>>) attributes {dimension_semantics = [#tpu.dimension_semantics<parallel>, #tpu.dimension_semantics<parallel>], iteration_bounds = array<i64: 2, 1>, scalar_prefetch = 0 : i64, scratch_operands = 0 : i64, tpu.core_type = #tpu.core_type<tc>, window_params = [{transform_indices = @transform_0, window_bounds = array<i64: 1, 6, 32>}, {pipeline_mode = #tpu.pipeline_mode<synchronous>, transform_indices = @transform_1, window_bounds = array<i64: 1, 32>}, {pipeline_mode = #tpu.pipeline_mode<synchronous>, transform_indices = @transform_2, window_bounds = array<i64: 1, 32>}, {pipeline_mode = #tpu.pipeline_mode<synchronous>, transform_indices = @transform_3, window_bounds = array<i64: 32, 64>}, {pipeline_mode = #tpu.pipeline_mode<synchronous>, transform_indices = @transform_4, window_bounds = array<i64: 1, 64>}, {pipeline_mode = #tpu.pipeline_mode<synchronous>, transform_indices = @transform_5, window_bounds = array<i64: 64, 32>}, {pipeline_mode = #tpu.pipeline_mode<synchronous>, transform_indices = @transform_6, window_bounds = array<i64: 1, 32>}, {transform_indices = @transform_7, window_bounds = array<i64: 1, 6, 32>}]} {
    %c0 = arith.constant 0 : index
    %c0_0 = arith.constant 0 : index
    %c0_1 = arith.constant 0 : index
    %0 = vector.load %arg2[%c0, %c0_0, %c0_1] : memref<1x6x32xf32, #tpu.memory_space<vmem>>, vector<1x6x32xf32>
    %1 = vector.shape_cast %0 : vector<1x6x32xf32> to vector<6x32xf32>
    %cst = arith.constant dense<0.000000e+00> : vector<6xf32>
    %2 = vector.multi_reduction <add>, %1, %cst [1] : vector<6x32xf32> to vector<6xf32>
    %3 = vector.shape_cast %2 : vector<6xf32> to vector<6x1xf32>
    %cst_2 = arith.constant 3.200000e+01 : f32
    %4 = vector.broadcast %cst_2 : f32 to vector<6x1xf32>
    %5 = arith.divf %3, %4 : vector<6x1xf32>
    %6 = vector.broadcast %5 : vector<6x1xf32> to vector<6x32xf32>
    %7 = arith.subf %1, %6 : vector<6x32xf32>
    %8 = arith.mulf %7, %7 : vector<6x32xf32>
    %cst_3 = arith.constant dense<0.000000e+00> : vector<6xf32>
    %9 = vector.multi_reduction <add>, %8, %cst_3 [1] : vector<6x32xf32> to vector<6xf32>
    %10 = vector.shape_cast %9 : vector<6xf32> to vector<6x1xf32>
    %cst_4 = arith.constant 3.200000e+01 : f32
    %11 = vector.broadcast %cst_4 : f32 to vector<6x1xf32>
    %12 = arith.divf %10, %11 : vector<6x1xf32>
    %cst_5 = arith.constant 9.99999996E-13 : f32
    %13 = vector.broadcast %cst_5 : f32 to vector<6x1xf32>
    %14 = arith.addf %12, %13 : vector<6x1xf32>
    %15 = math.rsqrt %14 : vector<6x1xf32>
    %16 = vector.broadcast %15 : vector<6x1xf32> to vector<6x32xf32>
    %17 = arith.mulf %7, %16 : vector<6x32xf32>
    %c0_6 = arith.constant 0 : index
    %c0_7 = arith.constant 0 : index
    %18 = vector.load %arg3[%c0_6, %c0_7] : memref<1x32xf32, #tpu.memory_space<vmem>>, vector<1x32xf32>
    %19 = vector.broadcast %18 : vector<1x32xf32> to vector<6x32xf32>
    %20 = arith.mulf %17, %19 : vector<6x32xf32>
    %c0_8 = arith.constant 0 : index
    %c0_9 = arith.constant 0 : index
    %21 = vector.load %arg4[%c0_8, %c0_9] : memref<1x32xf32, #tpu.memory_space<vmem>>, vector<1x32xf32>
    %22 = vector.broadcast %21 : vector<1x32xf32> to vector<6x32xf32>
    %23 = arith.addf %20, %22 : vector<6x32xf32>
    %24 = arith.truncf %23 : vector<6x32xf32> to vector<6x32xbf16>
    %c0_10 = arith.constant 0 : index
    %c0_11 = arith.constant 0 : index
    %25 = vector.load %arg5[%c0_10, %c0_11] : memref<32x64xbf16, #tpu.memory_space<vmem>>, vector<32x64xbf16>
    %cst_12 = arith.constant dense<0.000000e+00> : vector<6x64xf32>
    %26 = tpu.matmul %24, %25, %cst_12 {dimension_numbers = #tpu.dot_dimension_numbers<[1], [0], [0], [1], [0, 0, 1, 1], [], []>} : vector<6x32xbf16>, vector<32x64xbf16>, vector<6x64xf32> -> vector<6x64xf32>
    %c0_13 = arith.constant 0 : index
    %c0_14 = arith.constant 0 : index
    %27 = vector.load %arg6[%c0_13, %c0_14] : memref<1x64xf32, #tpu.memory_space<vmem>>, vector<1x64xf32>
    %28 = vector.broadcast %27 : vector<1x64xf32> to vector<6x64xf32>
    %29 = arith.addf %26, %28 : vector<6x64xf32>
    %cst_15 = arith.constant 0.000000e+00 : f32
    %30 = vector.broadcast %cst_15 : f32 to vector<6x64xf32>
    %31 = arith.maximumf %29, %30 : vector<6x64xf32>
    %32 = arith.truncf %31 : vector<6x64xf32> to vector<6x64xbf16>
    %c0_16 = arith.constant 0 : index
    %c0_17 = arith.constant 0 : index
    %33 = vector.load %arg7[%c0_16, %c0_17] : memref<64x32xbf16, #tpu.memory_space<vmem>>, vector<64x32xbf16>
    %cst_18 = arith.constant dense<0.000000e+00> : vector<6x32xf32>
    %34 = tpu.matmul %32, %33, %cst_18 {dimension_numbers = #tpu.dot_dimension_numbers<[1], [0], [0], [1], [0, 0, 1, 1], [], []>} : vector<6x64xbf16>, vector<64x32xbf16>, vector<6x32xf32> -> vector<6x32xf32>
    %c0_19 = arith.constant 0 : index
    %c0_20 = arith.constant 0 : index
    %35 = vector.load %arg8[%c0_19, %c0_20] : memref<1x32xf32, #tpu.memory_space<vmem>>, vector<1x32xf32>
    %36 = vector.broadcast %35 : vector<1x32xf32> to vector<6x32xf32>
    %37 = arith.addf %34, %36 : vector<6x32xf32>
    %38 = arith.addf %1, %37 : vector<6x32xf32>
    %c0_21 = arith.constant 0 : index
    %c0_22 = arith.constant 0 : index
    %c0_23 = arith.constant 0 : index
    %39 = vector.load %arg9[%c0_21, %c0_22, %c0_23] : memref<1x6x32xf32, #tpu.memory_space<vmem>>, vector<1x6x32xf32>
    %40 = vector.shape_cast %39 : vector<1x6x32xf32> to vector<6x32xf32>
    %41 = vector.shape_cast %38 : vector<6x32xf32> to vector<1x6x32xf32>
    tpu.vector_store %arg9[%c0_21, %c0_22, %c0_23], %41 {strides = array<i32>} : memref<1x6x32xf32, #tpu.memory_space<vmem>>, vector<1x6x32xf32>,
    return
  }
  func.func @transform_0(%arg0: i32, %arg1: i32) -> (i32, i32, i32) {
    %c0_i32 = arith.constant 0 : i32
    %c0_i32_0 = arith.constant 0 : i32
    return %arg0, %arg1, %c0_i32 : i32, i32, i32
  }
  func.func @transform_1(%arg0: i32, %arg1: i32) -> (i32, i32) {
    %c0_i32 = arith.constant 0 : i32
    %c0_i32_0 = arith.constant 0 : i32
    %c0_i32_1 = arith.constant 0 : i32
    return %c0_i32, %c0_i32_0 : i32, i32
  }
  func.func @transform_2(%arg0: i32, %arg1: i32) -> (i32, i32) {
    %c0_i32 = arith.constant 0 : i32
    %c0_i32_0 = arith.constant 0 : i32
    %c0_i32_1 = arith.constant 0 : i32
    return %c0_i32, %c0_i32_0 : i32, i32
  }
  func.func @transform_3(%arg0: i32, %arg1: i32) -> (i32, i32) {
    %c0_i32 = arith.constant 0 : i32
    %c0_i32_0 = arith.constant 0 : i32
    %c0_i32_1 = arith.constant 0 : i32
    return %c0_i32, %c0_i32_0 : i32, i32
  }
  func.func @transform_4(%arg0: i32, %arg1: i32) -> (i32, i32) {
    %c0_i32 = arith.constant 0 : i32
    %c0_i32_0 = arith.constant 0 : i32
    %c0_i32_1 = arith.constant 0 : i32
    return %c0_i32, %c0_i32_0 : i32, i32
  }
  func.func @transform_5(%arg0: i32, %arg1: i32) -> (i32, i32) {
    %c0_i32 = arith.constant 0 : i32
    %c0_i32_0 = arith.constant 0 : i32
    %c0_i32_1 = arith.constant 0 : i32
    return %c0_i32, %c0_i32_0 : i32, i32
  }
  func.func @transform_6(%arg0: i32, %arg1: i32) -> (i32, i32) {
    %c0_i32 = arith.constant 0 : i32
    %c0_i32_0 = arith.constant 0 : i32
    %c0_i32_1 = arith.constant 0 : i32
    return %c0_i32, %c0_i32_0 : i32, i32
  }
  func.func @transform_7(%arg0: i32, %arg1: i32) -> (i32, i32, i32) {
    %c0_i32 = arith.constant 0 : i32
    %c0_i32_0 = arith.constant 0 : i32
    return %arg0, %arg1, %c0_i32 : i32, i32, i32
  }
}

module attributes {stable_mosaic.version = 11 : i64} {
  func.func @_attn_layer_kernel(%arg0: i32, %arg1: memref<1x6x32xf32, #tpu.memory_space<vmem>>, %arg2: memref<1x32xf32, #tpu.memory_space<vmem>>, %arg3: memref<1x32xf32, #tpu.memory_space<vmem>>, %arg4: memref<32x96xbf16, #tpu.memory_space<vmem>>, %arg5: memref<1x96xf32, #tpu.memory_space<vmem>>, %arg6: memref<1x1x6xf32, #tpu.memory_space<vmem>>, %arg7: memref<32x32xbf16, #tpu.memory_space<vmem>>, %arg8: memref<1x32xf32, #tpu.memory_space<vmem>>, %arg9: memref<1x6x32xf32, #tpu.memory_space<vmem>>, %arg10: memref<6x32xbf16, #tpu.memory_space<vmem>>) attributes {dimension_semantics = [#tpu.dimension_semantics<parallel>], iteration_bounds = array<i64: 2>, scalar_prefetch = 0 : i64, scratch_operands = 1 : i64, tpu.core_type = #tpu.core_type<tc>, window_params = [{transform_indices = @transform_0, window_bounds = array<i64: 1, 6, 32>}, {pipeline_mode = #tpu.pipeline_mode<synchronous>, transform_indices = @transform_1, window_bounds = array<i64: 1, 32>}, {pipeline_mode = #tpu.pipeline_mode<synchronous>, transform_indices = @transform_2, window_bounds = array<i64: 1, 32>}, {pipeline_mode = #tpu.pipeline_mode<synchronous>, transform_indices = @transform_3, window_bounds = array<i64: 32, 96>}, {pipeline_mode = #tpu.pipeline_mode<synchronous>, transform_indices = @transform_4, window_bounds = array<i64: 1, 96>}, {transform_indices = @transform_5, window_bounds = array<i64: 1, 1, 6>}, {pipeline_mode = #tpu.pipeline_mode<synchronous>, transform_indices = @transform_6, window_bounds = array<i64: 32, 32>}, {pipeline_mode = #tpu.pipeline_mode<synchronous>, transform_indices = @transform_7, window_bounds = array<i64: 1, 32>}, {transform_indices = @transform_8, window_bounds = array<i64: 1, 6, 32>}]} {
    %c0 = arith.constant 0 : index
    %c0_0 = arith.constant 0 : index
    %c0_1 = arith.constant 0 : index
    %0 = vector.load %arg1[%c0, %c0_0, %c0_1] : memref<1x6x32xf32, #tpu.memory_space<vmem>>, vector<1x6x32xf32>
    %1 = vector.shape_cast %0 : vector<1x6x32xf32> to vector<6x32xf32>
    %cst = arith.constant dense<0.000000e+00> : vector<6xf32>
    %2 = vector.multi_reduction <add>, %1, %cst [1] : vector<6x32xf32> to vector<6xf32>
    %3 = vector.shape_cast %2 : vector<6xf32> to vector<6x1xf32>
    %cst_2 = arith.constant 3.200000e+01 : f32
    %4 = vector.broadcast %cst_2 : f32 to vector<6x1xf32>
    %5 = arith.divf %3, %4 : vector<6x1xf32>
    %6 = vector.broadcast %5 : vector<6x1xf32> to vector<6x32xf32>
    %7 = arith.subf %1, %6 : vector<6x32xf32>
    %8 = arith.mulf %7, %7 : vector<6x32xf32>
    %cst_3 = arith.constant dense<0.000000e+00> : vector<6xf32>
    %9 = vector.multi_reduction <add>, %8, %cst_3 [1] : vector<6x32xf32> to vector<6xf32>
    %10 = vector.shape_cast %9 : vector<6xf32> to vector<6x1xf32>
    %cst_4 = arith.constant 3.200000e+01 : f32
    %11 = vector.broadcast %cst_4 : f32 to vector<6x1xf32>
    %12 = arith.divf %10, %11 : vector<6x1xf32>
    %cst_5 = arith.constant 9.99999996E-13 : f32
    %13 = vector.broadcast %cst_5 : f32 to vector<6x1xf32>
    %14 = arith.addf %12, %13 : vector<6x1xf32>
    %15 = math.rsqrt %14 : vector<6x1xf32>
    %16 = vector.broadcast %15 : vector<6x1xf32> to vector<6x32xf32>
    %17 = arith.mulf %7, %16 : vector<6x32xf32>
    %c0_6 = arith.constant 0 : index
    %c0_7 = arith.constant 0 : index
    %18 = vector.load %arg2[%c0_6, %c0_7] : memref<1x32xf32, #tpu.memory_space<vmem>>, vector<1x32xf32>
    %19 = vector.broadcast %18 : vector<1x32xf32> to vector<6x32xf32>
    %20 = arith.mulf %17, %19 : vector<6x32xf32>
    %c0_8 = arith.constant 0 : index
    %c0_9 = arith.constant 0 : index
    %21 = vector.load %arg3[%c0_8, %c0_9] : memref<1x32xf32, #tpu.memory_space<vmem>>, vector<1x32xf32>
    %22 = vector.broadcast %21 : vector<1x32xf32> to vector<6x32xf32>
    %23 = arith.addf %20, %22 : vector<6x32xf32>
    %24 = arith.truncf %23 : vector<6x32xf32> to vector<6x32xbf16>
    %c0_10 = arith.constant 0 : index
    %c0_11 = arith.constant 0 : index
    %25 = vector.load %arg4[%c0_10, %c0_11] : memref<32x96xbf16, #tpu.memory_space<vmem>>, vector<32x96xbf16>
    %cst_12 = arith.constant dense<0.000000e+00> : vector<6x96xf32>
    %26 = tpu.matmul %24, %25, %cst_12 {dimension_numbers = #tpu.dot_dimension_numbers<[1], [0], [0], [1], [0, 0, 1, 1], [], []>} : vector<6x32xbf16>, vector<32x96xbf16>, vector<6x96xf32> -> vector<6x96xf32>
    %c0_13 = arith.constant 0 : index
    %c0_14 = arith.constant 0 : index
    %27 = vector.load %arg5[%c0_13, %c0_14] : memref<1x96xf32, #tpu.memory_space<vmem>>, vector<1x96xf32>
    %28 = vector.broadcast %27 : vector<1x96xf32> to vector<6x96xf32>
    %29 = arith.addf %26, %28 : vector<6x96xf32>
    %30 = arith.truncf %29 : vector<6x96xf32> to vector<6x96xbf16>
    %c0_15 = arith.constant 0 : index
    %c0_16 = arith.constant 0 : index
    %c0_17 = arith.constant 0 : index
    %31 = vector.load %arg6[%c0_15, %c0_16, %c0_17] : memref<1x1x6xf32, #tpu.memory_space<vmem>>, vector<1x1x6xf32>
    %32 = vector.shape_cast %31 : vector<1x1x6xf32> to vector<1x6xf32>
    %33 = vector.extract_strided_slice %30 {offsets = [0, 0], sizes = [6, 8], strides = [1, 1]} : vector<6x96xbf16> to vector<6x8xbf16>
    %34 = vector.extract_strided_slice %30 {offsets = [0, 32], sizes = [6, 8], strides = [1, 1]} : vector<6x96xbf16> to vector<6x8xbf16>
    %35 = vector.extract_strided_slice %30 {offsets = [0, 64], sizes = [6, 8], strides = [1, 1]} : vector<6x96xbf16> to vector<6x8xbf16>
    %cst_18 = arith.constant dense<0.000000e+00> : vector<6x6xf32>
    %36 = tpu.matmul %33, %34, %cst_18 {dimension_numbers = #tpu.dot_dimension_numbers<[1], [1], [0], [0], [0, 0, 1, 0], [], []>} : vector<6x8xbf16>, vector<6x8xbf16>, vector<6x6xf32> -> vector<6x6xf32>
    %cst_19 = arith.constant 0.353553385 : f32
    %37 = vector.broadcast %cst_19 : f32 to vector<6x6xf32>
    %38 = arith.mulf %36, %37 : vector<6x6xf32>
    %39 = vector.broadcast %32 : vector<1x6xf32> to vector<6x6xf32>
    %40 = arith.addf %38, %39 : vector<6x6xf32>
    %cst_20 = arith.constant dense<0xFF800000> : vector<6xf32>
    %41 = vector.multi_reduction <maximumf>, %40, %cst_20 [1] : vector<6x6xf32> to vector<6xf32>
    %42 = vector.shape_cast %41 : vector<6xf32> to vector<6x1xf32>
    %43 = vector.broadcast %42 : vector<6x1xf32> to vector<6x6xf32>
    %44 = arith.subf %40, %43 : vector<6x6xf32>
    %45 = math.exp %44 : vector<6x6xf32>
    %cst_21 = arith.constant dense<0.000000e+00> : vector<6xf32>
    %46 = vector.multi_reduction <add>, %45, %cst_21 [1] : vector<6x6xf32> to vector<6xf32>
    %47 = vector.shape_cast %46 : vector<6xf32> to vector<6x1xf32>
    %48 = tpu.reciprocal %47 {approx = true} : vector<6x1xf32> -> vector<6x1xf32>
    %49 = vector.broadcast %48 : vector<6x1xf32> to vector<6x6xf32>
    %50 = arith.mulf %45, %49 : vector<6x6xf32>
    %51 = arith.truncf %50 : vector<6x6xf32> to vector<6x6xbf16>
    %cst_22 = arith.constant dense<0.000000e+00> : vector<6x8xf32>
    %52 = tpu.matmul %51, %35, %cst_22 {dimension_numbers = #tpu.dot_dimension_numbers<[1], [0], [0], [1], [0, 0, 1, 1], [], []>} : vector<6x6xbf16>, vector<6x8xbf16>, vector<6x8xf32> -> vector<6x8xf32>
    %53 = arith.truncf %52 : vector<6x8xf32> to vector<6x8xbf16>
    %c0_23 = arith.constant 0 : index
    %c0_24 = arith.constant 0 : index
    %54 = vector.load %arg10[%c0_23, %c0_24] : memref<6x32xbf16, #tpu.memory_space<vmem>>, vector<6x8xbf16>
    tpu.vector_store %arg10[%c0_23, %c0_24], %53 {strides = array<i32>} : memref<6x32xbf16, #tpu.memory_space<vmem>>, vector<6x8xbf16>,
    %55 = vector.extract_strided_slice %30 {offsets = [0, 8], sizes = [6, 8], strides = [1, 1]} : vector<6x96xbf16> to vector<6x8xbf16>
    %56 = vector.extract_strided_slice %30 {offsets = [0, 40], sizes = [6, 8], strides = [1, 1]} : vector<6x96xbf16> to vector<6x8xbf16>
    %57 = vector.extract_strided_slice %30 {offsets = [0, 72], sizes = [6, 8], strides = [1, 1]} : vector<6x96xbf16> to vector<6x8xbf16>
    %cst_25 = arith.constant dense<0.000000e+00> : vector<6x6xf32>
    %58 = tpu.matmul %55, %56, %cst_25 {dimension_numbers = #tpu.dot_dimension_numbers<[1], [1], [0], [0], [0, 0, 1, 0], [], []>} : vector<6x8xbf16>, vector<6x8xbf16>, vector<6x6xf32> -> vector<6x6xf32>
    %cst_26 = arith.constant 0.353553385 : f32
    %59 = vector.broadcast %cst_26 : f32 to vector<6x6xf32>
    %60 = arith.mulf %58, %59 : vector<6x6xf32>
    %61 = vector.broadcast %32 : vector<1x6xf32> to vector<6x6xf32>
    %62 = arith.addf %60, %61 : vector<6x6xf32>
    %cst_27 = arith.constant dense<0xFF800000> : vector<6xf32>
    %63 = vector.multi_reduction <maximumf>, %62, %cst_27 [1] : vector<6x6xf32> to vector<6xf32>
    %64 = vector.shape_cast %63 : vector<6xf32> to vector<6x1xf32>
    %65 = vector.broadcast %64 : vector<6x1xf32> to vector<6x6xf32>
    %66 = arith.subf %62, %65 : vector<6x6xf32>
    %67 = math.exp %66 : vector<6x6xf32>
    %cst_28 = arith.constant dense<0.000000e+00> : vector<6xf32>
    %68 = vector.multi_reduction <add>, %67, %cst_28 [1] : vector<6x6xf32> to vector<6xf32>
    %69 = vector.shape_cast %68 : vector<6xf32> to vector<6x1xf32>
    %70 = tpu.reciprocal %69 {approx = true} : vector<6x1xf32> -> vector<6x1xf32>
    %71 = vector.broadcast %70 : vector<6x1xf32> to vector<6x6xf32>
    %72 = arith.mulf %67, %71 : vector<6x6xf32>
    %73 = arith.truncf %72 : vector<6x6xf32> to vector<6x6xbf16>
    %cst_29 = arith.constant dense<0.000000e+00> : vector<6x8xf32>
    %74 = tpu.matmul %73, %57, %cst_29 {dimension_numbers = #tpu.dot_dimension_numbers<[1], [0], [0], [1], [0, 0, 1, 1], [], []>} : vector<6x6xbf16>, vector<6x8xbf16>, vector<6x8xf32> -> vector<6x8xf32>
    %75 = arith.truncf %74 : vector<6x8xf32> to vector<6x8xbf16>
    %c0_30 = arith.constant 0 : index
    %c8 = arith.constant 8 : index
    %76 = vector.load %arg10[%c0_30, %c8] : memref<6x32xbf16, #tpu.memory_space<vmem>>, vector<6x8xbf16>
    tpu.vector_store %arg10[%c0_30, %c8], %75 {strides = array<i32>} : memref<6x32xbf16, #tpu.memory_space<vmem>>, vector<6x8xbf16>,
    %77 = vector.extract_strided_slice %30 {offsets = [0, 16], sizes = [6, 8], strides = [1, 1]} : vector<6x96xbf16> to vector<6x8xbf16>
    %78 = vector.extract_strided_slice %30 {offsets = [0, 48], sizes = [6, 8], strides = [1, 1]} : vector<6x96xbf16> to vector<6x8xbf16>
    %79 = vector.extract_strided_slice %30 {offsets = [0, 80], sizes = [6, 8], strides = [1, 1]} : vector<6x96xbf16> to vector<6x8xbf16>
    %cst_31 = arith.constant dense<0.000000e+00> : vector<6x6xf32>
    %80 = tpu.matmul %77, %78, %cst_31 {dimension_numbers = #tpu.dot_dimension_numbers<[1], [1], [0], [0], [0, 0, 1, 0], [], []>} : vector<6x8xbf16>, vector<6x8xbf16>, vector<6x6xf32> -> vector<6x6xf32>
    %cst_32 = arith.constant 0.353553385 : f32
    %81 = vector.broadcast %cst_32 : f32 to vector<6x6xf32>
    %82 = arith.mulf %80, %81 : vector<6x6xf32>
    %83 = vector.broadcast %32 : vector<1x6xf32> to vector<6x6xf32>
    %84 = arith.addf %82, %83 : vector<6x6xf32>
    %cst_33 = arith.constant dense<0xFF800000> : vector<6xf32>
    %85 = vector.multi_reduction <maximumf>, %84, %cst_33 [1] : vector<6x6xf32> to vector<6xf32>
    %86 = vector.shape_cast %85 : vector<6xf32> to vector<6x1xf32>
    %87 = vector.broadcast %86 : vector<6x1xf32> to vector<6x6xf32>
    %88 = arith.subf %84, %87 : vector<6x6xf32>
    %89 = math.exp %88 : vector<6x6xf32>
    %cst_34 = arith.constant dense<0.000000e+00> : vector<6xf32>
    %90 = vector.multi_reduction <add>, %89, %cst_34 [1] : vector<6x6xf32> to vector<6xf32>
    %91 = vector.shape_cast %90 : vector<6xf32> to vector<6x1xf32>
    %92 = tpu.reciprocal %91 {approx = true} : vector<6x1xf32> -> vector<6x1xf32>
    %93 = vector.broadcast %92 : vector<6x1xf32> to vector<6x6xf32>
    %94 = arith.mulf %89, %93 : vector<6x6xf32>
    %95 = arith.truncf %94 : vector<6x6xf32> to vector<6x6xbf16>
    %cst_35 = arith.constant dense<0.000000e+00> : vector<6x8xf32>
    %96 = tpu.matmul %95, %79, %cst_35 {dimension_numbers = #tpu.dot_dimension_numbers<[1], [0], [0], [1], [0, 0, 1, 1], [], []>} : vector<6x6xbf16>, vector<6x8xbf16>, vector<6x8xf32> -> vector<6x8xf32>
    %97 = arith.truncf %96 : vector<6x8xf32> to vector<6x8xbf16>
    %c0_36 = arith.constant 0 : index
    %c16 = arith.constant 16 : index
    %98 = vector.load %arg10[%c0_36, %c16] : memref<6x32xbf16, #tpu.memory_space<vmem>>, vector<6x8xbf16>
    tpu.vector_store %arg10[%c0_36, %c16], %97 {strides = array<i32>} : memref<6x32xbf16, #tpu.memory_space<vmem>>, vector<6x8xbf16>,
    %99 = vector.extract_strided_slice %30 {offsets = [0, 24], sizes = [6, 8], strides = [1, 1]} : vector<6x96xbf16> to vector<6x8xbf16>
    %100 = vector.extract_strided_slice %30 {offsets = [0, 56], sizes = [6, 8], strides = [1, 1]} : vector<6x96xbf16> to vector<6x8xbf16>
    %101 = vector.extract_strided_slice %30 {offsets = [0, 88], sizes = [6, 8], strides = [1, 1]} : vector<6x96xbf16> to vector<6x8xbf16>
    %cst_37 = arith.constant dense<0.000000e+00> : vector<6x6xf32>
    %102 = tpu.matmul %99, %100, %cst_37 {dimension_numbers = #tpu.dot_dimension_numbers<[1], [1], [0], [0], [0, 0, 1, 0], [], []>} : vector<6x8xbf16>, vector<6x8xbf16>, vector<6x6xf32> -> vector<6x6xf32>
    %cst_38 = arith.constant 0.353553385 : f32
    %103 = vector.broadcast %cst_38 : f32 to vector<6x6xf32>
    %104 = arith.mulf %102, %103 : vector<6x6xf32>
    %105 = vector.broadcast %32 : vector<1x6xf32> to vector<6x6xf32>
    %106 = arith.addf %104, %105 : vector<6x6xf32>
    %cst_39 = arith.constant dense<0xFF800000> : vector<6xf32>
    %107 = vector.multi_reduction <maximumf>, %106, %cst_39 [1] : vector<6x6xf32> to vector<6xf32>
    %108 = vector.shape_cast %107 : vector<6xf32> to vector<6x1xf32>
    %109 = vector.broadcast %108 : vector<6x1xf32> to vector<6x6xf32>
    %110 = arith.subf %106, %109 : vector<6x6xf32>
    %111 = math.exp %110 : vector<6x6xf32>
    %cst_40 = arith.constant dense<0.000000e+00> : vector<6xf32>
    %112 = vector.multi_reduction <add>, %111, %cst_40 [1] : vector<6x6xf32> to vector<6xf32>
    %113 = vector.shape_cast %112 : vector<6xf32> to vector<6x1xf32>
    %114 = tpu.reciprocal %113 {approx = true} : vector<6x1xf32> -> vector<6x1xf32>
    %115 = vector.broadcast %114 : vector<6x1xf32> to vector<6x6xf32>
    %116 = arith.mulf %111, %115 : vector<6x6xf32>
    %117 = arith.truncf %116 : vector<6x6xf32> to vector<6x6xbf16>
    %cst_41 = arith.constant dense<0.000000e+00> : vector<6x8xf32>
    %118 = tpu.matmul %117, %101, %cst_41 {dimension_numbers = #tpu.dot_dimension_numbers<[1], [0], [0], [1], [0, 0, 1, 1], [], []>} : vector<6x6xbf16>, vector<6x8xbf16>, vector<6x8xf32> -> vector<6x8xf32>
    %119 = arith.truncf %118 : vector<6x8xf32> to vector<6x8xbf16>
    %c0_42 = arith.constant 0 : index
    %c24 = arith.constant 24 : index
    %120 = vector.load %arg10[%c0_42, %c24] : memref<6x32xbf16, #tpu.memory_space<vmem>>, vector<6x8xbf16>
    tpu.vector_store %arg10[%c0_42, %c24], %119 {strides = array<i32>} : memref<6x32xbf16, #tpu.memory_space<vmem>>, vector<6x8xbf16>,
    %c0_43 = arith.constant 0 : index
    %c0_44 = arith.constant 0 : index
    %121 = vector.load %arg10[%c0_43, %c0_44] : memref<6x32xbf16, #tpu.memory_space<vmem>>, vector<6x32xbf16>
    %c0_45 = arith.constant 0 : index
    %c0_46 = arith.constant 0 : index
    %122 = vector.load %arg7[%c0_45, %c0_46] : memref<32x32xbf16, #tpu.memory_space<vmem>>, vector<32x32xbf16>
    %cst_47 = arith.constant dense<0.000000e+00> : vector<6x32xf32>
    %123 = tpu.matmul %121, %122, %cst_47 {dimension_numbers = #tpu.dot_dimension_numbers<[1], [0], [0], [1], [0, 0, 1, 1], [], []>} : vector<6x32xbf16>, vector<32x32xbf16>, vector<6x32xf32> -> vector<6x32xf32>
    %124 = arith.addf %1, %123 : vector<6x32xf32>
    %c0_48 = arith.constant 0 : index
    %c0_49 = arith.constant 0 : index
    %125 = vector.load %arg8[%c0_48, %c0_49] : memref<1x32xf32, #tpu.memory_space<vmem>>, vector<1x32xf32>
    %126 = vector.broadcast %125 : vector<1x32xf32> to vector<6x32xf32>
    %127 = arith.addf %124, %126 : vector<6x32xf32>
    %c0_50 = arith.constant 0 : index
    %c0_51 = arith.constant 0 : index
    %c0_52 = arith.constant 0 : index
    %128 = vector.load %arg9[%c0_50, %c0_51, %c0_52] : memref<1x6x32xf32, #tpu.memory_space<vmem>>, vector<1x6x32xf32>
    %129 = vector.shape_cast %128 : vector<1x6x32xf32> to vector<6x32xf32>
    %130 = vector.shape_cast %127 : vector<6x32xf32> to vector<1x6x32xf32>
    tpu.vector_store %arg9[%c0_50, %c0_51, %c0_52], %130 {strides = array<i32>} : memref<1x6x32xf32, #tpu.memory_space<vmem>>, vector<1x6x32xf32>,
    return
  }
  func.func @transform_0(%arg0: i32) -> (i32, i32, i32) {
    %c0_i32 = arith.constant 0 : i32
    %c0_i32_0 = arith.constant 0 : i32
    %c0_i32_1 = arith.constant 0 : i32
    return %arg0, %c0_i32, %c0_i32_0 : i32, i32, i32
  }
  func.func @transform_1(%arg0: i32) -> (i32, i32) {
    %c0_i32 = arith.constant 0 : i32
    %c0_i32_0 = arith.constant 0 : i32
    %c0_i32_1 = arith.constant 0 : i32
    return %c0_i32, %c0_i32_0 : i32, i32
  }
  func.func @transform_2(%arg0: i32) -> (i32, i32) {
    %c0_i32 = arith.constant 0 : i32
    %c0_i32_0 = arith.constant 0 : i32
    %c0_i32_1 = arith.constant 0 : i32
    return %c0_i32, %c0_i32_0 : i32, i32
  }
  func.func @transform_3(%arg0: i32) -> (i32, i32) {
    %c0_i32 = arith.constant 0 : i32
    %c0_i32_0 = arith.constant 0 : i32
    %c0_i32_1 = arith.constant 0 : i32
    return %c0_i32, %c0_i32_0 : i32, i32
  }
  func.func @transform_4(%arg0: i32) -> (i32, i32) {
    %c0_i32 = arith.constant 0 : i32
    %c0_i32_0 = arith.constant 0 : i32
    %c0_i32_1 = arith.constant 0 : i32
    return %c0_i32, %c0_i32_0 : i32, i32
  }
  func.func @transform_5(%arg0: i32) -> (i32, i32, i32) {
    %c0_i32 = arith.constant 0 : i32
    %c0_i32_0 = arith.constant 0 : i32
    %c0_i32_1 = arith.constant 0 : i32
    return %arg0, %c0_i32, %c0_i32_0 : i32, i32, i32
  }
  func.func @transform_6(%arg0: i32) -> (i32, i32) {
    %c0_i32 = arith.constant 0 : i32
    %c0_i32_0 = arith.constant 0 : i32
    %c0_i32_1 = arith.constant 0 : i32
    return %c0_i32, %c0_i32_0 : i32, i32
  }
  func.func @transform_7(%arg0: i32) -> (i32, i32) {
    %c0_i32 = arith.constant 0 : i32
    %c0_i32_0 = arith.constant 0 : i32
    %c0_i32_1 = arith.constant 0 : i32
    return %c0_i32, %c0_i32_0 : i32, i32
  }
  func.func @transform_8(%arg0: i32) -> (i32, i32, i32) {
    %c0_i32 = arith.constant 0 : i32
    %c0_i32_0 = arith.constant 0 : i32
    %c0_i32_1 = arith.constant 0 : i32
    return %arg0, %c0_i32, %c0_i32_0 : i32, i32, i32
  }
}

module attributes {stable_mosaic.version = 11 : i64} {
  func.func @_subsample_embed_kernel(%arg0: i32, %arg1: memref<1x3x7x20xf32, #tpu.memory_space<vmem>>, %arg2: memref<1x3x6x20xf32, #tpu.memory_space<vmem>>, %arg3: memref<3x20x288xbf16, #tpu.memory_space<vmem>>, %arg4: memref<1x288xf32, #tpu.memory_space<vmem>>, %arg5: memref<288x32xbf16, #tpu.memory_space<vmem>>, %arg6: memref<1x32xf32, #tpu.memory_space<vmem>>, %arg7: memref<128x32xbf16, #tpu.memory_space<vmem>>, %arg8: memref<1x32xf32, #tpu.memory_space<vmem>>, %arg9: memref<6x32xf32, #tpu.memory_space<vmem>>, %arg10: memref<1x6x32xf32, #tpu.memory_space<vmem>>) attributes {dimension_semantics = [#tpu.dimension_semantics<parallel>], iteration_bounds = array<i64: 2>, scalar_prefetch = 0 : i64, scratch_operands = 0 : i64, tpu.core_type = #tpu.core_type<tc>, window_params = [{transform_indices = @transform_0, window_bounds = array<i64: 1, 3, 7, 20>}, {transform_indices = @transform_1, window_bounds = array<i64: 1, 3, 6, 20>}, {pipeline_mode = #tpu.pipeline_mode<synchronous>, transform_indices = @transform_2, window_bounds = array<i64: 3, 20, 288>}, {pipeline_mode = #tpu.pipeline_mode<synchronous>, transform_indices = @transform_3, window_bounds = array<i64: 1, 288>}, {pipeline_mode = #tpu.pipeline_mode<synchronous>, transform_indices = @transform_4, window_bounds = array<i64: 288, 32>}, {pipeline_mode = #tpu.pipeline_mode<synchronous>, transform_indices = @transform_5, window_bounds = array<i64: 1, 32>}, {pipeline_mode = #tpu.pipeline_mode<synchronous>, transform_indices = @transform_6, window_bounds = array<i64: 128, 32>}, {pipeline_mode = #tpu.pipeline_mode<synchronous>, transform_indices = @transform_7, window_bounds = array<i64: 1, 32>}, {pipeline_mode = #tpu.pipeline_mode<synchronous>, transform_indices = @transform_8, window_bounds = array<i64: 6, 32>}, {transform_indices = @transform_9, window_bounds = array<i64: 1, 6, 32>}]} {
    %c0 = arith.constant 0 : index
    %c0_0 = arith.constant 0 : index
    %c0_1 = arith.constant 0 : index
    %c0_2 = arith.constant 0 : index
    %0 = vector.load %arg1[%c0, %c0_0, %c0_1, %c0_2] : memref<1x3x7x20xf32, #tpu.memory_space<vmem>>, vector<1x1x7x20xf32>
    %1 = vector.shape_cast %0 : vector<1x1x7x20xf32> to vector<7x20xf32>
    %2 = arith.truncf %1 : vector<7x20xf32> to vector<7x20xbf16>
    %c0_3 = arith.constant 0 : index
    %c0_4 = arith.constant 0 : index
    %c0_5 = arith.constant 0 : index
    %3 = vector.load %arg3[%c0_3, %c0_4, %c0_5] : memref<3x20x288xbf16, #tpu.memory_space<vmem>>, vector<1x20x288xbf16>
    %4 = vector.shape_cast %3 : vector<1x20x288xbf16> to vector<20x288xbf16>
    %cst = arith.constant dense<0.000000e+00> : vector<7x288xf32>
    %5 = tpu.matmul %2, %4, %cst {dimension_numbers = #tpu.dot_dimension_numbers<[1], [0], [0], [1], [0, 0, 1, 1], [], []>} : vector<7x20xbf16>, vector<20x288xbf16>, vector<7x288xf32> -> vector<7x288xf32>
    %c0_6 = arith.constant 0 : index
    %c1 = arith.constant 1 : index
    %c0_7 = arith.constant 0 : index
    %c0_8 = arith.constant 0 : index
    %6 = vector.load %arg1[%c0_6, %c1, %c0_7, %c0_8] : memref<1x3x7x20xf32, #tpu.memory_space<vmem>>, vector<1x1x7x20xf32>
    %7 = vector.shape_cast %6 : vector<1x1x7x20xf32> to vector<7x20xf32>
    %8 = arith.truncf %7 : vector<7x20xf32> to vector<7x20xbf16>
    %c1_9 = arith.constant 1 : index
    %c0_10 = arith.constant 0 : index
    %c0_11 = arith.constant 0 : index
    %9 = vector.load %arg3[%c1_9, %c0_10, %c0_11] : memref<3x20x288xbf16, #tpu.memory_space<vmem>>, vector<1x20x288xbf16>
    %10 = vector.shape_cast %9 : vector<1x20x288xbf16> to vector<20x288xbf16>
    %cst_12 = arith.constant dense<0.000000e+00> : vector<7x288xf32>
    %11 = tpu.matmul %8, %10, %cst_12 {dimension_numbers = #tpu.dot_dimension_numbers<[1], [0], [0], [1], [0, 0, 1, 1], [], []>} : vector<7x20xbf16>, vector<20x288xbf16>, vector<7x288xf32> -> vector<7x288xf32>
    %12 = arith.addf %5, %11 : vector<7x288xf32>
    %c0_13 = arith.constant 0 : index
    %c2 = arith.constant 2 : index
    %c0_14 = arith.constant 0 : index
    %c0_15 = arith.constant 0 : index
    %13 = vector.load %arg1[%c0_13, %c2, %c0_14, %c0_15] : memref<1x3x7x20xf32, #tpu.memory_space<vmem>>, vector<1x1x7x20xf32>
    %14 = vector.shape_cast %13 : vector<1x1x7x20xf32> to vector<7x20xf32>
    %15 = arith.truncf %14 : vector<7x20xf32> to vector<7x20xbf16>
    %c2_16 = arith.constant 2 : index
    %c0_17 = arith.constant 0 : index
    %c0_18 = arith.constant 0 : index
    %16 = vector.load %arg3[%c2_16, %c0_17, %c0_18] : memref<3x20x288xbf16, #tpu.memory_space<vmem>>, vector<1x20x288xbf16>
    %17 = vector.shape_cast %16 : vector<1x20x288xbf16> to vector<20x288xbf16>
    %cst_19 = arith.constant dense<0.000000e+00> : vector<7x288xf32>
    %18 = tpu.matmul %15, %17, %cst_19 {dimension_numbers = #tpu.dot_dimension_numbers<[1], [0], [0], [1], [0, 0, 1, 1], [], []>} : vector<7x20xbf16>, vector<20x288xbf16>, vector<7x288xf32> -> vector<7x288xf32>
    %19 = arith.addf %12, %18 : vector<7x288xf32>
    %c0_20 = arith.constant 0 : index
    %c0_21 = arith.constant 0 : index
    %20 = vector.load %arg4[%c0_20, %c0_21] : memref<1x288xf32, #tpu.memory_space<vmem>>, vector<1x288xf32>
    %21 = vector.broadcast %20 : vector<1x288xf32> to vector<7x288xf32>
    %22 = arith.addf %19, %21 : vector<7x288xf32>
    %cst_22 = arith.constant 0.000000e+00 : f32
    %23 = vector.broadcast %cst_22 : f32 to vector<7x288xf32>
    %24 = arith.maximumf %22, %23 : vector<7x288xf32>
    %25 = arith.truncf %24 : vector<7x288xf32> to vector<7x288xbf16>
    %c0_23 = arith.constant 0 : index
    %c0_24 = arith.constant 0 : index
    %c0_25 = arith.constant 0 : index
    %c0_26 = arith.constant 0 : index
    %26 = vector.load %arg2[%c0_23, %c0_24, %c0_25, %c0_26] : memref<1x3x6x20xf32, #tpu.memory_space<vmem>>, vector<1x1x6x20xf32>
    %27 = vector.shape_cast %26 : vector<1x1x6x20xf32> to vector<6x20xf32>
    %28 = arith.truncf %27 : vector<6x20xf32> to vector<6x20xbf16>
    %c0_27 = arith.constant 0 : index
    %c0_28 = arith.constant 0 : index
    %c0_29 = arith.constant 0 : index
    %29 = vector.load %arg3[%c0_27, %c0_28, %c0_29] : memref<3x20x288xbf16, #tpu.memory_space<vmem>>, vector<1x20x288xbf16>
    %30 = vector.shape_cast %29 : vector<1x20x288xbf16> to vector<20x288xbf16>
    %cst_30 = arith.constant dense<0.000000e+00> : vector<6x288xf32>
    %31 = tpu.matmul %28, %30, %cst_30 {dimension_numbers = #tpu.dot_dimension_numbers<[1], [0], [0], [1], [0, 0, 1, 1], [], []>} : vector<6x20xbf16>, vector<20x288xbf16>, vector<6x288xf32> -> vector<6x288xf32>
    %c0_31 = arith.constant 0 : index
    %c1_32 = arith.constant 1 : index
    %c0_33 = arith.constant 0 : index
    %c0_34 = arith.constant 0 : index
    %32 = vector.load %arg2[%c0_31, %c1_32, %c0_33, %c0_34] : memref<1x3x6x20xf32, #tpu.memory_space<vmem>>, vector<1x1x6x20xf32>
    %33 = vector.shape_cast %32 : vector<1x1x6x20xf32> to vector<6x20xf32>
    %34 = arith.truncf %33 : vector<6x20xf32> to vector<6x20xbf16>
    %c1_35 = arith.constant 1 : index
    %c0_36 = arith.constant 0 : index
    %c0_37 = arith.constant 0 : index
    %35 = vector.load %arg3[%c1_35, %c0_36, %c0_37] : memref<3x20x288xbf16, #tpu.memory_space<vmem>>, vector<1x20x288xbf16>
    %36 = vector.shape_cast %35 : vector<1x20x288xbf16> to vector<20x288xbf16>
    %cst_38 = arith.constant dense<0.000000e+00> : vector<6x288xf32>
    %37 = tpu.matmul %34, %36, %cst_38 {dimension_numbers = #tpu.dot_dimension_numbers<[1], [0], [0], [1], [0, 0, 1, 1], [], []>} : vector<6x20xbf16>, vector<20x288xbf16>, vector<6x288xf32> -> vector<6x288xf32>
    %38 = arith.addf %31, %37 : vector<6x288xf32>
    %c0_39 = arith.constant 0 : index
    %c2_40 = arith.constant 2 : index
    %c0_41 = arith.constant 0 : index
    %c0_42 = arith.constant 0 : index
    %39 = vector.load %arg2[%c0_39, %c2_40, %c0_41, %c0_42] : memref<1x3x6x20xf32, #tpu.memory_space<vmem>>, vector<1x1x6x20xf32>
    %40 = vector.shape_cast %39 : vector<1x1x6x20xf32> to vector<6x20xf32>
    %41 = arith.truncf %40 : vector<6x20xf32> to vector<6x20xbf16>
    %c2_43 = arith.constant 2 : index
    %c0_44 = arith.constant 0 : index
    %c0_45 = arith.constant 0 : index
    %42 = vector.load %arg3[%c2_43, %c0_44, %c0_45] : memref<3x20x288xbf16, #tpu.memory_space<vmem>>, vector<1x20x288xbf16>
    %43 = vector.shape_cast %42 : vector<1x20x288xbf16> to vector<20x288xbf16>
    %cst_46 = arith.constant dense<0.000000e+00> : vector<6x288xf32>
    %44 = tpu.matmul %41, %43, %cst_46 {dimension_numbers = #tpu.dot_dimension_numbers<[1], [0], [0], [1], [0, 0, 1, 1], [], []>} : vector<6x20xbf16>, vector<20x288xbf16>, vector<6x288xf32> -> vector<6x288xf32>
    %45 = arith.addf %38, %44 : vector<6x288xf32>
    %c0_47 = arith.constant 0 : index
    %c0_48 = arith.constant 0 : index
    %46 = vector.load %arg4[%c0_47, %c0_48] : memref<1x288xf32, #tpu.memory_space<vmem>>, vector<1x288xf32>
    %47 = vector.broadcast %46 : vector<1x288xf32> to vector<6x288xf32>
    %48 = arith.addf %45, %47 : vector<6x288xf32>
    %cst_49 = arith.constant 0.000000e+00 : f32
    %49 = vector.broadcast %cst_49 : f32 to vector<6x288xf32>
    %50 = arith.maximumf %48, %49 : vector<6x288xf32>
    %51 = arith.truncf %50 : vector<6x288xf32> to vector<6x288xbf16>
    %52 = vector.extract_strided_slice %25 {offsets = [0, 0], sizes = [6, 32], strides = [1, 1]} : vector<7x288xbf16> to vector<6x32xbf16>
    %c0_50 = arith.constant 0 : index
    %c0_51 = arith.constant 0 : index
    %53 = vector.load %arg5[%c0_50, %c0_51] : memref<288x32xbf16, #tpu.memory_space<vmem>>, vector<32x32xbf16>
    %cst_52 = arith.constant dense<0.000000e+00> : vector<6x32xf32>
    %54 = tpu.matmul %52, %53, %cst_52 {dimension_numbers = #tpu.dot_dimension_numbers<[1], [0], [0], [1], [0, 0, 1, 1], [], []>} : vector<6x32xbf16>, vector<32x32xbf16>, vector<6x32xf32> -> vector<6x32xf32>
    %55 = vector.extract_strided_slice %25 {offsets = [0, 32], sizes = [6, 32], strides = [1, 1]} : vector<7x288xbf16> to vector<6x32xbf16>
    %c32 = arith.constant 32 : index
    %c0_53 = arith.constant 0 : index
    %56 = vector.load %arg5[%c32, %c0_53] : memref<288x32xbf16, #tpu.memory_space<vmem>>, vector<32x32xbf16>
    %cst_54 = arith.constant dense<0.000000e+00> : vector<6x32xf32>
    %57 = tpu.matmul %55, %56, %cst_54 {dimension_numbers = #tpu.dot_dimension_numbers<[1], [0], [0], [1], [0, 0, 1, 1], [], []>} : vector<6x32xbf16>, vector<32x32xbf16>, vector<6x32xf32> -> vector<6x32xf32>
    %58 = arith.addf %54, %57 : vector<6x32xf32>
    %59 = vector.extract_strided_slice %25 {offsets = [0, 64], sizes = [6, 32], strides = [1, 1]} : vector<7x288xbf16> to vector<6x32xbf16>
    %c64 = arith.constant 64 : index
    %c0_55 = arith.constant 0 : index
    %60 = vector.load %arg5[%c64, %c0_55] : memref<288x32xbf16, #tpu.memory_space<vmem>>, vector<32x32xbf16>
    %cst_56 = arith.constant dense<0.000000e+00> : vector<6x32xf32>
    %61 = tpu.matmul %59, %60, %cst_56 {dimension_numbers = #tpu.dot_dimension_numbers<[1], [0], [0], [1], [0, 0, 1, 1], [], []>} : vector<6x32xbf16>, vector<32x32xbf16>, vector<6x32xf32> -> vector<6x32xf32>
    %62 = arith.addf %58, %61 : vector<6x32xf32>
    %63 = vector.extract_strided_slice %51 {offsets = [0, 0], sizes = [6, 32], strides = [1, 1]} : vector<6x288xbf16> to vector<6x32xbf16>
    %c96 = arith.constant 96 : index
    %c0_57 = arith.constant 0 : index
    %64 = vector.load %arg5[%c96, %c0_57] : memref<288x32xbf16, #tpu.memory_space<vmem>>, vector<32x32xbf16>
    %cst_58 = arith.constant dense<0.000000e+00> : vector<6x32xf32>
    %65 = tpu.matmul %63, %64, %cst_58 {dimension_numbers = #tpu.dot_dimension_numbers<[1], [0], [0], [1], [0, 0, 1, 1], [], []>} : vector<6x32xbf16>, vector<32x32xbf16>, vector<6x32xf32> -> vector<6x32xf32>
    %66 = arith.addf %62, %65 : vector<6x32xf32>
    %67 = vector.extract_strided_slice %51 {offsets = [0, 32], sizes = [6, 32], strides = [1, 1]} : vector<6x288xbf16> to vector<6x32xbf16>
    %c128 = arith.constant 128 : index
    %c0_59 = arith.constant 0 : index
    %68 = vector.load %arg5[%c128, %c0_59] : memref<288x32xbf16, #tpu.memory_space<vmem>>, vector<32x32xbf16>
    %cst_60 = arith.constant dense<0.000000e+00> : vector<6x32xf32>
    %69 = tpu.matmul %67, %68, %cst_60 {dimension_numbers = #tpu.dot_dimension_numbers<[1], [0], [0], [1], [0, 0, 1, 1], [], []>} : vector<6x32xbf16>, vector<32x32xbf16>, vector<6x32xf32> -> vector<6x32xf32>
    %70 = arith.addf %66, %69 : vector<6x32xf32>
    %71 = vector.extract_strided_slice %51 {offsets = [0, 64], sizes = [6, 32], strides = [1, 1]} : vector<6x288xbf16> to vector<6x32xbf16>
    %c160 = arith.constant 160 : index
    %c0_61 = arith.constant 0 : index
    %72 = vector.load %arg5[%c160, %c0_61] : memref<288x32xbf16, #tpu.memory_space<vmem>>, vector<32x32xbf16>
    %cst_62 = arith.constant dense<0.000000e+00> : vector<6x32xf32>
    %73 = tpu.matmul %71, %72, %cst_62 {dimension_numbers = #tpu.dot_dimension_numbers<[1], [0], [0], [1], [0, 0, 1, 1], [], []>} : vector<6x32xbf16>, vector<32x32xbf16>, vector<6x32xf32> -> vector<6x32xf32>
    %74 = arith.addf %70, %73 : vector<6x32xf32>
    %75 = vector.extract_strided_slice %25 {offsets = [1, 0], sizes = [6, 32], strides = [1, 1]} : vector<7x288xbf16> to vector<6x32xbf16>
    %c192 = arith.constant 192 : index
    %c0_63 = arith.constant 0 : index
    %76 = vector.load %arg5[%c192, %c0_63] : memref<288x32xbf16, #tpu.memory_space<vmem>>, vector<32x32xbf16>
    %cst_64 = arith.constant dense<0.000000e+00> : vector<6x32xf32>
    %77 = tpu.matmul %75, %76, %cst_64 {dimension_numbers = #tpu.dot_dimension_numbers<[1], [0], [0], [1], [0, 0, 1, 1], [], []>} : vector<6x32xbf16>, vector<32x32xbf16>, vector<6x32xf32> -> vector<6x32xf32>
    %78 = arith.addf %74, %77 : vector<6x32xf32>
    %79 = vector.extract_strided_slice %25 {offsets = [1, 32], sizes = [6, 32], strides = [1, 1]} : vector<7x288xbf16> to vector<6x32xbf16>
    %c224 = arith.constant 224 : index
    %c0_65 = arith.constant 0 : index
    %80 = vector.load %arg5[%c224, %c0_65] : memref<288x32xbf16, #tpu.memory_space<vmem>>, vector<32x32xbf16>
    %cst_66 = arith.constant dense<0.000000e+00> : vector<6x32xf32>
    %81 = tpu.matmul %79, %80, %cst_66 {dimension_numbers = #tpu.dot_dimension_numbers<[1], [0], [0], [1], [0, 0, 1, 1], [], []>} : vector<6x32xbf16>, vector<32x32xbf16>, vector<6x32xf32> -> vector<6x32xf32>
    %82 = arith.addf %78, %81 : vector<6x32xf32>
    %83 = vector.extract_strided_slice %25 {offsets = [1, 64], sizes = [6, 32], strides = [1, 1]} : vector<7x288xbf16> to vector<6x32xbf16>
    %c256 = arith.constant 256 : index
    %c0_67 = arith.constant 0 : index
    %84 = vector.load %arg5[%c256, %c0_67] : memref<288x32xbf16, #tpu.memory_space<vmem>>, vector<32x32xbf16>
    %cst_68 = arith.constant dense<0.000000e+00> : vector<6x32xf32>
    %85 = tpu.matmul %83, %84, %cst_68 {dimension_numbers = #tpu.dot_dimension_numbers<[1], [0], [0], [1], [0, 0, 1, 1], [], []>} : vector<6x32xbf16>, vector<32x32xbf16>, vector<6x32xf32> -> vector<6x32xf32>
    %86 = arith.addf %82, %85 : vector<6x32xf32>
    %c0_69 = arith.constant 0 : index
    %c0_70 = arith.constant 0 : index
    %87 = vector.load %arg6[%c0_69, %c0_70] : memref<1x32xf32, #tpu.memory_space<vmem>>, vector<1x32xf32>
    %88 = vector.broadcast %87 : vector<1x32xf32> to vector<6x32xf32>
    %89 = arith.addf %86, %88 : vector<6x32xf32>
    %cst_71 = arith.constant 0.000000e+00 : f32
    %90 = vector.broadcast %cst_71 : f32 to vector<6x32xf32>
    %91 = arith.maximumf %89, %90 : vector<6x32xf32>
    %92 = arith.truncf %91 : vector<6x32xf32> to vector<6x32xbf16>
    %c0_72 = arith.constant 0 : index
    %c0_73 = arith.constant 0 : index
    %93 = vector.load %arg7[%c0_72, %c0_73] : memref<128x32xbf16, #tpu.memory_space<vmem>>, vector<32x32xbf16>
    %cst_74 = arith.constant dense<0.000000e+00> : vector<6x32xf32>
    %94 = tpu.matmul %92, %93, %cst_74 {dimension_numbers = #tpu.dot_dimension_numbers<[1], [0], [0], [1], [0, 0, 1, 1], [], []>} : vector<6x32xbf16>, vector<32x32xbf16>, vector<6x32xf32> -> vector<6x32xf32>
    %95 = vector.extract_strided_slice %25 {offsets = [0, 64], sizes = [6, 32], strides = [1, 1]} : vector<7x288xbf16> to vector<6x32xbf16>
    %c0_75 = arith.constant 0 : index
    %c0_76 = arith.constant 0 : index
    %96 = vector.load %arg5[%c0_75, %c0_76] : memref<288x32xbf16, #tpu.memory_space<vmem>>, vector<32x32xbf16>
    %cst_77 = arith.constant dense<0.000000e+00> : vector<6x32xf32>
    %97 = tpu.matmul %95, %96, %cst_77 {dimension_numbers = #tpu.dot_dimension_numbers<[1], [0], [0], [1], [0, 0, 1, 1], [], []>} : vector<6x32xbf16>, vector<32x32xbf16>, vector<6x32xf32> -> vector<6x32xf32>
    %98 = vector.extract_strided_slice %25 {offsets = [0, 96], sizes = [6, 32], strides = [1, 1]} : vector<7x288xbf16> to vector<6x32xbf16>
    %c32_78 = arith.constant 32 : index
    %c0_79 = arith.constant 0 : index
    %99 = vector.load %arg5[%c32_78, %c0_79] : memref<288x32xbf16, #tpu.memory_space<vmem>>, vector<32x32xbf16>
    %cst_80 = arith.constant dense<0.000000e+00> : vector<6x32xf32>
    %100 = tpu.matmul %98, %99, %cst_80 {dimension_numbers = #tpu.dot_dimension_numbers<[1], [0], [0], [1], [0, 0, 1, 1], [], []>} : vector<6x32xbf16>, vector<32x32xbf16>, vector<6x32xf32> -> vector<6x32xf32>
    %101 = arith.addf %97, %100 : vector<6x32xf32>
    %102 = vector.extract_strided_slice %25 {offsets = [0, 128], sizes = [6, 32], strides = [1, 1]} : vector<7x288xbf16> to vector<6x32xbf16>
    %c64_81 = arith.constant 64 : index
    %c0_82 = arith.constant 0 : index
    %103 = vector.load %arg5[%c64_81, %c0_82] : memref<288x32xbf16, #tpu.memory_space<vmem>>, vector<32x32xbf16>
    %cst_83 = arith.constant dense<0.000000e+00> : vector<6x32xf32>
    %104 = tpu.matmul %102, %103, %cst_83 {dimension_numbers = #tpu.dot_dimension_numbers<[1], [0], [0], [1], [0, 0, 1, 1], [], []>} : vector<6x32xbf16>, vector<32x32xbf16>, vector<6x32xf32> -> vector<6x32xf32>
    %105 = arith.addf %101, %104 : vector<6x32xf32>
    %106 = vector.extract_strided_slice %51 {offsets = [0, 64], sizes = [6, 32], strides = [1, 1]} : vector<6x288xbf16> to vector<6x32xbf16>
    %c96_84 = arith.constant 96 : index
    %c0_85 = arith.constant 0 : index
    %107 = vector.load %arg5[%c96_84, %c0_85] : memref<288x32xbf16, #tpu.memory_space<vmem>>, vector<32x32xbf16>
    %cst_86 = arith.constant dense<0.000000e+00> : vector<6x32xf32>
    %108 = tpu.matmul %106, %107, %cst_86 {dimension_numbers = #tpu.dot_dimension_numbers<[1], [0], [0], [1], [0, 0, 1, 1], [], []>} : vector<6x32xbf16>, vector<32x32xbf16>, vector<6x32xf32> -> vector<6x32xf32>
    %109 = arith.addf %105, %108 : vector<6x32xf32>
    %110 = vector.extract_strided_slice %51 {offsets = [0, 96], sizes = [6, 32], strides = [1, 1]} : vector<6x288xbf16> to vector<6x32xbf16>
    %c128_87 = arith.constant 128 : index
    %c0_88 = arith.constant 0 : index
    %111 = vector.load %arg5[%c128_87, %c0_88] : memref<288x32xbf16, #tpu.memory_space<vmem>>, vector<32x32xbf16>
    %cst_89 = arith.constant dense<0.000000e+00> : vector<6x32xf32>
    %112 = tpu.matmul %110, %111, %cst_89 {dimension_numbers = #tpu.dot_dimension_numbers<[1], [0], [0], [1], [0, 0, 1, 1], [], []>} : vector<6x32xbf16>, vector<32x32xbf16>, vector<6x32xf32> -> vector<6x32xf32>
    %113 = arith.addf %109, %112 : vector<6x32xf32>
    %114 = vector.extract_strided_slice %51 {offsets = [0, 128], sizes = [6, 32], strides = [1, 1]} : vector<6x288xbf16> to vector<6x32xbf16>
    %c160_90 = arith.constant 160 : index
    %c0_91 = arith.constant 0 : index
    %115 = vector.load %arg5[%c160_90, %c0_91] : memref<288x32xbf16, #tpu.memory_space<vmem>>, vector<32x32xbf16>
    %cst_92 = arith.constant dense<0.000000e+00> : vector<6x32xf32>
    %116 = tpu.matmul %114, %115, %cst_92 {dimension_numbers = #tpu.dot_dimension_numbers<[1], [0], [0], [1], [0, 0, 1, 1], [], []>} : vector<6x32xbf16>, vector<32x32xbf16>, vector<6x32xf32> -> vector<6x32xf32>
    %117 = arith.addf %113, %116 : vector<6x32xf32>
    %118 = vector.extract_strided_slice %25 {offsets = [1, 64], sizes = [6, 32], strides = [1, 1]} : vector<7x288xbf16> to vector<6x32xbf16>
    %c192_93 = arith.constant 192 : index
    %c0_94 = arith.constant 0 : index
    %119 = vector.load %arg5[%c192_93, %c0_94] : memref<288x32xbf16, #tpu.memory_space<vmem>>, vector<32x32xbf16>
    %cst_95 = arith.constant dense<0.000000e+00> : vector<6x32xf32>
    %120 = tpu.matmul %118, %119, %cst_95 {dimension_numbers = #tpu.dot_dimension_numbers<[1], [0], [0], [1], [0, 0, 1, 1], [], []>} : vector<6x32xbf16>, vector<32x32xbf16>, vector<6x32xf32> -> vector<6x32xf32>
    %121 = arith.addf %117, %120 : vector<6x32xf32>
    %122 = vector.extract_strided_slice %25 {offsets = [1, 96], sizes = [6, 32], strides = [1, 1]} : vector<7x288xbf16> to vector<6x32xbf16>
    %c224_96 = arith.constant 224 : index
    %c0_97 = arith.constant 0 : index
    %123 = vector.load %arg5[%c224_96, %c0_97] : memref<288x32xbf16, #tpu.memory_space<vmem>>, vector<32x32xbf16>
    %cst_98 = arith.constant dense<0.000000e+00> : vector<6x32xf32>
    %124 = tpu.matmul %122, %123, %cst_98 {dimension_numbers = #tpu.dot_dimension_numbers<[1], [0], [0], [1], [0, 0, 1, 1], [], []>} : vector<6x32xbf16>, vector<32x32xbf16>, vector<6x32xf32> -> vector<6x32xf32>
    %125 = arith.addf %121, %124 : vector<6x32xf32>
    %126 = vector.extract_strided_slice %25 {offsets = [1, 128], sizes = [6, 32], strides = [1, 1]} : vector<7x288xbf16> to vector<6x32xbf16>
    %c256_99 = arith.constant 256 : index
    %c0_100 = arith.constant 0 : index
    %127 = vector.load %arg5[%c256_99, %c0_100] : memref<288x32xbf16, #tpu.memory_space<vmem>>, vector<32x32xbf16>
    %cst_101 = arith.constant dense<0.000000e+00> : vector<6x32xf32>
    %128 = tpu.matmul %126, %127, %cst_101 {dimension_numbers = #tpu.dot_dimension_numbers<[1], [0], [0], [1], [0, 0, 1, 1], [], []>} : vector<6x32xbf16>, vector<32x32xbf16>, vector<6x32xf32> -> vector<6x32xf32>
    %129 = arith.addf %125, %128 : vector<6x32xf32>
    %c0_102 = arith.constant 0 : index
    %c0_103 = arith.constant 0 : index
    %130 = vector.load %arg6[%c0_102, %c0_103] : memref<1x32xf32, #tpu.memory_space<vmem>>, vector<1x32xf32>
    %131 = vector.broadcast %130 : vector<1x32xf32> to vector<6x32xf32>
    %132 = arith.addf %129, %131 : vector<6x32xf32>
    %cst_104 = arith.constant 0.000000e+00 : f32
    %133 = vector.broadcast %cst_104 : f32 to vector<6x32xf32>
    %134 = arith.maximumf %132, %133 : vector<6x32xf32>
    %135 = arith.truncf %134 : vector<6x32xf32> to vector<6x32xbf16>
    %c32_105 = arith.constant 32 : index
    %c0_106 = arith.constant 0 : index
    %136 = vector.load %arg7[%c32_105, %c0_106] : memref<128x32xbf16, #tpu.memory_space<vmem>>, vector<32x32xbf16>
    %cst_107 = arith.constant dense<0.000000e+00> : vector<6x32xf32>
    %137 = tpu.matmul %135, %136, %cst_107 {dimension_numbers = #tpu.dot_dimension_numbers<[1], [0], [0], [1], [0, 0, 1, 1], [], []>} : vector<6x32xbf16>, vector<32x32xbf16>, vector<6x32xf32> -> vector<6x32xf32>
    %138 = arith.addf %94, %137 : vector<6x32xf32>
    %139 = vector.extract_strided_slice %25 {offsets = [0, 128], sizes = [6, 32], strides = [1, 1]} : vector<7x288xbf16> to vector<6x32xbf16>
    %c0_108 = arith.constant 0 : index
    %c0_109 = arith.constant 0 : index
    %140 = vector.load %arg5[%c0_108, %c0_109] : memref<288x32xbf16, #tpu.memory_space<vmem>>, vector<32x32xbf16>
    %cst_110 = arith.constant dense<0.000000e+00> : vector<6x32xf32>
    %141 = tpu.matmul %139, %140, %cst_110 {dimension_numbers = #tpu.dot_dimension_numbers<[1], [0], [0], [1], [0, 0, 1, 1], [], []>} : vector<6x32xbf16>, vector<32x32xbf16>, vector<6x32xf32> -> vector<6x32xf32>
    %142 = vector.extract_strided_slice %25 {offsets = [0, 160], sizes = [6, 32], strides = [1, 1]} : vector<7x288xbf16> to vector<6x32xbf16>
    %c32_111 = arith.constant 32 : index
    %c0_112 = arith.constant 0 : index
    %143 = vector.load %arg5[%c32_111, %c0_112] : memref<288x32xbf16, #tpu.memory_space<vmem>>, vector<32x32xbf16>
    %cst_113 = arith.constant dense<0.000000e+00> : vector<6x32xf32>
    %144 = tpu.matmul %142, %143, %cst_113 {dimension_numbers = #tpu.dot_dimension_numbers<[1], [0], [0], [1], [0, 0, 1, 1], [], []>} : vector<6x32xbf16>, vector<32x32xbf16>, vector<6x32xf32> -> vector<6x32xf32>
    %145 = arith.addf %141, %144 : vector<6x32xf32>
    %146 = vector.extract_strided_slice %25 {offsets = [0, 192], sizes = [6, 32], strides = [1, 1]} : vector<7x288xbf16> to vector<6x32xbf16>
    %c64_114 = arith.constant 64 : index
    %c0_115 = arith.constant 0 : index
    %147 = vector.load %arg5[%c64_114, %c0_115] : memref<288x32xbf16, #tpu.memory_space<vmem>>, vector<32x32xbf16>
    %cst_116 = arith.constant dense<0.000000e+00> : vector<6x32xf32>
    %148 = tpu.matmul %146, %147, %cst_116 {dimension_numbers = #tpu.dot_dimension_numbers<[1], [0], [0], [1], [0, 0, 1, 1], [], []>} : vector<6x32xbf16>, vector<32x32xbf16>, vector<6x32xf32> -> vector<6x32xf32>
    %149 = arith.addf %145, %148 : vector<6x32xf32>
    %150 = vector.extract_strided_slice %51 {offsets = [0, 128], sizes = [6, 32], strides = [1, 1]} : vector<6x288xbf16> to vector<6x32xbf16>
    %c96_117 = arith.constant 96 : index
    %c0_118 = arith.constant 0 : index
    %151 = vector.load %arg5[%c96_117, %c0_118] : memref<288x32xbf16, #tpu.memory_space<vmem>>, vector<32x32xbf16>
    %cst_119 = arith.constant dense<0.000000e+00> : vector<6x32xf32>
    %152 = tpu.matmul %150, %151, %cst_119 {dimension_numbers = #tpu.dot_dimension_numbers<[1], [0], [0], [1], [0, 0, 1, 1], [], []>} : vector<6x32xbf16>, vector<32x32xbf16>, vector<6x32xf32> -> vector<6x32xf32>
    %153 = arith.addf %149, %152 : vector<6x32xf32>
    %154 = vector.extract_strided_slice %51 {offsets = [0, 160], sizes = [6, 32], strides = [1, 1]} : vector<6x288xbf16> to vector<6x32xbf16>
    %c128_120 = arith.constant 128 : index
    %c0_121 = arith.constant 0 : index
    %155 = vector.load %arg5[%c128_120, %c0_121] : memref<288x32xbf16, #tpu.memory_space<vmem>>, vector<32x32xbf16>
    %cst_122 = arith.constant dense<0.000000e+00> : vector<6x32xf32>
    %156 = tpu.matmul %154, %155, %cst_122 {dimension_numbers = #tpu.dot_dimension_numbers<[1], [0], [0], [1], [0, 0, 1, 1], [], []>} : vector<6x32xbf16>, vector<32x32xbf16>, vector<6x32xf32> -> vector<6x32xf32>
    %157 = arith.addf %153, %156 : vector<6x32xf32>
    %158 = vector.extract_strided_slice %51 {offsets = [0, 192], sizes = [6, 32], strides = [1, 1]} : vector<6x288xbf16> to vector<6x32xbf16>
    %c160_123 = arith.constant 160 : index
    %c0_124 = arith.constant 0 : index
    %159 = vector.load %arg5[%c160_123, %c0_124] : memref<288x32xbf16, #tpu.memory_space<vmem>>, vector<32x32xbf16>
    %cst_125 = arith.constant dense<0.000000e+00> : vector<6x32xf32>
    %160 = tpu.matmul %158, %159, %cst_125 {dimension_numbers = #tpu.dot_dimension_numbers<[1], [0], [0], [1], [0, 0, 1, 1], [], []>} : vector<6x32xbf16>, vector<32x32xbf16>, vector<6x32xf32> -> vector<6x32xf32>
    %161 = arith.addf %157, %160 : vector<6x32xf32>
    %162 = vector.extract_strided_slice %25 {offsets = [1, 128], sizes = [6, 32], strides = [1, 1]} : vector<7x288xbf16> to vector<6x32xbf16>
    %c192_126 = arith.constant 192 : index
    %c0_127 = arith.constant 0 : index
    %163 = vector.load %arg5[%c192_126, %c0_127] : memref<288x32xbf16, #tpu.memory_space<vmem>>, vector<32x32xbf16>
    %cst_128 = arith.constant dense<0.000000e+00> : vector<6x32xf32>
    %164 = tpu.matmul %162, %163, %cst_128 {dimension_numbers = #tpu.dot_dimension_numbers<[1], [0], [0], [1], [0, 0, 1, 1], [], []>} : vector<6x32xbf16>, vector<32x32xbf16>, vector<6x32xf32> -> vector<6x32xf32>
    %165 = arith.addf %161, %164 : vector<6x32xf32>
    %166 = vector.extract_strided_slice %25 {offsets = [1, 160], sizes = [6, 32], strides = [1, 1]} : vector<7x288xbf16> to vector<6x32xbf16>
    %c224_129 = arith.constant 224 : index
    %c0_130 = arith.constant 0 : index
    %167 = vector.load %arg5[%c224_129, %c0_130] : memref<288x32xbf16, #tpu.memory_space<vmem>>, vector<32x32xbf16>
    %cst_131 = arith.constant dense<0.000000e+00> : vector<6x32xf32>
    %168 = tpu.matmul %166, %167, %cst_131 {dimension_numbers = #tpu.dot_dimension_numbers<[1], [0], [0], [1], [0, 0, 1, 1], [], []>} : vector<6x32xbf16>, vector<32x32xbf16>, vector<6x32xf32> -> vector<6x32xf32>
    %169 = arith.addf %165, %168 : vector<6x32xf32>
    %170 = vector.extract_strided_slice %25 {offsets = [1, 192], sizes = [6, 32], strides = [1, 1]} : vector<7x288xbf16> to vector<6x32xbf16>
    %c256_132 = arith.constant 256 : index
    %c0_133 = arith.constant 0 : index
    %171 = vector.load %arg5[%c256_132, %c0_133] : memref<288x32xbf16, #tpu.memory_space<vmem>>, vector<32x32xbf16>
    %cst_134 = arith.constant dense<0.000000e+00> : vector<6x32xf32>
    %172 = tpu.matmul %170, %171, %cst_134 {dimension_numbers = #tpu.dot_dimension_numbers<[1], [0], [0], [1], [0, 0, 1, 1], [], []>} : vector<6x32xbf16>, vector<32x32xbf16>, vector<6x32xf32> -> vector<6x32xf32>
    %173 = arith.addf %169, %172 : vector<6x32xf32>
    %c0_135 = arith.constant 0 : index
    %c0_136 = arith.constant 0 : index
    %174 = vector.load %arg6[%c0_135, %c0_136] : memref<1x32xf32, #tpu.memory_space<vmem>>, vector<1x32xf32>
    %175 = vector.broadcast %174 : vector<1x32xf32> to vector<6x32xf32>
    %176 = arith.addf %173, %175 : vector<6x32xf32>
    %cst_137 = arith.constant 0.000000e+00 : f32
    %177 = vector.broadcast %cst_137 : f32 to vector<6x32xf32>
    %178 = arith.maximumf %176, %177 : vector<6x32xf32>
    %179 = arith.truncf %178 : vector<6x32xf32> to vector<6x32xbf16>
    %c64_138 = arith.constant 64 : index
    %c0_139 = arith.constant 0 : index
    %180 = vector.load %arg7[%c64_138, %c0_139] : memref<128x32xbf16, #tpu.memory_space<vmem>>, vector<32x32xbf16>
    %cst_140 = arith.constant dense<0.000000e+00> : vector<6x32xf32>
    %181 = tpu.matmul %179, %180, %cst_140 {dimension_numbers = #tpu.dot_dimension_numbers<[1], [0], [0], [1], [0, 0, 1, 1], [], []>} : vector<6x32xbf16>, vector<32x32xbf16>, vector<6x32xf32> -> vector<6x32xf32>
    %182 = arith.addf %138, %181 : vector<6x32xf32>
    %183 = vector.extract_strided_slice %25 {offsets = [0, 192], sizes = [6, 32], strides = [1, 1]} : vector<7x288xbf16> to vector<6x32xbf16>
    %c0_141 = arith.constant 0 : index
    %c0_142 = arith.constant 0 : index
    %184 = vector.load %arg5[%c0_141, %c0_142] : memref<288x32xbf16, #tpu.memory_space<vmem>>, vector<32x32xbf16>
    %cst_143 = arith.constant dense<0.000000e+00> : vector<6x32xf32>
    %185 = tpu.matmul %183, %184, %cst_143 {dimension_numbers = #tpu.dot_dimension_numbers<[1], [0], [0], [1], [0, 0, 1, 1], [], []>} : vector<6x32xbf16>, vector<32x32xbf16>, vector<6x32xf32> -> vector<6x32xf32>
    %186 = vector.extract_strided_slice %25 {offsets = [0, 224], sizes = [6, 32], strides = [1, 1]} : vector<7x288xbf16> to vector<6x32xbf16>
    %c32_144 = arith.constant 32 : index
    %c0_145 = arith.constant 0 : index
    %187 = vector.load %arg5[%c32_144, %c0_145] : memref<288x32xbf16, #tpu.memory_space<vmem>>, vector<32x32xbf16>
    %cst_146 = arith.constant dense<0.000000e+00> : vector<6x32xf32>
    %188 = tpu.matmul %186, %187, %cst_146 {dimension_numbers = #tpu.dot_dimension_numbers<[1], [0], [0], [1], [0, 0, 1, 1], [], []>} : vector<6x32xbf16>, vector<32x32xbf16>, vector<6x32xf32> -> vector<6x32xf32>
    %189 = arith.addf %185, %188 : vector<6x32xf32>
    %190 = vector.extract_strided_slice %25 {offsets = [0, 256], sizes = [6, 32], strides = [1, 1]} : vector<7x288xbf16> to vector<6x32xbf16>
    %c64_147 = arith.constant 64 : index
    %c0_148 = arith.constant 0 : index
    %191 = vector.load %arg5[%c64_147, %c0_148] : memref<288x32xbf16, #tpu.memory_space<vmem>>, vector<32x32xbf16>
    %cst_149 = arith.constant dense<0.000000e+00> : vector<6x32xf32>
    %192 = tpu.matmul %190, %191, %cst_149 {dimension_numbers = #tpu.dot_dimension_numbers<[1], [0], [0], [1], [0, 0, 1, 1], [], []>} : vector<6x32xbf16>, vector<32x32xbf16>, vector<6x32xf32> -> vector<6x32xf32>
    %193 = arith.addf %189, %192 : vector<6x32xf32>
    %194 = vector.extract_strided_slice %51 {offsets = [0, 192], sizes = [6, 32], strides = [1, 1]} : vector<6x288xbf16> to vector<6x32xbf16>
    %c96_150 = arith.constant 96 : index
    %c0_151 = arith.constant 0 : index
    %195 = vector.load %arg5[%c96_150, %c0_151] : memref<288x32xbf16, #tpu.memory_space<vmem>>, vector<32x32xbf16>
    %cst_152 = arith.constant dense<0.000000e+00> : vector<6x32xf32>
    %196 = tpu.matmul %194, %195, %cst_152 {dimension_numbers = #tpu.dot_dimension_numbers<[1], [0], [0], [1], [0, 0, 1, 1], [], []>} : vector<6x32xbf16>, vector<32x32xbf16>, vector<6x32xf32> -> vector<6x32xf32>
    %197 = arith.addf %193, %196 : vector<6x32xf32>
    %198 = vector.extract_strided_slice %51 {offsets = [0, 224], sizes = [6, 32], strides = [1, 1]} : vector<6x288xbf16> to vector<6x32xbf16>
    %c128_153 = arith.constant 128 : index
    %c0_154 = arith.constant 0 : index
    %199 = vector.load %arg5[%c128_153, %c0_154] : memref<288x32xbf16, #tpu.memory_space<vmem>>, vector<32x32xbf16>
    %cst_155 = arith.constant dense<0.000000e+00> : vector<6x32xf32>
    %200 = tpu.matmul %198, %199, %cst_155 {dimension_numbers = #tpu.dot_dimension_numbers<[1], [0], [0], [1], [0, 0, 1, 1], [], []>} : vector<6x32xbf16>, vector<32x32xbf16>, vector<6x32xf32> -> vector<6x32xf32>
    %201 = arith.addf %197, %200 : vector<6x32xf32>
    %202 = vector.extract_strided_slice %51 {offsets = [0, 256], sizes = [6, 32], strides = [1, 1]} : vector<6x288xbf16> to vector<6x32xbf16>
    %c160_156 = arith.constant 160 : index
    %c0_157 = arith.constant 0 : index
    %203 = vector.load %arg5[%c160_156, %c0_157] : memref<288x32xbf16, #tpu.memory_space<vmem>>, vector<32x32xbf16>
    %cst_158 = arith.constant dense<0.000000e+00> : vector<6x32xf32>
    %204 = tpu.matmul %202, %203, %cst_158 {dimension_numbers = #tpu.dot_dimension_numbers<[1], [0], [0], [1], [0, 0, 1, 1], [], []>} : vector<6x32xbf16>, vector<32x32xbf16>, vector<6x32xf32> -> vector<6x32xf32>
    %205 = arith.addf %201, %204 : vector<6x32xf32>
    %206 = vector.extract_strided_slice %25 {offsets = [1, 192], sizes = [6, 32], strides = [1, 1]} : vector<7x288xbf16> to vector<6x32xbf16>
    %c192_159 = arith.constant 192 : index
    %c0_160 = arith.constant 0 : index
    %207 = vector.load %arg5[%c192_159, %c0_160] : memref<288x32xbf16, #tpu.memory_space<vmem>>, vector<32x32xbf16>
    %cst_161 = arith.constant dense<0.000000e+00> : vector<6x32xf32>
    %208 = tpu.matmul %206, %207, %cst_161 {dimension_numbers = #tpu.dot_dimension_numbers<[1], [0], [0], [1], [0, 0, 1, 1], [], []>} : vector<6x32xbf16>, vector<32x32xbf16>, vector<6x32xf32> -> vector<6x32xf32>
    %209 = arith.addf %205, %208 : vector<6x32xf32>
    %210 = vector.extract_strided_slice %25 {offsets = [1, 224], sizes = [6, 32], strides = [1, 1]} : vector<7x288xbf16> to vector<6x32xbf16>
    %c224_162 = arith.constant 224 : index
    %c0_163 = arith.constant 0 : index
    %211 = vector.load %arg5[%c224_162, %c0_163] : memref<288x32xbf16, #tpu.memory_space<vmem>>, vector<32x32xbf16>
    %cst_164 = arith.constant dense<0.000000e+00> : vector<6x32xf32>
    %212 = tpu.matmul %210, %211, %cst_164 {dimension_numbers = #tpu.dot_dimension_numbers<[1], [0], [0], [1], [0, 0, 1, 1], [], []>} : vector<6x32xbf16>, vector<32x32xbf16>, vector<6x32xf32> -> vector<6x32xf32>
    %213 = arith.addf %209, %212 : vector<6x32xf32>
    %214 = vector.extract_strided_slice %25 {offsets = [1, 256], sizes = [6, 32], strides = [1, 1]} : vector<7x288xbf16> to vector<6x32xbf16>
    %c256_165 = arith.constant 256 : index
    %c0_166 = arith.constant 0 : index
    %215 = vector.load %arg5[%c256_165, %c0_166] : memref<288x32xbf16, #tpu.memory_space<vmem>>, vector<32x32xbf16>
    %cst_167 = arith.constant dense<0.000000e+00> : vector<6x32xf32>
    %216 = tpu.matmul %214, %215, %cst_167 {dimension_numbers = #tpu.dot_dimension_numbers<[1], [0], [0], [1], [0, 0, 1, 1], [], []>} : vector<6x32xbf16>, vector<32x32xbf16>, vector<6x32xf32> -> vector<6x32xf32>
    %217 = arith.addf %213, %216 : vector<6x32xf32>
    %c0_168 = arith.constant 0 : index
    %c0_169 = arith.constant 0 : index
    %218 = vector.load %arg6[%c0_168, %c0_169] : memref<1x32xf32, #tpu.memory_space<vmem>>, vector<1x32xf32>
    %219 = vector.broadcast %218 : vector<1x32xf32> to vector<6x32xf32>
    %220 = arith.addf %217, %219 : vector<6x32xf32>
    %cst_170 = arith.constant 0.000000e+00 : f32
    %221 = vector.broadcast %cst_170 : f32 to vector<6x32xf32>
    %222 = arith.maximumf %220, %221 : vector<6x32xf32>
    %223 = arith.truncf %222 : vector<6x32xf32> to vector<6x32xbf16>
    %c96_171 = arith.constant 96 : index
    %c0_172 = arith.constant 0 : index
    %224 = vector.load %arg7[%c96_171, %c0_172] : memref<128x32xbf16, #tpu.memory_space<vmem>>, vector<32x32xbf16>
    %cst_173 = arith.constant dense<0.000000e+00> : vector<6x32xf32>
    %225 = tpu.matmul %223, %224, %cst_173 {dimension_numbers = #tpu.dot_dimension_numbers<[1], [0], [0], [1], [0, 0, 1, 1], [], []>} : vector<6x32xbf16>, vector<32x32xbf16>, vector<6x32xf32> -> vector<6x32xf32>
    %226 = arith.addf %182, %225 : vector<6x32xf32>
    %c0_174 = arith.constant 0 : index
    %c0_175 = arith.constant 0 : index
    %227 = vector.load %arg8[%c0_174, %c0_175] : memref<1x32xf32, #tpu.memory_space<vmem>>, vector<1x32xf32>
    %228 = vector.broadcast %227 : vector<1x32xf32> to vector<6x32xf32>
    %229 = arith.addf %226, %228 : vector<6x32xf32>
    %cst_176 = arith.constant 5.65685415 : f32
    %230 = vector.broadcast %cst_176 : f32 to vector<6x32xf32>
    %231 = arith.mulf %229, %230 : vector<6x32xf32>
    %c0_177 = arith.constant 0 : index
    %c0_178 = arith.constant 0 : index
    %232 = vector.load %arg9[%c0_177, %c0_178] : memref<6x32xf32, #tpu.memory_space<vmem>>, vector<6x32xf32>
    %233 = arith.addf %231, %232 : vector<6x32xf32>
    %c0_179 = arith.constant 0 : index
    %c0_180 = arith.constant 0 : index
    %c0_181 = arith.constant 0 : index
    %234 = vector.load %arg10[%c0_179, %c0_180, %c0_181] : memref<1x6x32xf32, #tpu.memory_space<vmem>>, vector<1x6x32xf32>
    %235 = vector.shape_cast %234 : vector<1x6x32xf32> to vector<6x32xf32>
    %236 = vector.shape_cast %233 : vector<6x32xf32> to vector<1x6x32xf32>
    tpu.vector_store %arg10[%c0_179, %c0_180, %c0_181], %236 {strides = array<i32>} : memref<1x6x32xf32, #tpu.memory_space<vmem>>, vector<1x6x32xf32>,
    return
  }
  func.func @transform_0(%arg0: i32) -> (i32, i32, i32, i32) {
    %c0_i32 = arith.constant 0 : i32
    %c0_i32_0 = arith.constant 0 : i32
    %c0_i32_1 = arith.constant 0 : i32
    %c0_i32_2 = arith.constant 0 : i32
    return %arg0, %c0_i32, %c0_i32_0, %c0_i32_1 : i32, i32, i32, i32
  }
  func.func @transform_1(%arg0: i32) -> (i32, i32, i32, i32) {
    %c0_i32 = arith.constant 0 : i32
    %c0_i32_0 = arith.constant 0 : i32
    %c0_i32_1 = arith.constant 0 : i32
    %c0_i32_2 = arith.constant 0 : i32
    return %arg0, %c0_i32, %c0_i32_0, %c0_i32_1 : i32, i32, i32, i32
  }
  func.func @transform_2(%arg0: i32) -> (i32, i32, i32) {
    %c0_i32 = arith.constant 0 : i32
    %c0_i32_0 = arith.constant 0 : i32
    %c0_i32_1 = arith.constant 0 : i32
    %c0_i32_2 = arith.constant 0 : i32
    return %c0_i32, %c0_i32_0, %c0_i32_1 : i32, i32, i32
  }
  func.func @transform_3(%arg0: i32) -> (i32, i32) {
    %c0_i32 = arith.constant 0 : i32
    %c0_i32_0 = arith.constant 0 : i32
    %c0_i32_1 = arith.constant 0 : i32
    return %c0_i32, %c0_i32_0 : i32, i32
  }
  func.func @transform_4(%arg0: i32) -> (i32, i32) {
    %c0_i32 = arith.constant 0 : i32
    %c0_i32_0 = arith.constant 0 : i32
    %c0_i32_1 = arith.constant 0 : i32
    return %c0_i32, %c0_i32_0 : i32, i32
  }
  func.func @transform_5(%arg0: i32) -> (i32, i32) {
    %c0_i32 = arith.constant 0 : i32
    %c0_i32_0 = arith.constant 0 : i32
    %c0_i32_1 = arith.constant 0 : i32
    return %c0_i32, %c0_i32_0 : i32, i32
  }
  func.func @transform_6(%arg0: i32) -> (i32, i32) {
    %c0_i32 = arith.constant 0 : i32
    %c0_i32_0 = arith.constant 0 : i32
    %c0_i32_1 = arith.constant 0 : i32
    return %c0_i32, %c0_i32_0 : i32, i32
  }
  func.func @transform_7(%arg0: i32) -> (i32, i32) {
    %c0_i32 = arith.constant 0 : i32
    %c0_i32_0 = arith.constant 0 : i32
    %c0_i32_1 = arith.constant 0 : i32
    return %c0_i32, %c0_i32_0 : i32, i32
  }
  func.func @transform_8(%arg0: i32) -> (i32, i32) {
    %c0_i32 = arith.constant 0 : i32
    %c0_i32_0 = arith.constant 0 : i32
    %c0_i32_1 = arith.constant 0 : i32
    return %c0_i32, %c0_i32_0 : i32, i32
  }
  func.func @transform_9(%arg0: i32) -> (i32, i32, i32) {
    %c0_i32 = arith.constant 0 : i32
    %c0_i32_0 = arith.constant 0 : i32
    %c0_i32_1 = arith.constant 0 : i32
    return %arg0, %c0_i32, %c0_i32_0 : i32, i32, i32
  }
}

module attributes {stable_mosaic.version = 11 : i64} {
  func.func @_layernorm_kernel(%arg0: i32, %arg1: i32, %arg2: memref<1x6x32xf32, #tpu.memory_space<vmem>>, %arg3: memref<1x32xf32, #tpu.memory_space<vmem>>, %arg4: memref<1x32xf32, #tpu.memory_space<vmem>>, %arg5: memref<1x6x32xf32, #tpu.memory_space<vmem>>) attributes {dimension_semantics = [#tpu.dimension_semantics<parallel>, #tpu.dimension_semantics<parallel>], iteration_bounds = array<i64: 2, 1>, scalar_prefetch = 0 : i64, scratch_operands = 0 : i64, tpu.core_type = #tpu.core_type<tc>, window_params = [{transform_indices = @transform_0, window_bounds = array<i64: 1, 6, 32>}, {pipeline_mode = #tpu.pipeline_mode<synchronous>, transform_indices = @transform_1, window_bounds = array<i64: 1, 32>}, {pipeline_mode = #tpu.pipeline_mode<synchronous>, transform_indices = @transform_2, window_bounds = array<i64: 1, 32>}, {transform_indices = @transform_3, window_bounds = array<i64: 1, 6, 32>}]} {
    %c0 = arith.constant 0 : index
    %c0_0 = arith.constant 0 : index
    %c0_1 = arith.constant 0 : index
    %0 = vector.load %arg2[%c0, %c0_0, %c0_1] : memref<1x6x32xf32, #tpu.memory_space<vmem>>, vector<1x6x32xf32>
    %1 = vector.shape_cast %0 : vector<1x6x32xf32> to vector<6x32xf32>
    %cst = arith.constant dense<0.000000e+00> : vector<6xf32>
    %2 = vector.multi_reduction <add>, %1, %cst [1] : vector<6x32xf32> to vector<6xf32>
    %3 = vector.shape_cast %2 : vector<6xf32> to vector<6x1xf32>
    %cst_2 = arith.constant 3.200000e+01 : f32
    %4 = vector.broadcast %cst_2 : f32 to vector<6x1xf32>
    %5 = arith.divf %3, %4 : vector<6x1xf32>
    %6 = vector.broadcast %5 : vector<6x1xf32> to vector<6x32xf32>
    %7 = arith.subf %1, %6 : vector<6x32xf32>
    %8 = arith.mulf %7, %7 : vector<6x32xf32>
    %cst_3 = arith.constant dense<0.000000e+00> : vector<6xf32>
    %9 = vector.multi_reduction <add>, %8, %cst_3 [1] : vector<6x32xf32> to vector<6xf32>
    %10 = vector.shape_cast %9 : vector<6xf32> to vector<6x1xf32>
    %cst_4 = arith.constant 3.200000e+01 : f32
    %11 = vector.broadcast %cst_4 : f32 to vector<6x1xf32>
    %12 = arith.divf %10, %11 : vector<6x1xf32>
    %cst_5 = arith.constant 9.99999996E-13 : f32
    %13 = vector.broadcast %cst_5 : f32 to vector<6x1xf32>
    %14 = arith.addf %12, %13 : vector<6x1xf32>
    %15 = math.rsqrt %14 : vector<6x1xf32>
    %16 = vector.broadcast %15 : vector<6x1xf32> to vector<6x32xf32>
    %17 = arith.mulf %7, %16 : vector<6x32xf32>
    %c0_6 = arith.constant 0 : index
    %c0_7 = arith.constant 0 : index
    %18 = vector.load %arg3[%c0_6, %c0_7] : memref<1x32xf32, #tpu.memory_space<vmem>>, vector<1x32xf32>
    %19 = vector.broadcast %18 : vector<1x32xf32> to vector<6x32xf32>
    %20 = arith.mulf %17, %19 : vector<6x32xf32>
    %c0_8 = arith.constant 0 : index
    %c0_9 = arith.constant 0 : index
    %21 = vector.load %arg4[%c0_8, %c0_9] : memref<1x32xf32, #tpu.memory_space<vmem>>, vector<1x32xf32>
    %22 = vector.broadcast %21 : vector<1x32xf32> to vector<6x32xf32>
    %23 = arith.addf %20, %22 : vector<6x32xf32>
    %c0_10 = arith.constant 0 : index
    %c0_11 = arith.constant 0 : index
    %c0_12 = arith.constant 0 : index
    %24 = vector.load %arg5[%c0_10, %c0_11, %c0_12] : memref<1x6x32xf32, #tpu.memory_space<vmem>>, vector<1x6x32xf32>
    %25 = vector.shape_cast %24 : vector<1x6x32xf32> to vector<6x32xf32>
    %26 = vector.shape_cast %23 : vector<6x32xf32> to vector<1x6x32xf32>
    tpu.vector_store %arg5[%c0_10, %c0_11, %c0_12], %26 {strides = array<i32>} : memref<1x6x32xf32, #tpu.memory_space<vmem>>, vector<1x6x32xf32>,
    return
  }
  func.func @transform_0(%arg0: i32, %arg1: i32) -> (i32, i32, i32) {
    %c0_i32 = arith.constant 0 : i32
    %c0_i32_0 = arith.constant 0 : i32
    return %arg0, %arg1, %c0_i32 : i32, i32, i32
  }
  func.func @transform_1(%arg0: i32, %arg1: i32) -> (i32, i32) {
    %c0_i32 = arith.constant 0 : i32
    %c0_i32_0 = arith.constant 0 : i32
    %c0_i32_1 = arith.constant 0 : i32
    return %c0_i32, %c0_i32_0 : i32, i32
  }
  func.func @transform_2(%arg0: i32, %arg1: i32) -> (i32, i32) {
    %c0_i32 = arith.constant 0 : i32
    %c0_i32_0 = arith.constant 0 : i32
    %c0_i32_1 = arith.constant 0 : i32
    return %c0_i32, %c0_i32_0 : i32, i32
  }
  func.func @transform_3(%arg0: i32, %arg1: i32) -> (i32, i32, i32) {
    %c0_i32 = arith.constant 0 : i32
    %c0_i32_0 = arith.constant 0 : i32
    return %arg0, %arg1, %c0_i32 : i32, i32, i32
  }
}

</mosaic_0001>

<bundles_post_ra>
// kernel: _forward_core.11
= control target key start
LH: loop header
LB: loop body
LE: loop exit
PB: predicated region body
PF: predicated region fallthrough
CT: control target
= control target key end

     0   :  { %s385_s12 = smov 0   ;;  %s387_s13 = smov 0   ;;  %s427_s0 = inlined_call_operand.vmem [shape: f32[2,6,32], index: 0, kind: input, shape index: {}]   ;;  %s428_s1 = inlined_call_operand.vmem [shape: f32[1,32], index: 1, kind: input, shape index: {}]   ;;  %s429_s2 = inlined_call_operand.vmem [shape: f32[1,32], index: 2, kind: input, shape index: {}]   ;;  %s430_s3 = inlined_call_operand.vmem [shape: f32[2,6,32], index: 3, kind: output, shape index: {}]  }
   0x1   :  { %s389_s14 = smov 0  }
   0x2 LB: > { %s25_s15 = sadd.s32 1, %s359_s13  ;;  %p308_p0 = scmp.ge.s32.totalorder %s363_s14, 1  ;;  %s363_s14 = sphi %s389_s14, %s13_s14   ;;  %s359_s13 = sphi %s387_s13, %s432_s13   ;;  %s355_s12 = sphi %s385_s12, %s431_s12  }
   0x3   : > { %p27_p1 = scmp.ge.s32.totalorder %s25_s15, 2  ;;  %p155_p2 = scmp.lt.s32.totalorder %s363_s14, 3 }
   0x5   : > { %s434_s15 = smov (%p27_p1, %s25_s15), 0  ;;  %p156_p3 = pnand %p308_p0, %p155_p2 }
   0x6   : > { %p183_p4 = scmp.lt.s32.totalorder (!%p156_p3), %s355_s12, 1  ;;  %vm198_vm0 = vcmask (!%p156_p3), 259072   ;;  %v311_v11 = vld [vmem:[%s428_s1] ss:$0 sm:$0xff] (!%p156_p3) }
   0x7   : > { %159 = sbr.rel (%p156_p3) target bundleno = 332 (0x14c), region = 32  ;;  %v312_v13 = vld [vmem:[%s429_s2] ss:$0 sm:$0xff] (!%p156_p3) }
   0xe   : > { %s436_s12 = smov (!%p183_p4, %s355_s12), 1 }
   0xf   : > { %s309_s16 = sshll.u32 %s436_s12, 3 }
  0x10   : > { %s189_s19 = scalar_lea.vmem %s427_s0, %s309_s16  ;;  %s196_s26 = scalar_lea.vmem %s430_s3, %s309_s16 }
  0x11   : > { %v197_v0 = vld [vmem:[%s189_s19] sm:$0x3f] }
  0x12   : > { %v199_v1 = vsel %vm198_vm0, %v197_v0, 0.0 }
  0x13   : > { %200 = vadd.xlane.f32.xlu0 %v199_v1 }
  0xa0   : > { %v201_v2 = vpop.xlane.xlu0 %200 }
  0xa1   : > { %v203_v3 = vmul.f32 0.03125, %v201_v2 }
  0xa3   : > { %v204_v4 = vsub.f32 %v197_v0, %v203_v3 }
  0xa5   : > { %v205_v5 = vmul.f32 %v204_v4, %v204_v4 }
  0xa7   : > { %v206_v6 = vsel %vm198_vm0, %v205_v5, 0.0 }
  0xa8   : > { %207 = vadd.xlane.f32.xlu0 %v206_v6 }
 0x135   : > { %v208_v7 = vpop.xlane.xlu0 %207 }
 0x136   : > { %v209_v8 = vmul.f32 0.03125, %v208_v7 }
 0x138   : > { %v210_v9 = vadd.f32 1e-12, %v209_v8 }
 0x13a   : > { %339 = vrsqrt.f32 %v210_v9 }
 0x144   : > { %v340_v10 = vpop.eup %339 }
 0x145   : > { %v212_v12 = vmul.f32 %v340_v10, %v204_v4 }
 0x147   : > { %v220_v14 = vmul.f32 %v311_v11, %v212_v12 }
 0x149   : > { %v228_v15 = vadd.f32 %v312_v13, %v220_v14 }
 0x14b   : > { %229 = vst.msk [vmem:[%s196_s26] sm:$0x3f] %vm198_vm0, %v228_v15 }
 0x14c PF: > { %s13_s14 = sadd.s32 1, %s363_s14   ;;  %s431_s12 = smov %s359_s13 }
 0x14d   : > { %p10_p5 = scmp.ge.s32.totalorder %s13_s14, 4   ;;  %s432_s13 = smov %s434_s15 }
 0x14f   :  { %12 = sbr.rel (!%p10_p5) target bundleno = 2 (0x2), region = 62 }

// kernel: _forward_core.8
= control target key start
LH: loop header
LB: loop body
LE: loop exit
PB: predicated region body
PF: predicated region fallthrough
CT: control target
= control target key end

     0   :  { %s716_s24 = smov 0   ;;  %s718_s25 = smov 0   ;;  %s789_s0 = inlined_call_operand.vmem [shape: f32[2,6,32], index: 0, kind: input, shape index: {}]   ;;  %s790_s1 = inlined_call_operand.vmem [shape: f32[1,32], index: 1, kind: input, shape index: {}]   ;;  %s791_s2 = inlined_call_operand.vmem [shape: f32[1,32], index: 2, kind: input, shape index: {}]   ;;  %s792_s3 = inlined_call_operand.vmem [shape: bf16[32,64], index: 3, kind: input, shape index: {}]   ;;  %s793_s4 = inlined_call_operand.vmem [shape: f32[1,64], index: 4, kind: input, shape index: {}]   ;;  %s794_s5 = inlined_call_operand.vmem [shape: bf16[64,32], index: 5, kind: input, shape index: {}]   ;;  %s795_s6 = inlined_call_operand.vmem [shape: f32[1,32], index: 6, kind: input, shape index: {}]   ;;  %s796_s7 = inlined_call_operand.vmem [shape: f32[2,6,32], index: 7, kind: output, shape index: {}]  }
   0x1   :  { %s720_s26 = smov 0  }
   0x2 LB: > { %s29_s27 = sadd.s32 1, %s668_s25  ;;  %p571_p0 = scmp.ge.s32.totalorder %s672_s26, 1  ;;  %s672_s26 = sphi %s720_s26, %s17_s26   ;;  %s668_s25 = sphi %s718_s25, %s798_s25   ;;  %s664_s24 = sphi %s716_s24, %s797_s24  }
   0x3   : > { %p31_p1 = scmp.ge.s32.totalorder %s29_s27, 2  ;;  %p255_p2 = scmp.lt.s32.totalorder %s672_s26, 3 }
   0x5   : > { %s800_s27 = smov (%p31_p1, %s29_s27), 0  ;;  %p256_p3 = pnand %p571_p0, %p255_p2 }
   0x6   : > { %p291_p4 = scmp.lt.s32.totalorder (!%p256_p3), %s664_s24, 1  ;;  %vm307_vm0 = vcmask (!%p256_p3), 259072   ;;  %v642_v7 = vld [vmem:[%s792_s3] sm:$0xff] (!%p256_p3)   ;;  %v674_v8 = vmov (!%p256_p3), 0.0   ;;  %v643_v9 = vld [vmem:[%s792_s3 + $0x8] sm:$0xff] (!%p256_p3)   ;;  %vm675_vm1 = vmmov (!%p256_p3), 0  }
   0x7   : > { %259 = sbr.rel (%p256_p3) target bundleno = 768 (0x300), region = 48  ;;  %596 = vmatprep.subr.bf16.mxu0 (!%p256_p3), %v674_v8  ;;  %604 = vmatprep.subr.bf16.mxu1 (!%p256_p3), %v674_v8  ;;  %v644_v10 = vld [vmem:[%s794_s5] sm:$0xff] (!%p256_p3)   ;;  %v645_v11 = vld [vmem:[%s794_s5 + $0x8] sm:$0xff] (!%p256_p3)   ;;  %vm362_vm2 = vcmask (!%p256_p3), 261120   ;;  %v646_v22 = vld [vmem:[%s794_s5 + $0x10] sm:$0xff] (!%p256_p3)   ;;  %vm447_vm3 = vcmask (!%p256_p3), 523264  }
   0x8   : > { %597 = vmatpush3.bf16.msra.mxu0 (!%p256_p3), %v642_v7  ;;  %600 = vmatprep.mubr.msk.bf16.mxu0 (!%p256_p3), %vm675_vm1, %v674_v8  ;;  %v574_v16 = vld [vmem:[%s790_s1] ss:$0 sm:$0xff] (!%p256_p3)  ;;  %v647_v23 = vld [vmem:[%s794_s5 + $0x18] sm:$0xff] (!%p256_p3)  }
   0x9   : > { %598 = vmatprep.subr.bf16.mxu0 (!%p256_p3), %v674_v8  ;;  %612 = vmatprep.mubr.msk.bf16.mxu1 (!%p256_p3), %vm675_vm1, %v674_v8  ;;  %v575_v18 = vld [vmem:[%s791_s2] ss:$0 sm:$0xff] (!%p256_p3) }
   0xa   : > { %605 = vmatpush3.bf16.msra.mxu1 (!%p256_p3), %v644_v10  ;;  %v576_v24 = vld [vmem:[%s793_s4] ss:$0 sm:$0xff] (!%p256_p3) }
   0xb   : > { %606 = vmatprep.subr.bf16.mxu1 (!%p256_p3), %v674_v8  ;;  %v580_v32 = vld [vmem:[%s795_s6] ss:$0 sm:$0xff] (!%p256_p3) }
   0xc   : > { %599 = vmatpush3.bf16.msra.mxu0 (!%p256_p3), %v643_v9 }
   0xe   : > { %s802_s24 = smov (!%p291_p4, %s664_s24), 1  ;;  %607 = vmatpush3.bf16.msra.mxu1 %v645_v11 }
   0xf   : > { %s572_s28 = sshll.u32 %s802_s24, 3  ;;  %608 = vmatprep.subr.bf16.mxu1 %v674_v8 }
  0x10   : > { %s297_s8 = scalar_lea.vmem %s789_s0, %s572_s28  ;;  %s304_s13 = scalar_lea.vmem %s796_s7, %s572_s28 }
  0x11   : > { %v306_v0 = vld [vmem:[%s297_s8] sm:$0x3f] }
  0x12   : > { %v308_v1 = vsel %vm307_vm0, %v306_v0, 0.0  ;;  %609 = vmatpush3.bf16.msra.mxu1 %v646_v22 }
  0x13   : > { %309 = vadd.xlane.f32.xlu0 %v308_v1  ;;  %610 = vmatprep.subr.bf16.mxu1 %v674_v8 }
  0x16   : > { %611 = vmatpush3.bf16.msra.mxu1 %v647_v23 }
  0xa0   : > { %v310_v2 = vpop.xlane.xlu0 %309 }
  0xa1   : > { %v312_v3 = vmul.f32 0.03125, %v310_v2 }
  0xa3   : > { %v313_v4 = vsub.f32 %v306_v0, %v312_v3 }
  0xa5   : > { %v314_v5 = vmul.f32 %v313_v4, %v313_v4 }
  0xa7   : > { %v315_v6 = vsel %vm307_vm0, %v314_v5, 0.0 }
  0xa8   : > { %316 = vadd.xlane.f32.xlu0 %v315_v6 }
 0x135   : > { %v317_v12 = vpop.xlane.xlu0 %316 }
 0x136   : > { %v318_v13 = vmul.f32 0.03125, %v317_v12 }
 0x138   : > { %v319_v14 = vadd.f32 1e-12, %v318_v13 }
 0x13a   : > { %648 = vrsqrt.f32 %v319_v14 }
 0x144   : > { %v649_v15 = vpop.eup %648 }
 0x145   : > { %v321_v17 = vmul.f32 %v649_v15, %v313_v4 }
 0x147   : > { %v329_v19 = vmul.f32 %v574_v16, %v321_v17 }
 0x149   : > { %v337_v20 = vadd.f32 %v575_v18, %v329_v19 }
 0x14b   : > { %v338_v21 = vpack.c.bf16 %v337_v20, %v337_v20 }
 0x14d   : > { %601 = vmatmul.mubr.msk.bf16.vlgmr.msra.gmra.mrb[0].mxu0 %vm362_vm2, %v338_v21 }
 0x220   : > { %v400_v25 = vpop.f32.mrb[0].mxu0 }
 0x221   : > { %v401_v26 = vadd.f32 %v576_v24, %v400_v25  ;;  %v602_v27 = vpop.f32.mrb[1].mxu0 }
 0x222   : > { %v403_v28 = vpop.f32.mrb[2].mxu0 }
 0x223   : > { %v406_v29 = vmax.f32 %v401_v26, 0.0  ;;  %v603_v30 = vpop.f32.mrb[3].mxu0 }
 0x225   : > { %v407_v31 = vpack.c.bf16 %v406_v29, %v406_v29 }
 0x227   : > { %613 = vmatmul.mubr.msk.bf16.vlgmr.msra.gmra.mrb[0].mxu1 %vm447_vm3, %v407_v31 }
 0x2fa   : > { %v485_v33 = vpop.f32.mrb[0].mxu1 }
 0x2fb   : > { %v486_v34 = vadd.f32 %v580_v32, %v485_v33  ;;  %v614_v35 = vpop.f32.mrb[1].mxu1 }
 0x2fc   : > { %v488_v36 = vpop.f32.mrb[2].mxu1 }
 0x2fd   : > { %v491_v37 = vadd.f32 %v486_v34, %v306_v0  ;;  %v615_v38 = vpop.f32.mrb[3].mxu1 }
 0x2ff   : > { %492 = vst.msk [vmem:[%s304_s13] sm:$0x3f] %vm307_vm0, %v491_v37 }
 0x300 PF: > { %s17_s26 = sadd.s32 1, %s672_s26   ;;  %s797_s24 = smov %s668_s25 }
 0x301   : > { %p14_p5 = scmp.ge.s32.totalorder %s17_s26, 4   ;;  %s798_s25 = smov %s800_s27 }
 0x303   :  { %16 = sbr.rel (!%p14_p5) target bundleno = 2 (0x2), region = 78 }

// kernel: _forward_core.7
= control target key start
LH: loop header
LB: loop body
LE: loop exit
PB: predicated region body
PF: predicated region fallthrough
CT: control target
= control target key end

     0   :  { %s1272_s27 = smov 0   ;;  %s1404_s0 = inlined_call_operand.vmem [shape: f32[2,6,32], index: 0, kind: input, shape index: {}]   ;;  %s1405_s1 = inlined_call_operand.vmem [shape: f32[1,32], index: 1, kind: input, shape index: {}]   ;;  %s1406_s2 = inlined_call_operand.vmem [shape: f32[1,32], index: 2, kind: input, shape index: {}]   ;;  %s1407_s3 = inlined_call_operand.vmem [shape: bf16[32,96], index: 3, kind: input, shape index: {}]   ;;  %s1408_s4 = inlined_call_operand.vmem [shape: f32[1,96], index: 4, kind: input, shape index: {}]   ;;  %s1409_s5 = inlined_call_operand.vmem [shape: f32[2,1,6], index: 5, kind: input, shape index: {}]   ;;  %s1410_s6 = inlined_call_operand.vmem [shape: bf16[32,32], index: 6, kind: input, shape index: {}]   ;;  %s1411_s7 = inlined_call_operand.vmem [shape: f32[1,32], index: 7, kind: input, shape index: {}]   ;;  %s1412_s8 = inlined_call_operand.vmem [shape: f32[2,6,32], index: 8, kind: output, shape index: {}]  }
   0x1 LB: > { %s1037_s28 = sadd.s32 4294967295, %s1209_s27   ;;  %p1041_p0 = scmp.ge.s32.totalorder %s1209_s27, 1  ;;  %s1209_s27 = sphi %s1272_s27, %s18_s27  }
   0x2   : > { %p269_p1 = scmp.lt.s32.totalorder %s1209_s27, 3 }
   0x4   : > { %p270_p2 = pnand %p1041_p0, %p269_p1 }
   0x5   : > { %p304_p3 = scmp.lt.s32.totalorder (!%p270_p2), %s1037_s28, 1  ;;  %vm317_vm0 = vcmask (!%p270_p2), 259072   ;;  %v1181_v7 = vld [vmem:[%s1407_s3] sm:$0xff] (!%p270_p2)   ;;  %v1211_v8 = vmov (!%p270_p2), 0.0   ;;  %vm1212_vm1 = vmmov (!%p270_p2), 0   ;;  %v1182_v9 = vld [vmem:[%s1407_s3 + $0x8] sm:$0xff] (!%p270_p2)  }
   0x6   : > { %273 = sbr.rel (%p270_p2) target bundleno = 1818 (0x71a), region = 52  ;;  %1093 = vmatprep.subr.bf16.mxu0 (!%p270_p2), %v1211_v8  ;;  %1097 = vmatprep.mubr.msk.bf16.mxu0 (!%p270_p2), %vm1212_vm1, %v1211_v8  ;;  %v1044_v14 = vld [vmem:[%s1405_s1] ss:$0 sm:$0xff] (!%p270_p2)  ;;  %vm372_vm2 = vcmask (!%p270_p2), 261120   ;;  %s1213_s21 = smov (!%p270_p2), 120   ;;  %vm421_vm3 = vcmask (!%p270_p2), 64512  }
   0x7   : > { %1094 = vmatpush3.bf16.msra.mxu0 (!%p270_p2), %v1181_v7  ;;  %1101 = vmatprep.subr.bf16.mxu1 (!%p270_p2), %v1211_v8  ;;  %v1045_v16 = vld [vmem:[%s1406_s2] ss:$0 sm:$0xff] (!%p270_p2)  ;;  %s1214_s22 = smov (!%p270_p2), 96   ;;  %s1215_s23 = smov (!%p270_p2), 88   ;;  %vm476_vm4 = vcmask (!%p270_p2), 46080   ;;  %vm495_vm5 = vcmask (!%p270_p2), 1042432  }
   0x8   : > { %1095 = vmatprep.subr.bf16.mxu0 (!%p270_p2), %v1211_v8  ;;  %1103 = vmatprep.mubr.msk.bf16.mxu1 (!%p270_p2), %vm1212_vm1, %v1211_v8  ;;  %v1046_v20 = vld [vmem:[%s1408_s4] ss:$0 sm:$0xff] (!%p270_p2)  ;;  %s1216_s24 = smov (!%p270_p2), 80   ;;  %s1217_s25 = smov (!%p270_p2), 112   ;;  %vm491_vm6 = vcmask (!%p270_p2), 48128   ;;  %vm540_vm7 = vcmask (!%p270_p2), 59392  }
   0x9   : > { %s1218_s26 = smov (!%p270_p2), 72   ;;  %s1219_s30 = smov (!%p270_p2), 104   ;;  %vm661_vm8 = vcmask (!%p270_p2), 124992   ;;  %vm782_vm9 = vcmask (!%p270_p2), 190592   ;;  %vm903_vm10 = vcmask (!%p270_p2), 256192  }
   0xa   : > { %s1220_s12 = smov (!%p270_p2), 64   ;;  %s1221_s13 = smov (!%p270_p2), 56  }
   0xb   : > { %1096 = vmatpush3.bf16.msra.mxu0 (!%p270_p2), %v1182_v9  ;;  %s1222_s14 = smov (!%p270_p2), 48   ;;  %s1223_s15 = smov (!%p270_p2), 40  }
   0xc   : > { %1107 = vmatprep.subr.bf16.mxu0 (!%p270_p2), %v1211_v8  ;;  %s1224_s16 = smov (!%p270_p2), 8  }
   0xd   : > { %s1414_s28 = smov (!%p304_p3, %s1037_s28), 1 }
   0xe   : > { %s1042_s29 = sshll.u32 %s1414_s28, 3  ;;  %s310_s11 = scalar_lea.vmem %s1409_s5, %s1414_s28 }
   0xf   : > { %s307_s10 = scalar_lea.vmem %s1404_s0, %s1042_s29  ;;  %v1051_v39 = vld [vmem:[%s310_s11] ss:$0 sm:$0xff] }
  0x10   : > { %v1288_v0 = vld [vmem:[%s307_s10] sm:$0x3f] }
  0x11   : > { %v318_v1 = vsel %vm317_vm0, %v1288_v0, 0.0 }
  0x12   : > { %319 = vadd.xlane.f32.xlu0 %v318_v1 }
  0x9f   : > { %v320_v2 = vpop.xlane.xlu0 %319 }
  0xa0   : > { %v322_v3 = vmul.f32 0.03125, %v320_v2 }
  0xa2   : > { %v323_v4 = vsub.f32 %v1288_v0, %v322_v3 }
  0xa4   : > { %v324_v5 = vmul.f32 %v323_v4, %v323_v4 }
  0xa6   : > { %v325_v6 = vsel %vm317_vm0, %v324_v5, 0.0 }
  0xa7   : > { %326 = vadd.xlane.f32.xlu0 %v325_v6 }
 0x134   : > { %v327_v10 = vpop.xlane.xlu0 %326 }
 0x135   : > { %v328_v11 = vmul.f32 0.03125, %v327_v10 }
 0x137   : > { %v329_v12 = vadd.f32 1e-12, %v328_v11 }
 0x139   : > { %1185 = vrsqrt.f32 %v329_v12 }
 0x143   : > { %v1186_v13 = vpop.eup %1185 }
 0x144   : > { %v331_v15 = vmul.f32 %v1186_v13, %v323_v4 }
 0x146   : > { %v339_v17 = vmul.f32 %v1044_v14, %v331_v15 }
 0x148   : > { %v347_v18 = vadd.f32 %v1045_v16, %v339_v17 }
 0x14a   : > { %v348_v19 = vpack.c.bf16 %v347_v18, %v347_v18 }
 0x14c   : > { %1098 = vmatmul.mubr.msk.bf16.vlgmr.msra.gmra.mrb[0].mxu0 %vm372_vm2, %v348_v19 }
 0x14d   : > { %1109 = vmatprep.mubr.msk.bf16.mxu0 %vm1212_vm1, %v1211_v8 }
 0x21f   : > { %v410_v21 = vpop.f32.mrb[0].mxu0 }
 0x220   : > { %v411_v22 = vadd.f32 %v1046_v20, %v410_v21  ;;  %v1099_v23 = vpop.f32.mrb[1].mxu0 }
 0x221   : > { %v413_v24 = vpop.f32.mrb[2].mxu0 }
 0x222   : > { %v1320_v25 = vpack.c.bf16 %v411_v22, %v411_v22  ;;  %v1100_v26 = vpop.f32.mrb[3].mxu0 }
 0x224   : > { %542 = vrot.lane.b32.xlu0 %v1320_v25, %s1213_s21  ;;  %419 = vrot.lane.b32.xlu1 %v1320_v25, %s1214_s22  ;;  %s1225_s21 = smov 16   ;;  %s1226_s22 = smov 24  }
 0x228   : > { %544 = vrot.lane.b32.xlu1 %v1320_v25, %s1215_s23 }
 0x22c   : > { %665 = vrot.lane.b32.xlu1 %v1320_v25, %s1216_s24 }
 0x230   : > { %663 = vrot.lane.b32.xlu1 %v1320_v25, %s1217_s25 }
 0x234   : > { %786 = vrot.lane.b32.xlu1 %v1320_v25, %s1218_s26 }
 0x238   : > { %784 = vrot.lane.b32.xlu1 %v1320_v25, %s1219_s30  ;;  %s314_s30 = scalar_lea.vmem %s1412_s8, %s1042_s29 }
 0x296   : > { %v420_v27 = vpop.permute.xlu1 %419  ;;  %v543_v32 = vpop.permute.xlu0 %542 }
 0x297   : > { %v426_v28 = vsel %vm421_vm3, %v420_v27, 0 }
 0x298   : > { %1102 = vmatpush3.bf16.xpose.msra.mxu1 %v426_v28 }
 0x299   : > { %1113 = vmatprep.subr.bf16.mxu1 %v1211_v8 }
 0x29a   : > { %v545_v29 = vpop.permute.xlu1 %544 }
 0x29b   : > { %v550_v30 = vsel %vm421_vm3, %v545_v29, 0 }
 0x29e   : > { %v666_v31 = vpop.permute.xlu1 %665 }
 0x29f   : > { %1104 = vmatmul.mubr.msk.bf16.vlgmr.msra.gmra.mrb[0].mxu1 %vm421_vm3, %v1320_v25  ;;  %v671_v34 = vsel %vm421_vm3, %v666_v31, 0 }
 0x2a0   : > { %1114 = vmatpush3.bf16.xpose.msra.mxu1 %v550_v30  ;;  %1115 = vmatprep.mubr.msk.bf16.mxu1 %vm1212_vm1, %v1211_v8 }
 0x2a1   : > { %1125 = vmatprep.subr.bf16.mxu1 %v1211_v8 }
 0x2a2   : > { %v664_v33 = vpop.permute.xlu1 %663 }
 0x2a6   : > { %v787_v35 = vpop.permute.xlu1 %786 }
 0x2a7   : > { %1116 = vmatmul.mubr.msk.bf16.vlgmr.msra.gmra.mrb[4].mxu1 %vm421_vm3, %v543_v32  ;;  %v792_v36 = vsel %vm421_vm3, %v787_v35, 0 }
 0x2a8   : > { %1126 = vmatpush3.bf16.xpose.msra.mxu1 %v671_v34  ;;  %1127 = vmatprep.mubr.msk.bf16.mxu1 %vm1212_vm1, %v1211_v8 }
 0x2a9   : > { %1137 = vmatprep.subr.bf16.mxu1 %v1211_v8 }
 0x2aa   : > { %v785_v37 = vpop.permute.xlu1 %784 }
 0x2af   : > { %1128 = vmatmul.mubr.msk.bf16.vlgmr.msra.gmra.mrb[8].mxu1 %vm421_vm3, %v664_v33 }
 0x2b0   : > { %1138 = vmatpush3.bf16.xpose.msra.mxu1 %v792_v36  ;;  %1139 = vmatprep.mubr.msk.bf16.mxu1 %vm1212_vm1, %v1211_v8 }
 0x2b1   : > { %1149 = vmatprep.subr.bf16.mxu1 %v1211_v8 }
 0x2b7   : > { %1140 = vmatmul.mubr.msk.bf16.vlgmr.msra.gmra.mrb[12].mxu1 %vm421_vm3, %v785_v37 }
 0x2b8   : > { %1153 = vmatprep.mubr.msk.bf16.mxu1 %vm1212_vm1, %v1211_v8 }
 0x372   : > { %v462_v38 = vpop.f32.mrb[0].mxu1 }
 0x373   : > { %v468_v40 = vmul.f32 0.35355338, %v462_v38  ;;  %v1105_v41 = vpop.f32.mrb[1].mxu1 }
 0x374   : > { %v465_v42 = vpop.f32.mrb[2].mxu1 }
 0x375   : > { %v1106_v43 = vpop.f32.mrb[3].mxu1  ;;  %v475_v44 = vadd.f32 %v1051_v39, %v468_v40 }
 0x377   : > { %v477_v45 = vsel %vm476_vm4, %v475_v44, -inf }
 0x378   : > { %478 = vmax.xlane.f32.xlu1 %v477_v45 }
 0x37a   : > { %v586_v46 = vpop.f32.mrb[4].mxu1 }
 0x37b   : > { %v592_v47 = vmul.f32 0.35355338, %v586_v46  ;;  %v1117_v48 = vpop.f32.mrb[5].mxu1 }
 0x37c   : > { %v589_v49 = vpop.f32.mrb[6].mxu1 }
 0x37d   : > { %v1118_v50 = vpop.f32.mrb[7].mxu1  ;;  %v593_v51 = vadd.f32 %v1051_v39, %v592_v47 }
 0x37f   : > { %v594_v52 = vsel %vm476_vm4, %v593_v51, -inf }
 0x380   : > { %595 = vmax.xlane.f32.xlu0 %v594_v52 }
 0x382   : > { %v707_v53 = vpop.f32.mrb[8].mxu1 }
 0x383   : > { %v713_v54 = vmul.f32 0.35355338, %v707_v53  ;;  %v1129_v55 = vpop.f32.mrb[9].mxu1 }
 0x384   : > { %v710_v56 = vpop.f32.mrb[10].mxu1 }
 0x385   : > { %v1130_v57 = vpop.f32.mrb[11].mxu1  ;;  %v714_v58 = vadd.f32 %v1051_v39, %v713_v54 }
 0x387   : > { %v715_v59 = vsel %vm476_vm4, %v714_v58, -inf }
 0x388   : > { %716 = vmax.xlane.f32.xlu1 %v715_v59  ;;  %v1183_v59 = vld [vmem:[%s1410_s6] sm:$0xff]  }
 0x389   : > { %1150 = vmatpush3.bf16.msra.mxu1 %v1183_v59 }
 0x38a   : > { %v828_v60 = vpop.f32.mrb[12].mxu1  ;;  %1151 = vmatprep.subr.bf16.mxu1 %v1211_v8 }
 0x38b   : > { %v834_v61 = vmul.f32 0.35355338, %v828_v60  ;;  %v1141_v62 = vpop.f32.mrb[13].mxu1 }
 0x38c   : > { %v831_v63 = vpop.f32.mrb[14].mxu1 }
 0x38d   : > { %v1142_v1 = vpop.f32.mrb[15].mxu1  ;;  %v835_v2 = vadd.f32 %v1051_v39, %v834_v61  ;;  %v1184_v61 = vld [vmem:[%s1410_s6 + $0x8] sm:$0xff]  }
 0x38e   : > { %1152 = vmatpush3.bf16.msra.mxu1 %v1184_v61 }
 0x38f   : > { %v836_v3 = vsel %vm476_vm4, %v835_v2, -inf }
 0x390   : > { %837 = vmax.xlane.f32.xlu0 %v836_v3 }
 0x405   : > { %v479_v4 = vpop.xlane.xlu1 %478 }
 0x406   : > { %v480_v5 = vsub.f32 %v475_v44, %v479_v4 }
 0x408   : > { %v481_v6 = vmul.f32 1.442695, %v480_v5 }
 0x40a   : > { %1187 = vpow2.f32 %v481_v6 }
 0x40d   : > { %v596_v7 = vpop.xlane.xlu0 %595 }
 0x40e   : > { %v597_v9 = vsub.f32 %v593_v51, %v596_v7 }
 0x410   : > { %v598_v10 = vmul.f32 1.442695, %v597_v9 }
 0x412   : > { %1189 = vpow2.f32 %v598_v10 }
 0x414   : > { %v1188_v11 = vpop.eup %1187 }
 0x415   : > { %v483_v12 = vsel %vm476_vm4, %v1188_v11, 0.0  ;;  %v717_v20 = vpop.xlane.xlu1 %716 }
 0x416   : > { %484 = vadd.xlane.f32.xlu1 %v483_v12  ;;  %v718_v21 = vsub.f32 %v714_v58, %v717_v20 }
 0x418   : > { %v719_v22 = vmul.f32 1.442695, %v718_v21 }
 0x41c   : > { %v1190_v13 = vpop.eup %1189 }
 0x41d   : > { %v838_v14 = vpop.xlane.xlu0 %837  ;;  %v600_v15 = vsel %vm476_vm4, %v1190_v13, 0.0 }
 0x41e   : > { %v839_v16 = vsub.f32 %v835_v2, %v838_v14  ;;  %601 = vadd.xlane.f32.xlu0 %v600_v15 }
 0x420   : > { %v840_v17 = vmul.f32 1.442695, %v839_v16 }
 0x422   : > { %1191 = vpow2.f32 %v840_v17 }
 0x423   : > { %1193 = vpow2.f32 %v719_v22 }
 0x427   : > { %489 = vrot.lane.b32.xlu1 %v1320_v25, %s1220_s12 }
 0x42c   : > { %v1192_v18 = vpop.eup %1191 }
 0x42d   : > { %v842_v19 = vsel %vm476_vm4, %v1192_v18, 0.0  ;;  %v1194_v23 = vpop.eup %1193 }
 0x42e   : > { %843 = vadd.xlane.f32.xlu0 %v842_v19  ;;  %v721_v24 = vsel %vm476_vm4, %v1194_v23, 0.0 }
 0x444   : > { %606 = vrot.lane.b32.xlu0 %v1320_v25, %s1221_s13 }
 0x44b   : > { %722 = vadd.xlane.f32.xlu1 %v721_v24 }
 0x45c   : > { %727 = vrot.lane.b32.xlu1 %v1320_v25, %s1222_s14 }
 0x460   : > { %848 = vrot.lane.b32.xlu1 %v1320_v25, %s1223_s15 }
 0x4a3   : > { %v485_v26 = vpop.xlane.xlu1 %484 }
 0x4a4   : > { %1195 = vrcp.f32 %v485_v26 }
 0x4a7   : > { %v490_v27 = vpop.permute.xlu1 %489 }
 0x4a8   : > { %v497_v28 = vsel %vm495_vm5, %v490_v27, 0 }
 0x4a9   : > { %1108 = vmatpush3.bf16.msra.mxu0 %v497_v28 }
 0x4aa   : > { %1119 = vmatprep.subr.bf16.mxu0 %v1211_v8 }
 0x4ab   : > { %v602_v30 = vpop.xlane.xlu0 %601 }
 0x4ac   : > { %1197 = vrcp.f32 %v602_v30 }
 0x4ae   : > { %v1196_v29 = vpop.eup %1195 }
 0x4af   : > { %v487_v31 = vmul.f32 %v1196_v29, %v1188_v11 }
 0x4b1   : > { %v488_v32 = vpack.c.bf16 %v487_v31, %v487_v31 }
 0x4b3   : > { %1110 = vmatmul.mubr.msk.bf16.vlgmr.msra.gmra.mrb[4].mxu0 %vm491_vm6, %v488_v32 }
 0x4b4   : > { %1121 = vmatprep.mubr.msk.bf16.mxu0 %vm1212_vm1, %v1211_v8 }
 0x4b6   : > { %v1198_v25 = vpop.eup %1197 }
 0x4b7   : > { %v604_v34 = vmul.f32 %v1198_v25, %v1190_v13  ;;  %v1065_v13 = vld [vmem:[%s1411_s7] ss:$0 sm:$0xff] }
 0x4b9   : > { %v605_v37 = vpack.c.bf16 %v604_v34, %v604_v34 }
 0x4bb   : > { %v844_v33 = vpop.xlane.xlu0 %843 }
 0x4bf   : > { %v607_v35 = vpop.permute.xlu0 %606 }
 0x4c0   : > { %v612_v36 = vsel %vm495_vm5, %v607_v35, 0 }
 0x4c1   : > { %1120 = vmatpush3.bf16.msra.mxu0 %v612_v36 }
 0x4c2   : > { %1131 = vmatprep.subr.bf16.mxu0 %v1211_v8 }
 0x4c4   : > { %1122 = vmatmul.mubr.msk.bf16.vlgmr.msra.gmra.mrb[8].mxu0 %vm491_vm6, %v605_v37 }
 0x4c5   : > { %1133 = vmatprep.mubr.msk.bf16.mxu0 %vm1212_vm1, %v1211_v8 }
 0x4d8   : > { %v723_v38 = vpop.xlane.xlu1 %722 }
 0x4d9   : > { %1199 = vrcp.f32 %v723_v38 }
 0x4da   : > { %1201 = vrcp.f32 %v844_v33 }
 0x4dc   : > { %v728_v39 = vpop.permute.xlu1 %727 }
 0x4dd   : > { %v733_v40 = vsel %vm495_vm5, %v728_v39, 0 }
 0x4de   : > { %1132 = vmatpush3.bf16.msra.mxu0 %v733_v40 }
 0x4df   : > { %1143 = vmatprep.subr.bf16.mxu0 %v1211_v8 }
 0x4e0   : > { %v849_v43 = vpop.permute.xlu1 %848 }
 0x4e1   : > { %v854_v46 = vsel %vm495_vm5, %v849_v43, 0 }
 0x4e3   : > { %v1200_v41 = vpop.eup %1199 }
 0x4e4   : > { %v725_v42 = vmul.f32 %v1200_v41, %v1194_v23  ;;  %v1202_v45 = vpop.eup %1201 }
 0x4e5   : > { %v846_v47 = vmul.f32 %v1202_v45, %v1192_v18 }
 0x4e6   : > { %v726_v44 = vpack.c.bf16 %v725_v42, %v725_v42 }
 0x4e7   : > { %v847_v48 = vpack.c.bf16 %v846_v47, %v846_v47 }
 0x4e8   : > { %1134 = vmatmul.mubr.msk.bf16.vlgmr.msra.gmra.mrb[12].mxu0 %vm491_vm6, %v726_v44 }
 0x4e9   : > { %1144 = vmatpush3.bf16.msra.mxu0 %v854_v46  ;;  %1145 = vmatprep.mubr.msk.bf16.mxu0 %vm1212_vm1, %v1211_v8 }
 0x4f0   : > { %1146 = vmatmul.mubr.msk.bf16.vlgmr.msra.gmra.mrb[16].mxu0 %vm491_vm6, %v847_v48 }
 0x586   : > { %v533_v49 = vpop.f32.mrb[4].mxu0 }
 0x587   : > { %v539_v50 = vpack.c.bf16 %v533_v49, %v533_v49  ;;  %v1111_v51 = vpop.f32.mrb[5].mxu0 }
 0x588   : > { %v536_v52 = vpop.f32.mrb[6].mxu0 }
 0x589   : > { %541 = vst.msk [vmem:[#allocation2] sm:$0x7] %vm540_vm7, %v539_v50  ;;  %v1112_v53 = vpop.f32.mrb[7].mxu0 }
 0x597   : > { %v648_v54 = vpop.f32.mrb[8].mxu0 }
 0x598   : > { %v1068_v55 = vpack.c.bf16 %v648_v54, %v648_v54  ;;  %v1123_v56 = vpop.f32.mrb[9].mxu0 }
 0x599   : > { %v651_v57 = vpop.f32.mrb[10].mxu0 }
 0x59a   : > { %658 = vrot.lane.b32.xlu0 %v1068_v55, %s1224_s16  ;;  %v1124_v58 = vpop.f32.mrb[11].mxu0 }
 0x5bb   : > { %v769_v60 = vpop.f32.mrb[12].mxu0 }
 0x5bc   : > { %v1069_v62 = vpack.c.bf16 %v769_v60, %v769_v60  ;;  %v1135_v63 = vpop.f32.mrb[13].mxu0 }
 0x5bd   : > { %v772_v1 = vpop.f32.mrb[14].mxu0 }
 0x5be   : > { %779 = vrot.lane.b32.xlu1 %v1069_v62, %s1225_s21  ;;  %v1136_v2 = vpop.f32.mrb[15].mxu0 }
 0x5c3   : > { %v890_v3 = vpop.f32.mrb[16].mxu0 }
 0x5c4   : > { %v1070_v4 = vpack.c.bf16 %v890_v3, %v890_v3  ;;  %v1147_v5 = vpop.f32.mrb[17].mxu0 }
 0x5c5   : > { %v893_v6 = vpop.f32.mrb[18].mxu0 }
 0x5c6   : > { %900 = vrot.lane.b32.xlu0 %v1070_v4, %s1226_s22  ;;  %v1148_v7 = vpop.f32.mrb[19].mxu0 }
 0x60c   : > { %v659_v9 = vpop.permute.xlu0 %658 }
 0x60d   : > { %662 = vst.msk [vmem:[#allocation2] sm:$0x7] %vm661_vm8, %v659_v9 }
 0x630   : > { %v780_v10 = vpop.permute.xlu1 %779 }
 0x631   : > { %783 = vst.msk [vmem:[#allocation2] sm:$0x7] %vm782_vm9, %v780_v10 }
 0x638   : > { %v901_v8 = vpop.permute.xlu0 %900 }
 0x639   : > { %904 = vst.msk [vmem:[#allocation2] sm:$0x7] %vm903_vm10, %v901_v8 }
 0x640   : > { %v905_v11 = vld [vmem:[#allocation2] sm:$0x7] }
 0x641   : > { %1154 = vmatmul.mubr.msk.bf16.vlgmr.msra.gmra.mrb[16].mxu1 %vm372_vm2, %v905_v11 }
 0x714   : > { %v959_v12 = vpop.f32.mrb[16].mxu1 }
 0x715   : > { %v965_v14 = vadd.f32 %v959_v12, %v1288_v0  ;;  %v1155_v15 = vpop.f32.mrb[17].mxu1 }
 0x716   : > { %v962_v16 = vpop.f32.mrb[18].mxu1 }
 0x717   : > { %v973_v17 = vadd.f32 %v1065_v13, %v965_v14  ;;  %v1156_v18 = vpop.f32.mrb[19].mxu1 }
 0x719   : > { %974 = vst.msk [vmem:[%s314_s30] sm:$0x3f] %vm317_vm0, %v973_v17 }
 0x71a PF: > { %s18_s27 = sadd.s32 1, %s1209_s27  }
 0x71b   : > { %p15_p4 = scmp.ge.s32.totalorder %s18_s27, 4  }
 0x71d   :  { %17 = sbr.rel (!%p15_p4) target bundleno = 1 (0x1), region = 85 }

// kernel: _forward_core.6
= control target key start
LH: loop header
LB: loop body
LE: loop exit
PB: predicated region body
PF: predicated region fallthrough
CT: control target
= control target key end

     0   :  { %s3885_s30 = smov 0   ;;  %s4544_s0 = inlined_call_operand.vmem [shape: f32[2,3,7,20], index: 0, kind: input, shape index: {}]   ;;  %s4545_s1 = inlined_call_operand.vmem [shape: f32[2,3,6,20], index: 1, kind: input, shape index: {}]   ;;  %s4546_s2 = inlined_call_operand.vmem [shape: bf16[3,20,288], index: 2, kind: input, shape index: {}]   ;;  %s4547_s3 = inlined_call_operand.vmem [shape: f32[1,288], index: 3, kind: input, shape index: {}]   ;;  %s4548_s4 = inlined_call_operand.vmem [shape: bf16[288,32], index: 4, kind: input, shape index: {}]   ;;  %s4549_s5 = inlined_call_operand.vmem [shape: f32[1,32], index: 5, kind: input, shape index: {}]   ;;  %s4550_s6 = inlined_call_operand.vmem [shape: bf16[128,32], index: 6, kind: input, shape index: {}]   ;;  %s4551_s7 = inlined_call_operand.vmem [shape: f32[1,32], index: 7, kind: input, shape index: {}]   ;;  %s4552_s8 = inlined_call_operand.vmem [shape: f32[6,32], index: 8, kind: input, shape index: {}]   ;;  %s4553_s9 = inlined_call_operand.vmem [shape: f32[2,6,32], index: 9, kind: output, shape index: {}]  }
   0x1 LB: > { %s3121_s10 = sadd.s32 4294967295, %s3827_s30   ;;  %p3125_p0 = scmp.ge.s32.totalorder %s3827_s30, 1  ;;  %s3827_s30 = sphi %s3885_s30, %s19_s30  }
   0x2   : > { %p297_p1 = scmp.lt.s32.totalorder %s3827_s30, 3 }
   0x4   : > { %p298_p2 = pnand %p3125_p0, %p297_p1 }
   0x5   : > { %v3896_v0 = vld [vmem:[%s4546_s2 + $0x28] ss:$12 sps:$4 sm:$0xff] (!%p298_p2)   ;;  %v3901_v1 = vld [vmem:[%s4546_s2 + $0x24] ss:$12 sps:$4 sm:$0xff] (!%p298_p2)   ;;  %v3134_v2 = vld [vmem:[%s4546_s2 + $0x3c] sm:$0x33] (!%p298_p2)  ;;  %v738_v49 = vlaneseq (!%p298_p2) }
   0x6   : > { %301 = sbr.rel (%p298_p2) target bundleno = 1402 (0x57a), region = 56  ;;  %vm398_vm0 = vcmask (!%p298_p2), 1041408   ;;  %v3829_v3 = vmov (!%p298_p2), 0   ;;  %p337_p3 = scmp.lt.s32.totalorder (!%p298_p2), %s3121_s10, 1  ;;  %408 = vmatprep.subr.bf16.mxu0 (!%p298_p2), %v3896_v0  ;;  %v3908_v4 = vcombine.high (!%p298_p2), %v3134_v2, %v3134_v2  ;;  %v3139_v5 = vcombine.low (!%p298_p2), %v3134_v2, %v3134_v2  ;;  %v3922_v8 = vld [vmem:[%s4546_s2 + $0x4] ss:$12 sps:$4 sm:$0xff] (!%p298_p2)  }
   0x7   : > { %440 = vmatprep.mubr.bf16.mxu0 (!%p298_p2), %v3829_v3  ;;  %409 = vmatpush1.bf16.msra.mxu0 (!%p298_p2), %v3901_v1  ;;  %v3830_v6 = vmov (!%p298_p2), 0.0   ;;  %vm3831_vm1 = vmmov (!%p298_p2), 0   ;;  %v358_v9 = vld [vmem:[%s4546_s2 + $0x18] sm:$0x33] (!%p298_p2)  ;;  %v3159_v10 = vld [vmem:[%s4546_s2 + $0x60] sm:$0x33] (!%p298_p2) }
   0x8   : > { %3389 = vmatprep.subr.bf16.mxu1 (!%p298_p2), %v3830_v6  ;;  %3142 = vmatprep.subr.msk.bf16.mxu0 (!%p298_p2), %vm398_vm0, %v3908_v4  ;;  %v3917_v7 = vsel (!%p298_p2), %vm398_vm0, %v3139_v5, 0  ;;  %v3936_v11 = vld [vmem:[%s4546_s2 + $0x2c] ss:$12 sps:$4 sm:$0xff] (!%p298_p2)   ;;  %v3788_v12 = vld [vmem:[%s4546_s2 + $0x44] ss:$0 sps:$4 sm:$0x33] (!%p298_p2)   ;;  %v3148_v15 = vcombine.low (!%p298_p2), %v358_v9, %v358_v9  ;;  %v3149_v17 = vcombine.high (!%p298_p2), %v358_v9, %v358_v9  ;;  %v3164_v18 = vcombine.low (!%p298_p2), %v3159_v10, %v3159_v10 }
   0x9   : > { %3393 = vmatprep.mubr.msk.bf16.mxu1 (!%p298_p2), %vm3831_vm1, %v3830_v6  ;;  %vm394_vm2 = vcmask (!%p298_p2), 162816   ;;  %v3953_v14 = vld [vmem:[%s4546_s2] ss:$12 sps:$4 sm:$0xff] (!%p298_p2)   ;;  %3390 = vmatpush3.bf16.msra.mxu1 (!%p298_p2), %v3936_v11  ;;  %v406_v19 = vsel (!%p298_p2), %vm398_vm0, %v3788_v12, 0  ;;  %v3789_v24 = vld [vmem:[%s4546_s2 + $0x8] ss:$12 sps:$4 sm:$0xff] (!%p298_p2)   ;;  %v3165_v31 = vcombine.high (!%p298_p2), %v3159_v10, %v3159_v10 }
   0xa   : > { %3391 = vmatprep.subr.bf16.mxu1 (!%p298_p2), %v3830_v6  ;;  %v3784_v21 = vld [vmem:[%s4546_s2 + $0x4c] ss:$12 sps:$4 sm:$0xff] (!%p298_p2)   ;;  %v517_v22 = vsel (!%p298_p2), %vm398_vm0, %v3148_v15, 0  ;;  %v3790_v23 = vld [vmem:[%s4546_s2 + $0x20] ss:$0 sps:$4 sm:$0x33] (!%p298_p2)  }
   0xb   : > { %411 = vmatpush1.bf16.msra.mxu0 (!%p298_p2), %v3917_v7  ;;  %v3782_v25 = vld [vmem:[%s4546_s2 + $0x48] ss:$12 sps:$4 sm:$0xff] (!%p298_p2)   ;;  %v3978_v26 = vsel (!%p298_p2), %vm398_vm0, %v3164_v18, 0  ;;  %v523_v29 = vsel (!%p298_p2), %vm398_vm0, %v3790_v23, 0  ;;  %v3791_v33 = vld [vmem:[%s4546_s2 + $0x50] ss:$12 sps:$4 sm:$0xff] (!%p298_p2)  }
   0xc   : > { %525 = vmatprep.subr.bf16.mxu0 (!%p298_p2), %v3922_v8  ;;  %v3792_v27 = vld [vmem:[%s4546_s2 + $0x68] ss:$0 sps:$4 sm:$0x33] (!%p298_p2)   ;;  %v4060_v41 = vld [vmem:[%s4548_s4] sm:$0xff] (!%p298_p2)   ;;  %v4074_v43 = vld [vmem:[%s4548_s4 + $0x10] sm:$0xff] (!%p298_p2)   ;;  %v4085_v50 = vshrl.u32 (!%p298_p2), %v738_v49, 7 }
   0xd   : > { %s4555_s10 = smov (!%p337_p3, %s3121_s10), 1  ;;  %3392 = vmatpush3.bf16.msra.mxu1 %v406_v19  ;;  %v3987_v30 = vsel %vm398_vm0, %v3792_v27, 0  ;;  %v4067_v42 = vld [vmem:[%s4548_s4 + $0x8] sm:$0xff]   ;;  %v4080_v44 = vld [vmem:[%s4548_s4 + $0x18] sm:$0xff]   ;;  %v4091_v58 = vld [vmem:[%s4547_s3] sm:$0x7] }
   0xe   : > { %s3757_s19 = smul.u32 24, %s4555_s10  ;;  %3397 = vmatprep.subr.bf16.mxu1 %v3830_v6  ;;  %v740_v57 = vsub.s32 0, %v4085_v50  ;;  %vm1057_vm3 = vcmask 261120   ;;  %s3832_s23 = smov 96   ;;  %v4106_v12 = vld [vmem:[%s4548_s4 + $0x38] sm:$0xff]   ;;  %vm3054_vm4 = vcmask 259072  }
   0xf   : > { %s3833_s26 = smov 64   ;;  %s3834_s27 = smov 32  }
  0x10   : > { %s3944_s28 = scalar_lea.vmem %s4544_s0, %s3757_s19  ;;  %s4005_s29 = scalar_lea.vmem %s4545_s1, %s3757_s19  ;;  %v741_v59 = vrot.slane %v4091_v58, %v740_v57 }
  0x11   : > { %v3129_v13 = vld [vmem:[%s3944_s28 + $0x8] sm:$0x7f]  ;;  %v352_v20 = vld [vmem:[%s3944_s28] sm:$0x7f]  ;;  %v3154_v32 = vld [vmem:[%s3944_s28 + $0x10] sm:$0x7f] }
  0x12   : > { %v362_v16 = vpack.c.bf16 %v3129_v13, %v3129_v13  ;;  %v353_v28 = vpack.c.bf16 %v352_v20, %v352_v20  ;;  %v608_v34 = vpack.c.bf16 %v3154_v32, %v3154_v32  ;;  %v3170_v35 = vld [vmem:[%s4005_s29 + $0x8] sm:$0x3f]  ;;  %v762_v37 = vld [vmem:[%s4005_s29] sm:$0x3f]  ;;  %v3177_v39 = vld [vmem:[%s4005_s29 + $0x10] sm:$0x3f] }
  0x13   : > { %v766_v36 = vpack.c.bf16 %v3170_v35, %v3170_v35  ;;  %v763_v38 = vpack.c.bf16 %v762_v37, %v762_v37  ;;  %v937_v40 = vpack.c.bf16 %v3177_v39, %v3177_v39  ;;  %s3128_s18 = sshll.u32 %s4555_s10, 3 }
  0x14   : > { %3143 = vmatmul.mubr.msk.bf16.vlgmr.msra.gmra.mrb[0].mxu0 %vm394_vm2, %v362_v16  ;;  %3394 = vmatmul.mubr.msk.bf16.vlgmr.msra.gmra.mrb[0].mxu1 %vm394_vm2, %v362_v16  ;;  %s350_s24 = scalar_lea.vmem %s4553_s9, %s3128_s18 }
  0x15   : > { %526 = vmatpush1.bf16.msra.mxu0 %v3953_v14  ;;  %557 = vmatprep.mubr.bf16.mxu0 %v3829_v3 }
  0x16   : > { %3151 = vmatprep.subr.msk.bf16.mxu0 %vm398_vm0, %v3149_v17  ;;  %3398 = vmatpush3.bf16.msra.mxu1 %v3789_v24 }
  0x17   : > { %3399 = vmatprep.subr.bf16.mxu1 %v3830_v6  ;;  %3401 = vmatprep.mubr.msk.bf16.mxu1 %vm3831_vm1, %v3830_v6 }
  0x19   : > { %528 = vmatpush1.bf16.msra.mxu0 %v517_v22 }
  0x1a   : > { %652 = vmatprep.subr.bf16.mxu0 %v3784_v21  ;;  %3400 = vmatpush3.bf16.msra.mxu1 %v523_v29 }
  0x1b   : > { %3405 = vmatprep.subr.bf16.mxu1 %v3830_v6 }
  0x1c   : > { %3152 = vmatmul.mubr.msk.bf16.vlgmr.msra.gmra.mrb[4].mxu0 %vm394_vm2, %v353_v28 }
  0x1d   : > { %653 = vmatpush1.bf16.msra.mxu0 %v3782_v25  ;;  %684 = vmatprep.mubr.bf16.mxu0 %v3829_v3 }
  0x1e   : > { %3167 = vmatprep.subr.msk.bf16.mxu0 %vm398_vm0, %v3165_v31  ;;  %3402 = vmatmul.mubr.msk.bf16.vlgmr.msra.gmra.mrb[4].mxu1 %vm394_vm2, %v353_v28 }
  0x1f   : > { %3406 = vmatpush3.bf16.msra.mxu1 %v3791_v33  ;;  %3409 = vmatprep.mubr.msk.bf16.mxu1 %vm3831_vm1, %v3830_v6 }
  0x20   : > { %3407 = vmatprep.subr.bf16.mxu1 %v3830_v6 }
  0x21   : > { %655 = vmatpush1.bf16.msra.mxu0 %v3978_v26 }
  0x22   : > { %770 = vmatprep.subr.bf16.mxu0 %v3896_v0 }
  0x23   : > { %3408 = vmatpush3.bf16.msra.mxu1 %v3987_v30 }
  0x24   : > { %3168 = vmatmul.mubr.msk.bf16.vlgmr.msra.gmra.mrb[8].mxu0 %vm394_vm2, %v608_v34  ;;  %3413 = vmatprep.subr.bf16.mxu1 %v3830_v6 }
  0x25   : > { %771 = vmatpush1.bf16.msra.mxu0 %v3901_v1  ;;  %802 = vmatprep.mubr.bf16.mxu0 %v3829_v3 }
  0x26   : > { %3171 = vmatprep.subr.msk.bf16.mxu0 %vm398_vm0, %v3908_v4  ;;  %3410 = vmatmul.mubr.msk.bf16.vlgmr.msra.gmra.mrb[8].mxu1 %vm394_vm2, %v608_v34  ;;  %v4097_v4 = vld [vmem:[%s4548_s4 + $0x30] sm:$0xff]  }
  0x27   : > { %3414 = vmatpush3.bf16.msra.mxu1 %v3936_v11  ;;  %3417 = vmatprep.mubr.msk.bf16.mxu1 %vm3831_vm1, %v3830_v6 }
  0x28   : > { %3415 = vmatprep.subr.bf16.mxu1 %v3830_v6 }
  0x29   : > { %773 = vmatpush1.bf16.msra.mxu0 %v3917_v7  ;;  %v744_v7 = vsub.s32 1, %v4085_v50 }
  0x2a   : > { %854 = vmatprep.subr.bf16.mxu0 %v3922_v8 }
  0x2b   : > { %3416 = vmatpush3.bf16.msra.mxu1 %v406_v19  ;;  %v745_v15 = vrot.slane %v4091_v58, %v744_v7 }
  0x2c   : > { %3172 = vmatmul.mubr.msk.bf16.vlgmr.msra.gmra.mrb[12].mxu0 %vm394_vm2, %v766_v36  ;;  %3421 = vmatprep.subr.bf16.mxu1 %v3830_v6 }
  0x2d   : > { %855 = vmatpush1.bf16.msra.mxu0 %v3953_v14  ;;  %886 = vmatprep.mubr.bf16.mxu0 %v3829_v3 }
  0x2e   : > { %3174 = vmatprep.subr.msk.bf16.mxu0 %vm398_vm0, %v3149_v17  ;;  %3418 = vmatmul.mubr.msk.bf16.vlgmr.msra.gmra.mrb[12].mxu1 %vm394_vm2, %v766_v36 }
  0x2f   : > { %3422 = vmatpush3.bf16.msra.mxu1 %v3789_v24  ;;  %3425 = vmatprep.mubr.msk.bf16.mxu1 %vm3831_vm1, %v3830_v6 }
  0x30   : > { %3423 = vmatprep.subr.bf16.mxu1 %v3830_v6 }
  0x31   : > { %857 = vmatpush1.bf16.msra.mxu0 %v517_v22 }
  0x32   : > { %941 = vmatprep.subr.bf16.mxu0 %v3784_v21 }
  0x33   : > { %3424 = vmatpush3.bf16.msra.mxu1 %v523_v29 }
  0x34   : > { %3175 = vmatmul.mubr.msk.bf16.vlgmr.msra.gmra.mrb[16].mxu0 %vm394_vm2, %v763_v38  ;;  %3429 = vmatprep.subr.bf16.mxu1 %v3830_v6 }
  0x35   : > { %942 = vmatpush1.bf16.msra.mxu0 %v3782_v25  ;;  %973 = vmatprep.mubr.bf16.mxu0 %v3829_v3 }
  0x36   : > { %3178 = vmatprep.subr.msk.bf16.mxu0 %vm398_vm0, %v3165_v31  ;;  %3426 = vmatmul.mubr.msk.bf16.vlgmr.msra.gmra.mrb[16].mxu1 %vm394_vm2, %v763_v38  ;;  %v4130_v38 = vld [vmem:[%s4548_s4 + $0x50] sm:$0xff]  }
  0x37   : > { %3430 = vmatpush3.bf16.msra.mxu1 %v3791_v33  ;;  %3433 = vmatprep.mubr.msk.bf16.mxu1 %vm3831_vm1, %v3830_v6 }
  0x38   : > { %3431 = vmatprep.subr.bf16.mxu1 %v3830_v6 }
  0x39   : > { %944 = vmatpush1.bf16.msra.mxu0 %v3978_v26 }
  0x3a   : > { %3437 = vmatprep.subr.bf16.mxu0 %v3830_v6 }
  0x3b   : > { %3432 = vmatpush3.bf16.msra.mxu1 %v3987_v30 }
  0x3c   : > { %3179 = vmatmul.mubr.msk.bf16.vlgmr.msra.gmra.mrb[20].mxu0 %vm394_vm2, %v937_v40  ;;  %3445 = vmatprep.subr.bf16.mxu1 %v3830_v6 }
  0x3d   : > { %3441 = vmatprep.mubr.msk.bf16.mxu0 %vm3831_vm1, %v3830_v6  ;;  %3438 = vmatpush3.bf16.msra.mxu0 %v4074_v43 }
  0x3e   : > { %3434 = vmatmul.mubr.msk.bf16.vlgmr.msra.gmra.mrb[20].mxu1 %vm394_vm2, %v937_v40  ;;  %3439 = vmatprep.subr.bf16.mxu0 %v3830_v6 }
  0x3f   : > { %3449 = vmatprep.mubr.msk.bf16.mxu1 %vm3831_vm1, %v3830_v6  ;;  %3446 = vmatpush3.bf16.msra.mxu1 %v4060_v41 }
  0x40   : > { %3447 = vmatprep.subr.bf16.mxu1 %v3830_v6 }
  0x41   : > { %3440 = vmatpush3.bf16.msra.mxu0 %v4080_v44 }
  0x42   : > { %3453 = vmatprep.subr.bf16.mxu0 %v3830_v6 }
  0x43   : > { %3448 = vmatpush3.bf16.msra.mxu1 %v4067_v42 }
  0x44   : > { %3461 = vmatprep.subr.bf16.mxu1 %v3830_v6 }
  0xe7   : > { %v442_v45 = vpop.f32.mrb[0].mxu0  ;;  %v483_v49 = vpop.f32.mrb[0].mxu1 }
  0xe8   : > { %v444_v46 = vpop.f32.mrb[1].mxu0 }
  0xe9   : > { %v446_v47 = vpop.f32.mrb[2].mxu0 }
  0xea   : > { %v447_v48 = vpop.f32.mrb[3].mxu0  ;;  %v4143_v47 = vld [vmem:[%s4548_s4 + $0x58] sm:$0xff]  }
  0xef   : > { %v559_v51 = vpop.f32.mrb[4].mxu0 }
  0xf0   : > { %v560_v52 = vadd.f32 %v559_v51, %v442_v45  ;;  %v561_v53 = vpop.f32.mrb[5].mxu0  ;;  %v3395_v51 = vpop.f32.mrb[1].mxu1 }
  0xf1   : > { %v562_v54 = vadd.f32 %v561_v53, %v444_v46  ;;  %v563_v55 = vpop.f32.mrb[6].mxu0 }
  0xf2   : > { %v564_v56 = vpop.f32.mrb[7].mxu0 }
  0xf7   : > { %v686_v60 = vpop.f32.mrb[8].mxu0 }
  0xf8   : > { %v733_v61 = vadd.f32 %v686_v60, %v560_v52  ;;  %v688_v62 = vpop.f32.mrb[9].mxu0  ;;  %v486_v52 = vpop.f32.mrb[2].mxu1 }
  0xf9   : > { %v734_v63 = vadd.f32 %v688_v62, %v562_v54  ;;  %v690_v0 = vpop.f32.mrb[10].mxu0  ;;  %v3396_v53 = vpop.f32.mrb[3].mxu1 }
  0xfa   : > { %v753_v1 = vadd.f32 %v741_v59, %v733_v61  ;;  %v691_v2 = vpop.f32.mrb[11].mxu0  ;;  %v600_v54 = vpop.f32.mrb[4].mxu1 }
  0xfb   : > { %v754_v18 = vadd.f32 %v745_v15, %v734_v63  ;;  %v601_v55 = vadd.f32 %v600_v54, %v483_v49  ;;  %v3403_v56 = vpop.f32.mrb[5].mxu1 }
  0xfc   : > { %v756_v3 = vmax.f32 %v753_v1, 0.0  ;;  %v603_v57 = vpop.f32.mrb[6].mxu1  ;;  %v3811_v56 = vld [vmem:[%s4550_s6] sm:$0xff]  }
  0xfd   : > { %v757_v25 = vmax.f32 %v754_v18, 0.0  ;;  %v3812_v57 = vld [vmem:[%s4550_s6 + $0x8] sm:$0xff]  }
  0xfe   : > { %v759_v5 = vpack.c.bf16 %v756_v3, %v756_v3 }
  0xff   : > { %v804_v8 = vpop.f32.mrb[12].mxu0  ;;  %v4120_v26 = vpack.c.bf16 %v757_v25, %v757_v25  ;;  %v4206_v25 = vld [vmem:[%s4548_s4 + $0x48] sm:$0xff]  }
 0x100   : > { %v806_v9 = vpop.f32.mrb[13].mxu0  ;;  %1043 = vrot.lane.b32.xlu0 %v759_v5, %s3832_s23  ;;  %3450 = vmatmul.mubr.msk.bf16.vlgmr.msra.gmra.mrb[24].mxu1 %vm1057_vm3, %v759_v5  ;;  %v1409_v10 = vshll.u32 %v759_v5, 16  ;;  %v1407_v16 = vshrl.u32 %v759_v5, 16 }
 0x101   : > { %v808_v11 = vpop.f32.mrb[14].mxu0  ;;  %3462 = vmatpush3.bf16.msra.mxu1 %v4097_v4  ;;  %3465 = vmatprep.mubr.msk.bf16.mxu1 %vm3831_vm1, %v3830_v6  ;;  %v1956_v35 = vshll.u32 %v4120_v26, 16  ;;  %v1954_v46 = vshrl.u32 %v4120_v26, 16 }
 0x102   : > { %v809_v13 = vpop.f32.mrb[15].mxu0  ;;  %v1411_v14 = vrot.slane %v1409_v10, 1  ;;  %3463 = vmatprep.subr.bf16.mxu1 %v3830_v6 }
 0x103   : > { %v1958_v45 = vrot.slane %v1956_v35, 1 }
 0x104   : > { %1160 = vrot.lane.b32.xlu0 %v759_v5, %s3833_s26  ;;  %v4114_v17 = vor.u32 %v1411_v14, %v1407_v16 }
 0x105   : > { %3464 = vmatpush3.bf16.msra.mxu1 %v4106_v12  ;;  %v4148_v48 = vor.u32 %v1958_v45, %v1954_v46 }
 0x106   : > { %3477 = vmatprep.subr.bf16.mxu1 %v3830_v6 }
 0x107   : > { %v888_v19 = vpop.f32.mrb[16].mxu0 }
 0x108   : > { %v889_v20 = vadd.f32 %v888_v19, %v804_v8  ;;  %v890_v21 = vpop.f32.mrb[17].mxu0  ;;  %1473 = vrot.lane.b32.xlu0 %v4114_v17, %s3832_s23  ;;  %v748_v8 = vsub.s32 2, %v4085_v50 }
 0x109   : > { %v891_v22 = vadd.f32 %v890_v21, %v806_v9  ;;  %v892_v23 = vpop.f32.mrb[18].mxu0 }
 0x10a   : > { %v893_v24 = vpop.f32.mrb[19].mxu0  ;;  %v4198_v23 = vld [vmem:[%s4548_s4 + $0x40] sm:$0xff]  }
 0x10c   : > { %1607 = vrot.lane.b32.xlu0 %v759_v5, %s3834_s27 }
 0x10f   : > { %v975_v27 = vpop.f32.mrb[20].mxu0 }
 0x110   : > { %v1022_v28 = vadd.f32 %v975_v27, %v889_v20  ;;  %v977_v29 = vpop.f32.mrb[21].mxu0  ;;  %1908 = vrot.lane.b32.xlu0 %v4114_v17, %s3834_s27  ;;  %v4216_v27 = vld [vmem:[%s4548_s4 + $0x60] sm:$0xff]  }
 0x111   : > { %v1023_v30 = vadd.f32 %v977_v29, %v891_v22  ;;  %v979_v31 = vpop.f32.mrb[22].mxu0  ;;  %v4182_v22 = vld [vmem:[%s4548_s4 + $0x20] sm:$0xff]   ;;  %v4223_v29 = vld [vmem:[%s4548_s4 + $0x68] sm:$0xff]  }
 0x112   : > { %v1025_v32 = vadd.f32 %v1022_v28, %v741_v59  ;;  %v980_v33 = vpop.f32.mrb[23].mxu0  ;;  %v3404_v59 = vpop.f32.mrb[7].mxu1 }
 0x113   : > { %v1026_v34 = vadd.f32 %v1023_v30, %v745_v15  ;;  %v727_v60 = vpop.f32.mrb[8].mxu1  ;;  %v4174_v15 = vrot.slane %v4091_v58, %v748_v8  ;;  %v4189_v58 = vld [vmem:[%s4548_s4 + $0x28] sm:$0xff]   ;;  %v4228_v30 = vld [vmem:[%s4548_s4 + $0x70] sm:$0xff]   ;;  %v4244_v33 = vld [vmem:[%s4548_s4 + $0x80] sm:$0xff]  }
 0x114   : > { %v1028_v36 = vmax.f32 %v1025_v32, 0.0  ;;  %2207 = vrot.lane.b32.xlu0 %v4120_v26, %s3833_s26  ;;  %v4170_v61 = vadd.f32 %v727_v60, %v601_v55  ;;  %v3411_v62 = vpop.f32.mrb[9].mxu1  ;;  %v4239_v32 = vld [vmem:[%s4548_s4 + $0x78] sm:$0xff]   ;;  %v3813_v59 = vld [vmem:[%s4550_s6 + $0x10] sm:$0xff]  }
 0x115   : > { %v1029_v37 = vmax.f32 %v1026_v34, 0.0  ;;  %v730_v63 = vpop.f32.mrb[10].mxu1  ;;  %v4257_v34 = vld [vmem:[%s4548_s4 + $0x88] sm:$0xff]   ;;  %v3814_v60 = vld [vmem:[%s4550_s6 + $0x18] sm:$0xff]  }
 0x116   : > { %v1031_v39 = vpack.c.bf16 %v1028_v36, %v1028_v36  ;;  %v3412_v0 = vpop.f32.mrb[11].mxu1 }
 0x117   : > { %v4132_v40 = vpack.c.bf16 %v1029_v37, %v1029_v37  ;;  %v845_v1 = vpop.f32.mrb[12].mxu1 }
 0x118   : > { %1283 = vrot.lane.b32.xlu1 %v1031_v39, %s3832_s23  ;;  %3466 = vmatmul.mubr.msk.bf16.vlgmr.msra.gmra.mrb[28].mxu1 %vm1057_vm3, %v1031_v39  ;;  %v3419_v2 = vpop.f32.mrb[13].mxu1 }
 0x119   : > { %2341 = vrot.lane.b32.xlu0 %v4132_v40, %s3833_s26  ;;  %3478 = vmatpush3.bf16.msra.mxu1 %v4130_v38  ;;  %v848_v3 = vpop.f32.mrb[14].mxu1 }
 0x11a   : > { %3479 = vmatprep.subr.bf16.mxu1 %v3830_v6  ;;  %3481 = vmatprep.mubr.msk.bf16.mxu1 %vm3831_vm1, %v3830_v6  ;;  %v3420_v5 = vpop.f32.mrb[15].mxu1 }
 0x11b   : > { %v929_v7 = vpop.f32.mrb[16].mxu1 }
 0x11c   : > { %1345 = vrot.lane.b32.xlu1 %v1031_v39, %s3833_s26  ;;  %v930_v9 = vadd.f32 %v929_v7, %v845_v1  ;;  %v3427_v10 = vpop.f32.mrb[17].mxu1 }
 0x11d   : > { %2474 = vrot.lane.b32.xlu0 %v4148_v48, %s3833_s26  ;;  %3480 = vmatpush3.bf16.msra.mxu1 %v4143_v47  ;;  %v932_v11 = vpop.f32.mrb[18].mxu1 }
 0x11e   : > { %3493 = vmatprep.subr.bf16.mxu1 %v3830_v6  ;;  %v3428_v13 = vpop.f32.mrb[19].mxu1 }
 0x11f   : > { %v1016_v14 = vpop.f32.mrb[20].mxu1 }
 0x120   : > { %1535 = vrot.lane.b32.xlu1 %v4114_v17, %s3833_s26  ;;  %v1024_v16 = vadd.f32 %v1016_v14, %v930_v9  ;;  %v3435_v18 = vpop.f32.mrb[21].mxu1 }
 0x121   : > { %2753 = vrot.lane.b32.xlu0 %v4132_v40, %s3834_s27  ;;  %v1019_v19 = vpop.f32.mrb[22].mxu1 }
 0x122   : > { %v4177_v20 = vadd.f32 %v1024_v16, %v4174_v15  ;;  %v3436_v21 = vpop.f32.mrb[23].mxu1 }
 0x124   : > { %1777 = vrot.lane.b32.xlu1 %v1031_v39, %s3834_s27 }
 0x128   : > { %2122 = vrot.lane.b32.xlu1 %v4120_v26, %s3832_s23 }
 0x12c   : > { %2295 = vrot.lane.b32.xlu1 %v4132_v40, %s3832_s23 }
 0x130   : > { %2428 = vrot.lane.b32.xlu1 %v4148_v48, %s3832_s23 }
 0x134   : > { %2583 = vrot.lane.b32.xlu1 %v4120_v26, %s3834_s27 }
 0x138   : > { %2884 = vrot.lane.b32.xlu1 %v4148_v48, %s3834_s27 }
 0x172   : > { %v1044_v50 = vpop.permute.xlu0 %1043 }
 0x173   : > { %3442 = vmatmul.mubr.msk.bf16.vlgmr.msra.gmra.mrb[24].mxu0 %vm1057_vm3, %v1044_v50 }
 0x174   : > { %3454 = vmatpush3.bf16.msra.mxu0 %v4182_v22  ;;  %3457 = vmatprep.mubr.msk.bf16.mxu0 %vm3831_vm1, %v3830_v6 }
 0x175   : > { %3455 = vmatprep.subr.bf16.mxu0 %v3830_v6 }
 0x176   : > { %v1161_v24 = vpop.permute.xlu0 %1160 }
 0x178   : > { %3456 = vmatpush3.bf16.msra.mxu0 %v4189_v58 }
 0x179   : > { %3469 = vmatprep.subr.bf16.mxu0 %v3830_v6 }
 0x17a   : > { %v1474_v35 = vpop.permute.xlu0 %1473 }
 0x17b   : > { %3458 = vmatmul.mubr.msk.bf16.vlgmr.msra.gmra.mrb[28].mxu0 %vm1057_vm3, %v1161_v24 }
 0x17c   : > { %3470 = vmatpush3.bf16.msra.mxu0 %v4198_v23  ;;  %3473 = vmatprep.mubr.msk.bf16.mxu0 %vm3831_vm1, %v3830_v6 }
 0x17d   : > { %3471 = vmatprep.subr.bf16.mxu0 %v3830_v6 }
 0x17e   : > { %v1608_v36 = vpop.permute.xlu0 %1607 }
 0x180   : > { %3472 = vmatpush3.bf16.msra.mxu0 %v4206_v25 }
 0x181   : > { %3485 = vmatprep.subr.bf16.mxu0 %v3830_v6 }
 0x182   : > { %v1909_v39 = vpop.permute.xlu0 %1908 }
 0x18a   : > { %v1284_v28 = vpop.permute.xlu1 %1283 }
 0x18b   : > { %3474 = vmatmul.mubr.msk.bf16.vlgmr.msra.gmra.mrb[32].mxu0 %vm1057_vm3, %v1284_v28 }
 0x18c   : > { %3486 = vmatpush3.bf16.msra.mxu0 %v4216_v27  ;;  %3489 = vmatprep.mubr.msk.bf16.mxu0 %vm3831_vm1, %v3830_v6 }
 0x18d   : > { %3487 = vmatprep.subr.bf16.mxu0 %v3830_v6 }
 0x18e   : > { %v1346_v31 = vpop.permute.xlu1 %1345 }
 0x18f   : > { %3482 = vmatmul.mubr.msk.bf16.vlgmr.msra.gmra.mrb[32].mxu1 %vm1057_vm3, %v1346_v31 }
 0x190   : > { %3488 = vmatpush3.bf16.msra.mxu0 %v4223_v29  ;;  %3494 = vmatpush3.bf16.msra.mxu1 %v4228_v30 }
 0x191   : > { %3501 = vmatprep.subr.bf16.mxu0 %v3830_v6  ;;  %3495 = vmatprep.subr.bf16.mxu1 %v3830_v6 }
 0x192   : > { %3497 = vmatprep.mubr.msk.bf16.mxu1 %vm3831_vm1, %v3830_v6 }
 0x193   : > { %3490 = vmatmul.mubr.msk.bf16.vlgmr.msra.gmra.mrb[36].mxu0 %vm1057_vm3, %v4114_v17  ;;  %v1536_v17 = vpop.permute.xlu1 %1535 }
 0x194   : > { %3496 = vmatpush3.bf16.msra.mxu1 %v4239_v32  ;;  %3502 = vmatpush3.bf16.msra.mxu0 %v4244_v33 }
 0x195   : > { %3503 = vmatprep.subr.bf16.mxu0 %v3830_v6  ;;  %3509 = vmatprep.subr.bf16.mxu1 %v3830_v6 }
 0x196   : > { %3505 = vmatprep.mubr.msk.bf16.mxu0 %vm3831_vm1, %v3830_v6 }
 0x197   : > { %3498 = vmatmul.mubr.msk.bf16.vlgmr.msra.gmra.mrb[36].mxu1 %vm1057_vm3, %v1474_v35  ;;  %v1778_v37 = vpop.permute.xlu1 %1777 }
 0x198   : > { %3504 = vmatpush3.bf16.msra.mxu0 %v4257_v34  ;;  %3510 = vmatpush3.bf16.msra.mxu1 %v4074_v43 }
 0x199   : > { %3511 = vmatprep.subr.bf16.mxu1 %v3830_v6  ;;  %3517 = vmatprep.subr.bf16.mxu0 %v3830_v6 }
 0x19a   : > { %3513 = vmatprep.mubr.msk.bf16.mxu1 %vm3831_vm1, %v3830_v6 }
 0x19b   : > { %3506 = vmatmul.mubr.msk.bf16.vlgmr.msra.gmra.mrb[40].mxu0 %vm1057_vm3, %v1536_v17 }
 0x19c   : > { %3512 = vmatpush3.bf16.msra.mxu1 %v4080_v44  ;;  %3518 = vmatpush3.bf16.msra.mxu0 %v4060_v41 }
 0x19d   : > { %3519 = vmatprep.subr.bf16.mxu0 %v3830_v6  ;;  %3525 = vmatprep.subr.bf16.mxu1 %v3830_v6 }
 0x19e   : > { %3521 = vmatprep.mubr.msk.bf16.mxu0 %vm3831_vm1, %v3830_v6 }
 0x19f   : > { %3514 = vmatmul.mubr.msk.bf16.vlgmr.msra.gmra.mrb[40].mxu1 %vm1057_vm3, %v1608_v36 }
 0x1a0   : > { %3520 = vmatpush3.bf16.msra.mxu0 %v4067_v42  ;;  %3526 = vmatpush3.bf16.msra.mxu1 %v4182_v22 }
 0x1a1   : > { %3527 = vmatprep.subr.bf16.mxu1 %v3830_v6  ;;  %3533 = vmatprep.subr.bf16.mxu0 %v3830_v6 }
 0x1a2   : > { %3529 = vmatprep.mubr.msk.bf16.mxu1 %vm3831_vm1, %v3830_v6 }
 0x1a3   : > { %3522 = vmatmul.mubr.msk.bf16.vlgmr.msra.gmra.mrb[44].mxu0 %vm1057_vm3, %v1161_v24 }
 0x1a4   : > { %3528 = vmatpush3.bf16.msra.mxu1 %v4189_v58  ;;  %3534 = vmatpush3.bf16.msra.mxu0 %v4097_v4 }
 0x1a5   : > { %3535 = vmatprep.subr.bf16.mxu0 %v3830_v6  ;;  %3541 = vmatprep.subr.bf16.mxu1 %v3830_v6 }
 0x1a6   : > { %3537 = vmatprep.mubr.msk.bf16.mxu0 %vm3831_vm1, %v3830_v6 }
 0x1a7   : > { %3530 = vmatmul.mubr.msk.bf16.vlgmr.msra.gmra.mrb[44].mxu1 %vm1057_vm3, %v4120_v26 }
 0x1a8   : > { %3536 = vmatpush3.bf16.msra.mxu0 %v4106_v12  ;;  %3542 = vmatpush3.bf16.msra.mxu1 %v4198_v23 }
 0x1a9   : > { %3543 = vmatprep.subr.bf16.mxu1 %v3830_v6  ;;  %3549 = vmatprep.subr.bf16.mxu0 %v3830_v6 }
 0x1aa   : > { %3545 = vmatprep.mubr.msk.bf16.mxu1 %vm3831_vm1, %v3830_v6 }
 0x1ab   : > { %3538 = vmatmul.mubr.msk.bf16.vlgmr.msra.gmra.mrb[48].mxu0 %vm1057_vm3, %v1346_v31 }
 0x1ac   : > { %3544 = vmatpush3.bf16.msra.mxu1 %v4206_v25  ;;  %3550 = vmatpush3.bf16.msra.mxu0 %v4130_v38 }
 0x1ad   : > { %3551 = vmatprep.subr.bf16.mxu0 %v3830_v6  ;;  %3557 = vmatprep.subr.bf16.mxu1 %v3830_v6 }
 0x1ae   : > { %3553 = vmatprep.mubr.msk.bf16.mxu0 %vm3831_vm1, %v3830_v6 }
 0x1af   : > { %3546 = vmatmul.mubr.msk.bf16.vlgmr.msra.gmra.mrb[48].mxu1 %vm1057_vm3, %v1778_v37 }
 0x1b0   : > { %3552 = vmatpush3.bf16.msra.mxu0 %v4143_v47  ;;  %3558 = vmatpush3.bf16.msra.mxu1 %v4216_v27 }
 0x1b1   : > { %3559 = vmatprep.subr.bf16.mxu1 %v3830_v6  ;;  %3565 = vmatprep.subr.bf16.mxu0 %v3830_v6 }
 0x1b2   : > { %3561 = vmatprep.mubr.msk.bf16.mxu1 %vm3831_vm1, %v3830_v6 }
 0x1b3   : > { %3554 = vmatmul.mubr.msk.bf16.vlgmr.msra.gmra.mrb[52].mxu0 %vm1057_vm3, %v4132_v40 }
 0x1b4   : > { %3560 = vmatpush3.bf16.msra.mxu1 %v4223_v29  ;;  %3566 = vmatpush3.bf16.msra.mxu0 %v4228_v30 }
 0x1b5   : > { %3567 = vmatprep.subr.bf16.mxu0 %v3830_v6  ;;  %3573 = vmatprep.subr.bf16.mxu1 %v3830_v6 }
 0x1b6   : > { %3569 = vmatprep.mubr.msk.bf16.mxu0 %vm3831_vm1, %v3830_v6 }
 0x1b7   : > { %3562 = vmatmul.mubr.msk.bf16.vlgmr.msra.gmra.mrb[52].mxu1 %vm1057_vm3, %v1536_v17 }
 0x1b8   : > { %3568 = vmatpush3.bf16.msra.mxu0 %v4239_v32  ;;  %3574 = vmatpush3.bf16.msra.mxu1 %v4244_v33 }
 0x1b9   : > { %3575 = vmatprep.subr.bf16.mxu1 %v3830_v6  ;;  %3577 = vmatprep.mubr.msk.bf16.mxu1 %vm3831_vm1, %v3830_v6 }
 0x1ba   : > { %3581 = vmatprep.subr.bf16.mxu0 %v3830_v6 }
 0x1bb   : > { %3570 = vmatmul.mubr.msk.bf16.vlgmr.msra.gmra.mrb[56].mxu0 %vm1057_vm3, %v1909_v39 }
 0x1bc   : > { %3576 = vmatpush3.bf16.msra.mxu1 %v4257_v34  ;;  %3585 = vmatprep.mubr.msk.bf16.mxu0 %vm3831_vm1, %v3830_v6 }
 0x1bd   : > { %3589 = vmatprep.subr.bf16.mxu1 %v3830_v6  ;;  %3582 = vmatpush3.bf16.msra.mxu0 %v3813_v59 }
 0x1be   : > { %3583 = vmatprep.subr.bf16.mxu0 %v3830_v6 }
 0x1bf   : > { %3578 = vmatmul.mubr.msk.bf16.vlgmr.msra.gmra.mrb[56].mxu1 %vm1057_vm3, %v4148_v48 }
 0x1c0   : > { %3593 = vmatprep.mubr.msk.bf16.mxu1 %vm3831_vm1, %v3830_v6  ;;  %3590 = vmatpush3.bf16.msra.mxu1 %v3811_v56 }
 0x1c1   : > { %3591 = vmatprep.subr.bf16.mxu1 %v3830_v6  ;;  %3584 = vmatpush3.bf16.msra.mxu0 %v3814_v60 }
 0x1c2   : > { %3597 = vmatprep.subr.bf16.mxu0 %v3830_v6 }
 0x1c4   : > { %3592 = vmatpush3.bf16.msra.mxu1 %v3812_v57 }
 0x1c5   : > { %3605 = vmatprep.subr.bf16.mxu1 %v3830_v6 }
 0x1d3   : > { %v1150_v45 = vpop.f32.mrb[24].mxu1 }
 0x1d4   : > { %v3451_v46 = vpop.f32.mrb[25].mxu1 }
 0x1d5   : > { %v1153_v49 = vpop.f32.mrb[26].mxu1 }
 0x1d6   : > { %v3452_v51 = vpop.f32.mrb[27].mxu1 }
 0x1eb   : > { %v1271_v52 = vpop.f32.mrb[28].mxu1 }
 0x1ec   : > { %v3467_v53 = vpop.f32.mrb[29].mxu1 }
 0x1ed   : > { %v1274_v54 = vpop.f32.mrb[30].mxu1  ;;  %v4356_v53 = vld [vmem:[%s4549_s5] ss:$0 sm:$0xff] }
 0x1ee   : > { %v3468_v55 = vpop.f32.mrb[31].mxu1 }
 0x246   : > { %v1095_v62 = vpop.f32.mrb[24].mxu0 }
 0x247   : > { %v1151_v63 = vadd.f32 %v1150_v45, %v1095_v62  ;;  %v3443_v0 = vpop.f32.mrb[25].mxu0 }
 0x248   : > { %v1098_v1 = vpop.f32.mrb[26].mxu0 }
 0x249   : > { %v3444_v2 = vpop.f32.mrb[27].mxu0 }
 0x24e   : > { %v1211_v3 = vpop.f32.mrb[28].mxu0 }
 0x24f   : > { %v1217_v5 = vadd.f32 %v1211_v3, %v1151_v63  ;;  %v3459_v7 = vpop.f32.mrb[29].mxu0 }
 0x250   : > { %v1214_v8 = vpop.f32.mrb[30].mxu0 }
 0x251   : > { %v3460_v9 = vpop.f32.mrb[31].mxu0  ;;  %v1277_v10 = vadd.f32 %v1271_v52, %v1217_v5 }
 0x25e   : > { %v1334_v11 = vpop.f32.mrb[32].mxu0 }
 0x25f   : > { %v1340_v13 = vadd.f32 %v1334_v11, %v1277_v10  ;;  %v3475_v14 = vpop.f32.mrb[33].mxu0 }
 0x260   : > { %v1337_v16 = vpop.f32.mrb[34].mxu0 }
 0x261   : > { %v3476_v18 = vpop.f32.mrb[35].mxu0 }
 0x262   : > { %v1396_v19 = vpop.f32.mrb[32].mxu1 }
 0x263   : > { %v1402_v21 = vadd.f32 %v1396_v19, %v1340_v13  ;;  %v3483_v50 = vpop.f32.mrb[33].mxu1 }
 0x264   : > { %v1399_v24 = vpop.f32.mrb[34].mxu1 }
 0x265   : > { %v3484_v28 = vpop.f32.mrb[35].mxu1 }
 0x266   : > { %v1462_v31 = vpop.f32.mrb[36].mxu0 }
 0x267   : > { %v1468_v35 = vadd.f32 %v1462_v31, %v1402_v21  ;;  %v3491_v17 = vpop.f32.mrb[37].mxu0 }
 0x268   : > { %v1465_v36 = vpop.f32.mrb[38].mxu0 }
 0x269   : > { %v3492_v37 = vpop.f32.mrb[39].mxu0 }
 0x26a   : > { %v1524_v39 = vpop.f32.mrb[36].mxu1  ;;  %v4376_v37 = vpop.permute.xlu0 %2207 }
 0x26b   : > { %v1530_v45 = vadd.f32 %v1524_v39, %v1468_v35  ;;  %v3499_v46 = vpop.f32.mrb[37].mxu1 }
 0x26c   : > { %v1527_v49 = vpop.f32.mrb[38].mxu1  ;;  %v2123_v46 = vpop.permute.xlu1 %2122 }
 0x26d   : > { %v3500_v51 = vpop.f32.mrb[39].mxu1 }
 0x26e   : > { %v1586_v52 = vpop.f32.mrb[40].mxu0 }
 0x26f   : > { %v1592_v54 = vadd.f32 %v1586_v52, %v1530_v45  ;;  %v3507_v55 = vpop.f32.mrb[41].mxu0 }
 0x270   : > { %v1589_v56 = vpop.f32.mrb[42].mxu0 }
 0x271   : > { %v1600_v57 = vadd.f32 %v4356_v53, %v1592_v54  ;;  %v3508_v59 = vpop.f32.mrb[43].mxu0 }
 0x272   : > { %v1646_v60 = vpop.f32.mrb[40].mxu1 }
 0x273   : > { %v1601_v62 = vmax.f32 %v1600_v57, 0.0  ;;  %v3515_v63 = vpop.f32.mrb[41].mxu1 }
 0x274   : > { %v1649_v0 = vpop.f32.mrb[42].mxu1 }
 0x275   : > { %v1602_v1 = vpack.c.bf16 %v1601_v62, %v1601_v62  ;;  %v3516_v2 = vpop.f32.mrb[43].mxu1 }
 0x276   : > { %v1686_v3 = vpop.f32.mrb[44].mxu0 }
 0x277   : > { %v1687_v5 = vadd.f32 %v1686_v3, %v1646_v60  ;;  %v3523_v7 = vpop.f32.mrb[45].mxu0  ;;  %3594 = vmatmul.mubr.msk.bf16.vlgmr.msra.gmra.mrb[60].mxu1 %vm1057_vm3, %v1602_v1  ;;  %v2296_v60 = vpop.permute.xlu1 %2295 }
 0x278   : > { %v1689_v8 = vpop.f32.mrb[46].mxu0  ;;  %3606 = vmatpush3.bf16.msra.mxu1 %v4060_v41  ;;  %3609 = vmatprep.mubr.msk.bf16.mxu1 %vm3831_vm1, %v3830_v6 }
 0x279   : > { %v3524_v9 = vpop.f32.mrb[47].mxu0  ;;  %3607 = vmatprep.subr.bf16.mxu1 %v3830_v6 }
 0x27a   : > { %v1729_v10 = vpop.f32.mrb[44].mxu1 }
 0x27b   : > { %v1735_v11 = vadd.f32 %v1729_v10, %v1687_v5  ;;  %v3531_v13 = vpop.f32.mrb[45].mxu1  ;;  %v2429_v8 = vpop.permute.xlu1 %2428 }
 0x27c   : > { %v1732_v14 = vpop.f32.mrb[46].mxu1  ;;  %3608 = vmatpush3.bf16.msra.mxu1 %v4067_v42 }
 0x27d   : > { %v3532_v16 = vpop.f32.mrb[47].mxu1  ;;  %3621 = vmatprep.subr.bf16.mxu1 %v3830_v6 }
 0x27e   : > { %v1770_v18 = vpop.f32.mrb[48].mxu0 }
 0x27f   : > { %v1776_v19 = vadd.f32 %v1770_v18, %v1735_v11  ;;  %v3539_v21 = vpop.f32.mrb[49].mxu0  ;;  %3610 = vmatmul.mubr.msk.bf16.vlgmr.msra.gmra.mrb[64].mxu1 %vm1057_vm3, %v4120_v26  ;;  %v2584_v13 = vpop.permute.xlu1 %2583 }
 0x280   : > { %v1773_v41 = vpop.f32.mrb[50].mxu0  ;;  %3622 = vmatpush3.bf16.msra.mxu1 %v4097_v4  ;;  %3625 = vmatprep.mubr.msk.bf16.mxu1 %vm3831_vm1, %v3830_v6 }
 0x281   : > { %v3540_v50 = vpop.f32.mrb[51].mxu0  ;;  %3623 = vmatprep.subr.bf16.mxu1 %v3830_v6 }
 0x282   : > { %v1816_v24 = vpop.f32.mrb[48].mxu1 }
 0x283   : > { %v1822_v42 = vadd.f32 %v1816_v24, %v1776_v19  ;;  %v3547_v28 = vpop.f32.mrb[49].mxu1 }
 0x284   : > { %v1819_v31 = vpop.f32.mrb[50].mxu1  ;;  %3624 = vmatpush3.bf16.msra.mxu1 %v4106_v12 }
 0x285   : > { %v3548_v35 = vpop.f32.mrb[51].mxu1  ;;  %3637 = vmatprep.subr.bf16.mxu1 %v3830_v6 }
 0x286   : > { %v1860_v17 = vpop.f32.mrb[52].mxu0 }
 0x287   : > { %v1866_v26 = vadd.f32 %v1860_v17, %v1822_v42  ;;  %v3555_v36 = vpop.f32.mrb[53].mxu0  ;;  %3626 = vmatmul.mubr.msk.bf16.vlgmr.msra.gmra.mrb[68].mxu1 %vm1057_vm3, %v4132_v40  ;;  %v4384_v40 = vpop.permute.xlu0 %2341 }
 0x288   : > { %v1863_v39 = vpop.f32.mrb[54].mxu0  ;;  %3638 = vmatpush3.bf16.msra.mxu1 %v4130_v38  ;;  %3641 = vmatprep.mubr.msk.bf16.mxu1 %vm3831_vm1, %v3830_v6 }
 0x289   : > { %v3556_v45 = vpop.f32.mrb[55].mxu0  ;;  %3639 = vmatprep.subr.bf16.mxu1 %v3830_v6 }
 0x28a   : > { %v1901_v49 = vpop.f32.mrb[52].mxu1 }
 0x28b   : > { %v1907_v51 = vadd.f32 %v1901_v49, %v1866_v26  ;;  %v3563_v52 = vpop.f32.mrb[53].mxu1  ;;  %v2475_v11 = vpop.permute.xlu0 %2474 }
 0x28c   : > { %v1904_v54 = vpop.f32.mrb[54].mxu1  ;;  %3640 = vmatpush3.bf16.msra.mxu1 %v4143_v47 }
 0x28d   : > { %v3564_v55 = vpop.f32.mrb[55].mxu1  ;;  %3653 = vmatprep.subr.bf16.mxu1 %v3830_v6 }
 0x28e   : > { %v1947_v56 = vpop.f32.mrb[56].mxu0 }
 0x28f   : > { %v1953_v57 = vadd.f32 %v1947_v56, %v1907_v51  ;;  %v3571_v59 = vpop.f32.mrb[57].mxu0  ;;  %3642 = vmatmul.mubr.msk.bf16.vlgmr.msra.gmra.mrb[72].mxu1 %vm1057_vm3, %v4384_v40 }
 0x290   : > { %v1950_v62 = vpop.f32.mrb[58].mxu0  ;;  %3654 = vmatpush3.bf16.msra.mxu1 %v4228_v30  ;;  %3657 = vmatprep.mubr.msk.bf16.mxu1 %vm3831_vm1, %v3830_v6 }
 0x291   : > { %v3572_v63 = vpop.f32.mrb[59].mxu0  ;;  %3655 = vmatprep.subr.bf16.mxu1 %v3830_v6 }
 0x292   : > { %v1997_v0 = vpop.f32.mrb[56].mxu1 }
 0x293   : > { %v2003_v1 = vadd.f32 %v1997_v0, %v1953_v57  ;;  %v3579_v2 = vpop.f32.mrb[57].mxu1 }
 0x294   : > { %v2000_v3 = vpop.f32.mrb[58].mxu1  ;;  %3656 = vmatpush3.bf16.msra.mxu1 %v4239_v32 }
 0x295   : > { %v2004_v5 = vadd.f32 %v4356_v53, %v2003_v1  ;;  %v3580_v7 = vpop.f32.mrb[59].mxu1  ;;  %3669 = vmatprep.subr.bf16.mxu1 %v3830_v6 }
 0x297   : > { %v2005_v9 = vmax.f32 %v2004_v5, 0.0  ;;  %3658 = vmatmul.mubr.msk.bf16.vlgmr.msra.gmra.mrb[76].mxu1 %vm1057_vm3, %v2429_v8 }
 0x298   : > { %3673 = vmatprep.mubr.msk.bf16.mxu1 %vm3831_vm1, %v3830_v6 }
 0x299   : > { %v2006_v10 = vpack.c.bf16 %v2005_v9, %v2005_v9 }
 0x29b   : > { %3586 = vmatmul.mubr.msk.bf16.vlgmr.msra.gmra.mrb[60].mxu0 %vm1057_vm3, %v2006_v10 }
 0x29c   : > { %3598 = vmatpush3.bf16.msra.mxu0 %v4074_v43  ;;  %3601 = vmatprep.mubr.msk.bf16.mxu0 %vm3831_vm1, %v3830_v6 }
 0x29d   : > { %3599 = vmatprep.subr.bf16.mxu0 %v3830_v6 }
 0x2a0   : > { %3600 = vmatpush3.bf16.msra.mxu0 %v4080_v44 }
 0x2a1   : > { %3613 = vmatprep.subr.bf16.mxu0 %v3830_v6 }
 0x2a3   : > { %3602 = vmatmul.mubr.msk.bf16.vlgmr.msra.gmra.mrb[64].mxu0 %vm1057_vm3, %v2123_v46 }
 0x2a4   : > { %3614 = vmatpush3.bf16.msra.mxu0 %v4182_v22  ;;  %3617 = vmatprep.mubr.msk.bf16.mxu0 %vm3831_vm1, %v3830_v6 }
 0x2a5   : > { %3615 = vmatprep.subr.bf16.mxu0 %v3830_v6 }
 0x2a8   : > { %3616 = vmatpush3.bf16.msra.mxu0 %v4189_v58 }
 0x2a9   : > { %3629 = vmatprep.subr.bf16.mxu0 %v3830_v6 }
 0x2ab   : > { %3618 = vmatmul.mubr.msk.bf16.vlgmr.msra.gmra.mrb[68].mxu0 %vm1057_vm3, %v4376_v37 }
 0x2ac   : > { %3630 = vmatpush3.bf16.msra.mxu0 %v4198_v23  ;;  %3633 = vmatprep.mubr.msk.bf16.mxu0 %vm3831_vm1, %v3830_v6 }
 0x2ad   : > { %3631 = vmatprep.subr.bf16.mxu0 %v3830_v6 }
 0x2b0   : > { %3632 = vmatpush3.bf16.msra.mxu0 %v4206_v25 }
 0x2b1   : > { %3645 = vmatprep.subr.bf16.mxu0 %v3830_v6 }
 0x2b3   : > { %3634 = vmatmul.mubr.msk.bf16.vlgmr.msra.gmra.mrb[72].mxu0 %vm1057_vm3, %v2296_v60 }
 0x2b4   : > { %3646 = vmatpush3.bf16.msra.mxu0 %v4216_v27  ;;  %3649 = vmatprep.mubr.msk.bf16.mxu0 %vm3831_vm1, %v3830_v6 }
 0x2b5   : > { %3647 = vmatprep.subr.bf16.mxu0 %v3830_v6 }
 0x2b8   : > { %3648 = vmatpush3.bf16.msra.mxu0 %v4223_v29 }
 0x2b9   : > { %3661 = vmatprep.subr.bf16.mxu0 %v3830_v6 }
 0x2bb   : > { %3650 = vmatmul.mubr.msk.bf16.vlgmr.msra.gmra.mrb[76].mxu0 %vm1057_vm3, %v4148_v48  ;;  %v755_v48 = vadd.f32 %v4174_v15, %v4170_v61 }
 0x2bc   : > { %3662 = vmatpush3.bf16.msra.mxu0 %v4244_v33  ;;  %3665 = vmatprep.mubr.msk.bf16.mxu0 %vm3831_vm1, %v3830_v6 }
 0x2bd   : > { %3663 = vmatprep.subr.bf16.mxu0 %v3830_v6 }
 0x2c0   : > { %3664 = vmatpush3.bf16.msra.mxu0 %v4257_v34 }
 0x2c1   : > { %3677 = vmatprep.subr.bf16.mxu0 %v3830_v6 }
 0x2c3   : > { %3666 = vmatmul.mubr.msk.bf16.vlgmr.msra.gmra.mrb[80].mxu0 %vm1057_vm3, %v2475_v11 }
 0x2c4   : > { %3678 = vmatpush3.bf16.msra.mxu0 %v4074_v43  ;;  %3681 = vmatprep.mubr.msk.bf16.mxu0 %vm3831_vm1, %v3830_v6  ;;  %v758_v43 = vmax.f32 %v755_v48, 0.0 }
 0x2c5   : > { %3679 = vmatprep.subr.bf16.mxu0 %v3830_v6 }
 0x2c6   : > { %v761_v14 = vpack.c.bf16 %v758_v43, %v758_v43 }
 0x2c8   : > { %3680 = vmatpush3.bf16.msra.mxu0 %v4080_v44  ;;  %v2754_v44 = vpop.permute.xlu0 %2753  ;;  %v2932_v61 = vshll.u32 %v761_v14, 16  ;;  %v2930_v15 = vshrl.u32 %v761_v14, 16 }
 0x2c9   : > { %3693 = vmatprep.subr.bf16.mxu0 %v3830_v6 }
 0x2cb   : > { %3682 = vmatmul.mubr.msk.bf16.vlgmr.msra.gmra.mrb[84].mxu0 %vm1057_vm3, %v2584_v13 }
 0x2cc   : > { %3694 = vmatpush3.bf16.msra.mxu0 %v4182_v22  ;;  %3697 = vmatprep.mubr.msk.bf16.mxu0 %vm3831_vm1, %v3830_v6  ;;  %v2934_v22 = vrot.slane %v2932_v61, 1 }
 0x2cd   : > { %3695 = vmatprep.subr.bf16.mxu0 %v3830_v6 }
 0x2d0   : > { %3696 = vmatpush3.bf16.msra.mxu0 %v4189_v58  ;;  %v2935_v58 = vor.u32 %v2934_v22, %v2930_v15 }
 0x2d1   : > { %3709 = vmatprep.subr.bf16.mxu0 %v3830_v6 }
 0x2d3   : > { %3698 = vmatmul.mubr.msk.bf16.vlgmr.msra.gmra.mrb[88].mxu0 %vm1057_vm3, %v761_v14 }
 0x2d4   : > { %3710 = vmatpush3.bf16.msra.mxu0 %v4198_v23  ;;  %3713 = vmatprep.mubr.msk.bf16.mxu0 %vm3831_vm1, %v3830_v6  ;;  %v3815_v23 = vld [vmem:[%s4550_s6 + $0x20] sm:$0xff]  }
 0x2d5   : > { %3711 = vmatprep.subr.bf16.mxu0 %v3830_v6  ;;  %3670 = vmatpush3.bf16.msra.mxu1 %v3815_v23 }
 0x2d6   : > { %3671 = vmatprep.subr.bf16.mxu1 %v3830_v6 }
 0x2d8   : > { %3712 = vmatpush3.bf16.msra.mxu0 %v4206_v25  ;;  %v3816_v25 = vld [vmem:[%s4550_s6 + $0x28] sm:$0xff]  }
 0x2d9   : > { %3725 = vmatprep.subr.bf16.mxu0 %v3830_v6  ;;  %3672 = vmatpush3.bf16.msra.mxu1 %v3816_v25 }
 0x2da   : > { %3685 = vmatprep.subr.bf16.mxu1 %v3830_v6 }
 0x2db   : > { %3714 = vmatmul.mubr.msk.bf16.vlgmr.msra.gmra.mrb[92].mxu0 %vm1057_vm3, %v2754_v44 }
 0x2dc   : > { %3726 = vmatpush3.bf16.msra.mxu0 %v4216_v27  ;;  %3729 = vmatprep.mubr.msk.bf16.mxu0 %vm3831_vm1, %v3830_v6 }
 0x2dd   : > { %3727 = vmatprep.subr.bf16.mxu0 %v3830_v6 }
 0x2e0   : > { %3728 = vmatpush3.bf16.msra.mxu0 %v4223_v29 }
 0x2e1   : > { %3741 = vmatprep.subr.bf16.mxu0 %v3830_v6 }
 0x2e3   : > { %3730 = vmatmul.mubr.msk.bf16.vlgmr.msra.gmra.mrb[96].mxu0 %vm1057_vm3, %v2475_v11 }
 0x2e4   : > { %3742 = vmatpush3.bf16.msra.mxu0 %v4244_v33  ;;  %3745 = vmatprep.mubr.msk.bf16.mxu0 %vm3831_vm1, %v3830_v6 }
 0x2e5   : > { %3743 = vmatprep.subr.bf16.mxu0 %v3830_v6 }
 0x2e8   : > { %3744 = vmatpush3.bf16.msra.mxu0 %v4257_v34 }
 0x2eb   : > { %3746 = vmatmul.mubr.msk.bf16.vlgmr.msra.gmra.mrb[100].mxu0 %vm1057_vm3, %v2935_v58 }
 0x34a   : > { %v2115_v27 = vpop.f32.mrb[60].mxu1 }
 0x34b   : > { %v3595_v29 = vpop.f32.mrb[61].mxu1 }
 0x34c   : > { %v2118_v33 = vpop.f32.mrb[62].mxu1 }
 0x34d   : > { %v3596_v34 = vpop.f32.mrb[63].mxu1 }
 0x352   : > { %v2201_v16 = vpop.f32.mrb[64].mxu1 }
 0x353   : > { %v3611_v18 = vpop.f32.mrb[65].mxu1 }
 0x354   : > { %v2204_v19 = vpop.f32.mrb[66].mxu1 }
 0x355   : > { %v3612_v21 = vpop.f32.mrb[67].mxu1  ;;  %v3819_v19 = vld [vmem:[%s4548_s4] sm:$0xff]  }
 0x35a   : > { %v2287_v41 = vpop.f32.mrb[68].mxu1 }
 0x35b   : > { %v3627_v50 = vpop.f32.mrb[69].mxu1 }
 0x35c   : > { %v2290_v24 = vpop.f32.mrb[70].mxu1 }
 0x35d   : > { %v3628_v42 = vpop.f32.mrb[71].mxu1 }
 0x362   : > { %v2380_v28 = vpop.f32.mrb[72].mxu1 }
 0x363   : > { %v3643_v31 = vpop.f32.mrb[73].mxu1 }
 0x364   : > { %v2383_v35 = vpop.f32.mrb[74].mxu1 }
 0x365   : > { %v3644_v17 = vpop.f32.mrb[75].mxu1 }
 0x36a   : > { %v2467_v26 = vpop.f32.mrb[76].mxu1 }
 0x36b   : > { %v3659_v36 = vpop.f32.mrb[77].mxu1 }
 0x36c   : > { %v2470_v39 = vpop.f32.mrb[78].mxu1 }
 0x36d   : > { %v3660_v45 = vpop.f32.mrb[79].mxu1 }
 0x36e   : > { %v2060_v46 = vpop.f32.mrb[60].mxu0 }
 0x36f   : > { %v4480_v49 = vadd.f32 %v2115_v27, %v2060_v46  ;;  %v3587_v51 = vpop.f32.mrb[61].mxu0  ;;  %v3817_v46 = vld [vmem:[%s4550_s6 + $0x30] sm:$0xff]  }
 0x370   : > { %v2063_v52 = vpop.f32.mrb[62].mxu0 }
 0x371   : > { %v3588_v54 = vpop.f32.mrb[63].mxu0 }
 0x376   : > { %v2161_v55 = vpop.f32.mrb[64].mxu0 }
 0x377   : > { %v2202_v56 = vadd.f32 %v2201_v16, %v2161_v55  ;;  %v3603_v57 = vpop.f32.mrb[65].mxu0 }
 0x378   : > { %v2164_v59 = vpop.f32.mrb[66].mxu0 }
 0x379   : > { %v3604_v60 = vpop.f32.mrb[67].mxu0 }
 0x37e   : > { %v2246_v62 = vpop.f32.mrb[68].mxu0 }
 0x37f   : > { %v2252_v63 = vadd.f32 %v2246_v62, %v2202_v56  ;;  %v3619_v0 = vpop.f32.mrb[69].mxu0 }
 0x380   : > { %v2249_v1 = vpop.f32.mrb[70].mxu0 }
 0x381   : > { %v3620_v2 = vpop.f32.mrb[71].mxu0  ;;  %v2293_v3 = vadd.f32 %v2287_v41, %v2252_v63  ;;  %v3820_v41 = vld [vmem:[%s4548_s4 + $0x8] sm:$0xff]  }
 0x386   : > { %v2334_v5 = vpop.f32.mrb[72].mxu0 }
 0x387   : > { %v2340_v7 = vadd.f32 %v2334_v5, %v2293_v3  ;;  %v3635_v8 = vpop.f32.mrb[73].mxu0 }
 0x388   : > { %v2337_v9 = vpop.f32.mrb[74].mxu0 }
 0x389   : > { %v3636_v10 = vpop.f32.mrb[75].mxu0  ;;  %v2386_v11 = vadd.f32 %v2380_v28, %v2340_v7 }
 0x38e   : > { %v2421_v48 = vpop.f32.mrb[76].mxu0 }
 0x38f   : > { %v2427_v13 = vadd.f32 %v2421_v48, %v2386_v11  ;;  %v3651_v43 = vpop.f32.mrb[77].mxu0 }
 0x390   : > { %v2424_v14 = vpop.f32.mrb[78].mxu0 }
 0x391   : > { %v3652_v44 = vpop.f32.mrb[79].mxu0  ;;  %v2473_v61 = vadd.f32 %v2467_v26, %v2427_v13 }
 0x396   : > { %v2513_v15 = vpop.f32.mrb[80].mxu0 }
 0x397   : > { %v2519_v22 = vadd.f32 %v2513_v15, %v2473_v61  ;;  %v3667_v58 = vpop.f32.mrb[81].mxu0 }
 0x398   : > { %v2516_v23 = vpop.f32.mrb[82].mxu0 }
 0x399   : > { %v2520_v25 = vadd.f32 %v4356_v53, %v2519_v22  ;;  %v3668_v27 = vpop.f32.mrb[83].mxu0 }
 0x39a   : > { %v3248_v27 = vld [vmem:[%s4551_s7] ss:$0 sm:$0xff] }
 0x39b   : > { %v2521_v29 = vmax.f32 %v2520_v25, 0.0 }
 0x39d   : > { %v2522_v33 = vpack.c.bf16 %v2521_v29, %v2521_v29 }
 0x39e   : > { %v2622_v34 = vpop.f32.mrb[84].mxu0 }
 0x39f   : > { %3674 = vmatmul.mubr.msk.bf16.vlgmr.msra.gmra.mrb[80].mxu1 %vm1057_vm3, %v2522_v33  ;;  %v3683_v16 = vpop.f32.mrb[85].mxu0 }
 0x3a0   : > { %v2625_v18 = vpop.f32.mrb[86].mxu0  ;;  %3686 = vmatpush3.bf16.msra.mxu1 %v3819_v19  ;;  %3689 = vmatprep.mubr.msk.bf16.mxu1 %vm3831_vm1, %v3830_v6  ;;  %v3052_v19 = vld [vmem:[%s4552_s8] sm:$0x3f] }
 0x3a1   : > { %v3684_v21 = vpop.f32.mrb[87].mxu0  ;;  %3687 = vmatprep.subr.bf16.mxu1 %v3830_v6 }
 0x3a4   : > { %3688 = vmatpush3.bf16.msra.mxu1 %v3820_v41 }
 0x3a5   : > { %3701 = vmatprep.subr.bf16.mxu1 %v3830_v6 }
 0x3a6   : > { %v2705_v50 = vpop.f32.mrb[88].mxu0 }
 0x3a7   : > { %3690 = vmatmul.mubr.msk.bf16.vlgmr.msra.gmra.mrb[84].mxu1 %vm1057_vm3, %v4376_v37  ;;  %v3699_v24 = vpop.f32.mrb[89].mxu0 }
 0x3a8   : > { %v2708_v42 = vpop.f32.mrb[90].mxu0  ;;  %3702 = vmatpush3.bf16.msra.mxu1 %v4097_v4  ;;  %3705 = vmatprep.mubr.msk.bf16.mxu1 %vm3831_vm1, %v3830_v6  ;;  %v1030_v4 = vmax.f32 %v4177_v20, 0.0 }
 0x3a9   : > { %v3700_v28 = vpop.f32.mrb[91].mxu0  ;;  %3703 = vmatprep.subr.bf16.mxu1 %v3830_v6 }
 0x3ac   : > { %3704 = vmatpush3.bf16.msra.mxu1 %v4106_v12  ;;  %v1033_v12 = vpack.c.bf16 %v1030_v4, %v1030_v4 }
 0x3ad   : > { %3717 = vmatprep.subr.bf16.mxu1 %v3830_v6 }
 0x3ae   : > { %v2792_v31 = vpop.f32.mrb[92].mxu0 }
 0x3af   : > { %3706 = vmatmul.mubr.msk.bf16.vlgmr.msra.gmra.mrb[88].mxu1 %vm1057_vm3, %v4384_v40  ;;  %v3715_v35 = vpop.f32.mrb[93].mxu0 }
 0x3b0   : > { %v2795_v37 = vpop.f32.mrb[94].mxu0  ;;  %3718 = vmatpush3.bf16.msra.mxu1 %v4130_v38  ;;  %3721 = vmatprep.mubr.msk.bf16.mxu1 %vm3831_vm1, %v3830_v6 }
 0x3b1   : > { %v3716_v17 = vpop.f32.mrb[95].mxu0  ;;  %3719 = vmatprep.subr.bf16.mxu1 %v3830_v6 }
 0x3b4   : > { %3720 = vmatpush3.bf16.msra.mxu1 %v4143_v47  ;;  %v2885_v47 = vpop.permute.xlu1 %2884 }
 0x3b5   : > { %3733 = vmatprep.subr.bf16.mxu1 %v3830_v6 }
 0x3b6   : > { %v2877_v26 = vpop.f32.mrb[96].mxu0 }
 0x3b7   : > { %3722 = vmatmul.mubr.msk.bf16.vlgmr.msra.gmra.mrb[92].mxu1 %vm1057_vm3, %v1033_v12  ;;  %v3731_v40 = vpop.f32.mrb[97].mxu0 }
 0x3b8   : > { %v2880_v36 = vpop.f32.mrb[98].mxu0  ;;  %3734 = vmatpush3.bf16.msra.mxu1 %v4228_v30  ;;  %3737 = vmatprep.mubr.msk.bf16.mxu1 %vm3831_vm1, %v3830_v6 }
 0x3b9   : > { %v3732_v38 = vpop.f32.mrb[99].mxu0  ;;  %3735 = vmatprep.subr.bf16.mxu1 %v3830_v6 }
 0x3bc   : > { %3736 = vmatpush3.bf16.msra.mxu1 %v4239_v32  ;;  %v3818_v32 = vld [vmem:[%s4550_s6 + $0x38] sm:$0xff]  }
 0x3bd   : > { %3749 = vmatprep.subr.bf16.mxu1 %v3830_v6 }
 0x3be   : > { %v2973_v20 = vpop.f32.mrb[100].mxu0 }
 0x3bf   : > { %3738 = vmatmul.mubr.msk.bf16.vlgmr.msra.gmra.mrb[96].mxu1 %vm1057_vm3, %v2885_v47  ;;  %v3747_v39 = vpop.f32.mrb[101].mxu0 }
 0x3c0   : > { %v2976_v45 = vpop.f32.mrb[102].mxu0  ;;  %3753 = vmatprep.mubr.msk.bf16.mxu1 %vm3831_vm1, %v3830_v6  ;;  %3750 = vmatpush3.bf16.msra.mxu1 %v3817_v46 }
 0x3c1   : > { %v3748_v30 = vpop.f32.mrb[103].mxu0  ;;  %3751 = vmatprep.subr.bf16.mxu1 %v3830_v6 }
 0x3c4   : > { %3752 = vmatpush3.bf16.msra.mxu1 %v3818_v32 }
 0x472   : > { %v2576_v51 = vpop.f32.mrb[80].mxu1 }
 0x473   : > { %v2582_v52 = vadd.f32 %v2576_v51, %v4480_v49  ;;  %v3675_v54 = vpop.f32.mrb[81].mxu1 }
 0x474   : > { %v2579_v55 = vpop.f32.mrb[82].mxu1 }
 0x475   : > { %v3676_v56 = vpop.f32.mrb[83].mxu1 }
 0x47a   : > { %v2662_v57 = vpop.f32.mrb[84].mxu1 }
 0x47b   : > { %v2663_v59 = vadd.f32 %v2662_v57, %v2622_v34  ;;  %v3691_v60 = vpop.f32.mrb[85].mxu1 }
 0x47c   : > { %v2665_v62 = vpop.f32.mrb[86].mxu1 }
 0x47d   : > { %v3692_v63 = vpop.f32.mrb[87].mxu1  ;;  %v2711_v0 = vadd.f32 %v2705_v50, %v2663_v59 }
 0x482   : > { %v2746_v1 = vpop.f32.mrb[88].mxu1 }
 0x483   : > { %v2752_v2 = vadd.f32 %v2746_v1, %v2711_v0  ;;  %v3707_v6 = vpop.f32.mrb[89].mxu1 }
 0x484   : > { %v2749_v3 = vpop.f32.mrb[90].mxu1 }
 0x485   : > { %v3708_v5 = vpop.f32.mrb[91].mxu1  ;;  %v2798_v7 = vadd.f32 %v2792_v31, %v2752_v2 }
 0x48a   : > { %v2836_v8 = vpop.f32.mrb[92].mxu1 }
 0x48b   : > { %v2842_v9 = vadd.f32 %v2836_v8, %v2798_v7  ;;  %v3723_v10 = vpop.f32.mrb[93].mxu1 }
 0x48c   : > { %v2839_v11 = vpop.f32.mrb[94].mxu1 }
 0x48d   : > { %v3724_v49 = vpop.f32.mrb[95].mxu1  ;;  %v2883_v48 = vadd.f32 %v2877_v26, %v2842_v9 }
 0x492   : > { %v2923_v13 = vpop.f32.mrb[96].mxu1 }
 0x493   : > { %v2929_v43 = vadd.f32 %v2923_v13, %v2883_v48  ;;  %v3739_v14 = vpop.f32.mrb[97].mxu1 }
 0x494   : > { %v2926_v44 = vpop.f32.mrb[98].mxu1 }
 0x495   : > { %v2979_v61 = vadd.f32 %v2973_v20, %v2929_v43  ;;  %v3740_v15 = vpop.f32.mrb[99].mxu1 }
 0x497   : > { %v2980_v22 = vadd.f32 %v4356_v53, %v2979_v61 }
 0x499   : > { %v2981_v58 = vmax.f32 %v2980_v22, 0.0 }
 0x49b   : > { %v2982_v23 = vpack.c.bf16 %v2981_v58, %v2981_v58 }
 0x49d   : > { %3754 = vmatmul.mubr.msk.bf16.vlgmr.msra.gmra.mrb[100].mxu1 %vm1057_vm3, %v2982_v23 }
 0x570   : > { %v3036_v25 = vpop.f32.mrb[100].mxu1 }
 0x571   : > { %v3042_v29 = vadd.f32 %v3036_v25, %v2582_v52  ;;  %v3755_v33 = vpop.f32.mrb[101].mxu1 }
 0x572   : > { %v3039_v34 = vpop.f32.mrb[102].mxu1 }
 0x573   : > { %v3050_v16 = vadd.f32 %v3248_v27, %v3042_v29  ;;  %v3756_v18 = vpop.f32.mrb[103].mxu1 }
 0x575   : > { %v3051_v53 = vmul.f32 5.656854, %v3050_v16 }
 0x577   : > { %v3053_v21 = vadd.f32 %v3052_v19, %v3051_v53 }
 0x579   : > { %3055 = vst.msk [vmem:[%s350_s24] sm:$0x3f] %vm3054_vm4, %v3053_v21 }
 0x57a PF: > { %s19_s30 = sadd.s32 1, %s3827_s30  }
 0x57b   : > { %p16_p4 = scmp.ge.s32.totalorder %s19_s30, 4  }
 0x57d   :  { %18 = sbr.rel (!%p16_p4) target bundleno = 1 (0x1), region = 95 }

</bundles_post_ra>
